<compile_context>
chip_gen: v7x
topology: tpu7x:2x2x1
jax: 0.10.0
libtpu: 0.0.40
codegen_flags: <defaults>
</compile_context>

<pallas_src>
import functools
import numpy as np
import jax
import jax.numpy as jnp
from jax.experimental import pallas as pl
from jax.experimental.pallas import tpu as pltpu

LANE = 128
SUBLANE = 8
ACT_DTYPE = jnp.bfloat16   # inter-block activation / MXU operand dtype


def _round_up(x, m):
    return ((x + m - 1) // m) * m


def _vmem_limit_bytes():
    """Per-generation scoped-VMEM budget: ~3/4 of physical, capped at 96 MiB
    (=> ~96 MiB on v5e/v6e's 128 MiB, ~48 MiB on v7x's 64 MiB per TC)."""
    try:
        info = pltpu.get_tpu_info()
        cap = None
        for name in ("vmem_capacity_bytes", "vmem_size_bytes", "vmem_bytes"):
            cap = getattr(info, name, None)
            if cap:
                break
        if not cap:
            return 48 * 1024 * 1024
        return int(min((3 * int(cap)) // 4, 96 * 1024 * 1024))
    except Exception:
        return 48 * 1024 * 1024


# ----------------------------- fused MBConv kernel --------------------------

def _fused_mbconv_kernel(x_ref, pw_w_ref, pw_sh_ref, dw_w_ref, dw_sh_ref,
                         pwl_w_ref, pwl_sh_ref, o_ref, ssum_ref,
                         xpad_scr, z_scr, *, H, W, K, left):
    """pw-expand -> dw KxK -> pw-linear, fully in VMEM for one image tile.

    x_ref:      (1, H, W, Cin_p)   activation tile (ACT_DTYPE)
    pw_w_ref:   (Cin_p, Cexp_p)    1x1 expand weights, BN scale pre-folded (bf16)
    pw_sh_ref:  (1, Cexp_p)        folded-BN shift, f32
    dw_w_ref:   (K*K, Cexp_p)      depthwise taps, BN scale pre-folded, f32
    dw_sh_ref:  (1, Cexp_p)        folded-BN shift, f32
    pwl_w_ref:  (Cexp_p, Cout_p)   1x1 linear weights, BN scale * mask pre-folded (bf16)
    pwl_sh_ref: (1, Cout_p)        folded-BN shift * mask, f32
    o_ref:      (1, H, W, Cout_p)  output tile (ACT_DTYPE)
    ssum_ref:   (1, 1, Cout_p)     per-image spatial sum of the output (f32)
    xpad_scr:   (H+2p, W_slab, Cexp_p) f32 zero-halo slab for the dw taps
    z_scr:      (H, W, Cexp_p)     bf16 staging of the dw output
    """
    pad = K // 2
    Cin_p = x_ref.shape[-1]
    Cexp_p = pw_w_ref.shape[-1]
    Cout_p = pwl_w_ref.shape[-1]
    col0 = left - pad              # first slab column read by the kw=0 tap
    col1 = left + W + pad          # one past last column read by kw=K-1

    # ---- 1) 1x1 expand (MXU) + folded-BN shift + ReLU ----
    x2d = x_ref[...].reshape(H * W, Cin_p)
    y = jnp.dot(x2d, pw_w_ref[...], preferred_element_type=jnp.float32)
    y = jnp.maximum(y + pw_sh_ref[...], 0.0)

    # ---- 2) stage expanded activation into the zero-halo VMEM slab ----
    # Zero only the thin halo strips read by the taps (no full-slab memset).
    if pad > 0:
        zero_row = jnp.zeros((pad, col1 - col0, Cexp_p), jnp.float32)
        xpad_scr[0:pad, col0:col1, :] = zero_row                    # top
        xpad_scr[pad + H:2 * pad + H, col0:col1, :] = zero_row      # bottom
        zero_col = jnp.zeros((H, pad, Cexp_p), jnp.float32)
        xpad_scr[pad:pad + H, col0:left, :] = zero_col              # left
        xpad_scr[pad:pad + H, left + W:col1, :] = zero_col          # right
    # Interior write starts at a sublane-aligned column (left % 8 == 0).
    xpad_scr[pad:pad + H, left:left + W, :] = y.reshape(H, W, Cexp_p)

    # ---- 3) KxK depthwise (VPU) + folded-BN shift + ReLU, strip-mined ----
    # One output row at a time keeps the accumulator register-resident; each
    # row ends in a ref store, bounding live ranges in the unrolled loop.
    # TODO(synk): a pltpu.roll-based variant would move the kw sublane shifts
    # onto the (idle) XLU slot.
    dw_w = dw_w_ref[...]                               # (K*K, Cexp_p) f32
    taps = [dw_w[i:i + 1, :] for i in range(K * K)]    # (1, Cexp_p) each
    dw_sh = dw_sh_ref[...]                             # (1, Cexp_p)
    for h in range(H):
        rows = [xpad_scr[h + kh] for kh in range(K)]   # (W_slab, Cexp_p) f32
        acc = None
        for kh in range(K):
            for kw in range(K):
                sl = rows[kh][col0 + kw:col0 + kw + W, :]
                term = sl * taps[kh * K + kw]
                acc = term if acc is None else acc + term
        zrow = jnp.maximum(acc + dw_sh, 0.0)
        z_scr[h, :, :] = zrow.astype(z_scr.dtype)

    # ---- 4) 1x1 linear (MXU) + folded-BN/mask shift + fused student sum ----
    z2d = z_scr[...].reshape(H * W, Cexp_p)
    out = jnp.dot(z2d, pwl_w_ref[...], preferred_element_type=jnp.float32)
    out = out + pwl_sh_ref[...]
    o_ref[...] = out.reshape(1, H, W, Cout_p).astype(o_ref.dtype)
    # Spatial sum for the KL logits, while the data is still in vregs.
    ssum_ref[...] = jnp.sum(out, axis=0).reshape(1, 1, Cout_p)


def fused_mbconv(x_nhwc_p, pw_w, pw_sh, dw_w, dw_sh, pwl_w, pwl_sh, K=3):
    N, H, W, Cin_p = x_nhwc_p.shape
    Cexp_p = pw_w.shape[1]
    Cout_p = pwl_w.shape[1]
    pad = K // 2
    # Left halo rounded up to a sublane group -> aligned interior write.
    left = _round_up(max(pad, 1), SUBLANE)
    w_slab = _round_up(left + W + pad, SUBLANE)
    kernel = functools.partial(_fused_mbconv_kernel, H=H, W=W, K=K, left=left)
    out, ssum = pl.pallas_call(
        kernel,
        grid=(N,),
        out_shape=(jax.ShapeDtypeStruct((N, H, W, Cout_p), x_nhwc_p.dtype),
                   jax.ShapeDtypeStruct((N, 1, Cout_p), jnp.float32)),
        in_specs=[
            pl.BlockSpec((1, H, W, Cin_p), lambda n: (n, 0, 0, 0)),
            # Grid-resident weights / shifts (constant index_map).
            # TODO(synk): pipeline_mode=pl.Buffered(1) on v7x to reclaim the
            # redundant double-buffer VMEM for these.
            pl.BlockSpec((Cin_p, Cexp_p), lambda n: (0, 0)),
            pl.BlockSpec((1, Cexp_p), lambda n: (0, 0)),
            pl.BlockSpec((K * K, Cexp_p), lambda n: (0, 0)),
            pl.BlockSpec((1, Cexp_p), lambda n: (0, 0)),
            pl.BlockSpec((Cexp_p, Cout_p), lambda n: (0, 0)),
            pl.BlockSpec((1, Cout_p), lambda n: (0, 0)),
        ],
        out_specs=(
            pl.BlockSpec((1, H, W, Cout_p), lambda n: (n, 0, 0, 0)),
            pl.BlockSpec((1, 1, Cout_p), lambda n: (n, 0, 0)),
        ),
        scratch_shapes=[
            # TODO(synk): bf16 slab / row-tiling with a K-1 halo for v7x's
            # smaller VMEM; f32 kept here (v5e has no bf16 VPU).
            pltpu.VMEM((H + 2 * pad, w_slab, Cexp_p), jnp.float32),
            pltpu.VMEM((H, W, Cexp_p), ACT_DTYPE),
        ],
        compiler_params=pltpu.CompilerParams(
            dimension_semantics=("parallel",),
            vmem_limit_bytes=_vmem_limit_bytes()),
    )(x_nhwc_p, pw_w, pw_sh, dw_w, dw_sh, pwl_w, pwl_sh)
    return out, ssum


# --------------------------- parameter utilities ---------------------------

def _fold_bn(gamma, beta, mean, var, eps=1e-5):
    scale = gamma / jnp.sqrt(var + eps)
    shift = beta - mean * scale
    return scale, shift


def init_block_params(key, cin, cout, exp_rate, k=3):
    """Deterministic, lane-padded parameters for one MBConv-style IRF block.
    BN scales are folded into the weights here (host-side); only shifts are
    carried separately.  The pwl weights stay f32 so the (mask * scale) fold
    can be applied per call before the bf16 cast."""
    cexp = cout * exp_rate
    cin_p = _round_up(cin, LANE)
    cexp_p = _round_up(cexp, LANE)
    cout_p = _round_up(cout, LANE)

    ks = jax.random.split(key, 3)
    pw_w = jax.random.normal(ks[0], (cin, cexp), jnp.float32) / np.sqrt(cin)
    dw_w = jax.random.normal(ks[1], (k, k, cexp), jnp.float32) / float(k)
    pwl_w = jax.random.normal(ks[2], (cexp, cout), jnp.float32) / np.sqrt(cexp)

    def bn(c):
        return _fold_bn(jnp.ones((c,), jnp.float32), jnp.zeros((c,), jnp.float32),
                        jnp.zeros((c,), jnp.float32), jnp.ones((c,), jnp.float32))

    pw_s, pw_b = bn(cexp)
    dw_s, dw_b = bn(cexp)
    pwl_s, pwl_b = bn(cout)

    # Fold BN scales into weights (exact: the affine commutes).
    pw_w = pw_w * pw_s[None, :]
    dw_w = dw_w * dw_s[None, None, :]

    def pad2(w, rows, cols):
        return jnp.pad(w, ((0, rows - w.shape[0]), (0, cols - w.shape[1])))

    def pad_row(v, c):
        # padded channels get shift=0 so they stay exactly zero
        return jnp.pad(v, (0, c - v.shape[0]))[None, :]

    return dict(
        pw_w=pad2(pw_w, cin_p, cexp_p).astype(ACT_DTYPE),
        pw_sh=pad_row(pw_b, cexp_p),
        dw_w=pad2(dw_w.reshape(k * k, cexp), k * k, cexp_p),
        dw_sh=pad_row(dw_b, cexp_p),
        pwl_w_f32=pad2(pwl_w, cexp_p, cout_p),
        pwl_scale=jnp.pad(pwl_s, (0, cout_p - cout)),
        pwl_shift=jnp.pad(pwl_b, (0, cout_p - cout)),
    )


# ------------------------------ block_unit ---------------------------------

def block_unit_forward(x_nhwc_p, teacher_nchw, temperature, params,
                       gs_index, option_step, largest_out_channel,
                       out_H, out_W, exp_rate,
                       effective_input_channel, cost_before, kl_before,
                       dw_k=3):
    """One block_unit: fused MBConv + channel masking + KL + cost."""
    N, H, W, _ = x_nhwc_p.shape
    Cout = largest_out_channel
    Cout_p = params['pwl_w_f32'].shape[1]

    # ---- block_unit.masking: effective channels & mask folded into pwl ----
    eff_out = largest_out_channel - int(gs_index) * option_step
    # mask is {0,1} and commutes through the affine epilogue -> exact fold;
    # it also zeroes the lane-padding channels >= Cout.
    chan_mask = (jnp.arange(Cout_p) < eff_out).astype(jnp.float32)
    pwl_w = (params['pwl_w_f32']
             * (params['pwl_scale'] * chan_mask)[None, :]).astype(ACT_DTYPE)
    pwl_sh = (params['pwl_shift'] * chan_mask)[None, :]

    # ---- fused inverted-residual block (pw -> dw -> pwl) ----
    # TODO(synk): exact `irf_block_from_supernet` internals (BN/activation
    # placement, residual connection, Gumbel-softmax expansion-channel search)
    # are not in the reference source; a standard folded-BN MBConv is used.
    out_p, s_sum = fused_mbconv(x_nhwc_p, params['pw_w'], params['pw_sh'],
                                params['dw_w'], params['dw_sh'],
                                pwl_w, pwl_sh, K=dw_k)

    # ---- KL loss vs teacher output ----
    # TODO(synk): the supernet block's kl_loss definition is not available;
    # approximated as batch-mean KL(teacher || student) over spatially-pooled
    # channel logits at the given temperature.  The student spatial sum comes
    # straight from the kernel (no second HBM read of out_p).
    s_logits = (s_sum[:, 0, :Cout] / float(H * W)) / temperature
    t_logits = jnp.mean(teacher_nchw, axis=(2, 3)) / temperature
    log_p_s = jax.nn.log_softmax(s_logits, axis=-1)
    p_t = jax.nn.softmax(t_logits, axis=-1)
    kl = jnp.sum(p_t * (jnp.log(p_t + 1e-12) - log_p_s)) / N
    kl_after = kl_before + kl

    # ---- block_unit.calculate_irf_block_cost (mirrors the PyTorch source) ----
    pw_cost = out_H * out_W * effective_input_channel * eff_out * exp_rate
    dw_cost = (out_H * out_W * dw_k * dw_k
               * eff_out * exp_rate * eff_out * exp_rate)
    pwl_cost = out_H * out_W * eff_out * eff_out * exp_rate
    cost_after = cost_before + pw_cost + dw_cost + pwl_cost

    return out_p, eff_out, cost_after, kl_after


# ------------------------------ irf_stage ----------------------------------

def irf_stage_forward(x_nchw, all_output_nchw, temperature,
                      effective_channel, cost_accumulate, kl_accumulate,
                      blocks_params, gs_indices, option_step,
                      largest_out_channel, out_H, out_W, exp_rate):
    # NCHW -> NHWC once; pad channels to the 128-lane width once; bf16 carry.
    x = jnp.transpose(x_nchw, (0, 2, 3, 1))
    cin = x.shape[-1]
    cin_p = _round_up(cin, LANE)
    x = jnp.pad(x, ((0, 0), (0, 0), (0, 0), (0, cin_p - cin))).astype(ACT_DTYPE)

    # TODO(synk): fusing adjacent blocks into one kernel would remove the
    # inter-block HBM round-trip of the bf16 NHWC activation.
    for i, params in enumerate(blocks_params):
        x, effective_channel, cost_accumulate, kl_accumulate = block_unit_forward(
            x, all_output_nchw[i], temperature, params, gs_indices[i],
            option_step, largest_out_channel, out_H, out_W, exp_rate,
            effective_channel, cost_accumulate, kl_accumulate)

    # un-pad channels and return in the original NCHW / f32 contract
    out = x[..., :largest_out_channel].astype(jnp.float32)
    out_nchw = jnp.transpose(out, (0, 3, 1, 2))
    return out_nchw, effective_channel, cost_accumulate, kl_accumulate


# --------------------------------- main -------------------------------------

if __name__ == "__main__":
    key = jax.random.PRNGKey(0)
    N, Cin, H, W = 2, 4, 16, 16
    largest_out_channel = 8
    option_number, option_step = 4, 2
    exp_rate = 6
    block_number = 2
    out_H, out_W = H, W
    temperature = 5.0

    k_x, k_t, k_p = jax.random.split(key, 3)
    x = jax.random.normal(k_x, (N, Cin, H, W), jnp.float32)
    # teacher feature maps ("all_output"), one per block, NCHW like PyTorch
    all_output = [jax.random.normal(jax.random.fold_in(k_t, i),
                                    (N, largest_out_channel, H, W), jnp.float32)
                  for i in range(block_number)]

    blocks_params = []
    cin = Cin
    for i in range(block_number):
        blocks_params.append(init_block_params(jax.random.fold_in(k_p, i),
                                               cin, largest_out_channel, exp_rate))
        cin = largest_out_channel

    # deterministic GS_thetas_index per block (the torch buffer is
    # uninitialized in __init__; fixed indices are used here)
    gs_indices = [0, 1]

    out, eff_c, cost, kl = irf_stage_forward(
        x, all_output, temperature,
        effective_channel=Cin, cost_accumulate=0.0,
        kl_accumulate=jnp.float32(0.0),
        blocks_params=blocks_params, gs_indices=gs_indices,
        option_step=option_step, largest_out_channel=largest_out_channel,
        out_H=out_H, out_W=out_W, exp_rate=exp_rate)

    out = jax.block_until_ready(out)
    kl = jax.block_until_ready(kl)
    assert out.shape == (N, largest_out_channel, H, W)
    assert eff_c == largest_out_channel - gs_indices[-1] * option_step
    assert np.isfinite(float(kl)) and np.isfinite(float(cost))
    # masked channels must be exactly zero for the last block (gs_index=1)
    assert np.allclose(np.asarray(out)[:, eff_c:, :, :], 0.0)
    print("KERNEL_OK")
</pallas_src>

<mosaic_0001>
module attributes {stable_mosaic.version = 11 : i64} {
  func.func @_fused_mbconv_kernel(%arg0: i32, %arg1: memref<1x16x16x128xbf16, #tpu.memory_space<vmem>>, %arg2: memref<128x128xbf16, #tpu.memory_space<vmem>>, %arg3: memref<1x128xf32, #tpu.memory_space<vmem>>, %arg4: memref<9x128xf32, #tpu.memory_space<vmem>>, %arg5: memref<1x128xf32, #tpu.memory_space<vmem>>, %arg6: memref<128x128xbf16, #tpu.memory_space<vmem>>, %arg7: memref<1x128xf32, #tpu.memory_space<vmem>>, %arg8: memref<1x16x16x128xbf16, #tpu.memory_space<vmem>>, %arg9: memref<1x1x128xf32, #tpu.memory_space<vmem>>, %arg10: memref<18x32x128xf32, #tpu.memory_space<vmem>>, %arg11: memref<16x16x128xbf16, #tpu.memory_space<vmem>>) attributes {dimension_semantics = [#tpu.dimension_semantics<parallel>], iteration_bounds = array<i64: 2>, scalar_prefetch = 0 : i64, scratch_operands = 2 : i64, tpu.core_type = #tpu.core_type<tc>, window_params = [{transform_indices = @transform_0, window_bounds = array<i64: 1, 16, 16, 128>}, {pipeline_mode = #tpu.pipeline_mode<synchronous>, transform_indices = @transform_1, window_bounds = array<i64: 128, 128>}, {pipeline_mode = #tpu.pipeline_mode<synchronous>, transform_indices = @transform_2, window_bounds = array<i64: 1, 128>}, {pipeline_mode = #tpu.pipeline_mode<synchronous>, transform_indices = @transform_3, window_bounds = array<i64: 9, 128>}, {pipeline_mode = #tpu.pipeline_mode<synchronous>, transform_indices = @transform_4, window_bounds = array<i64: 1, 128>}, {pipeline_mode = #tpu.pipeline_mode<synchronous>, transform_indices = @transform_5, window_bounds = array<i64: 128, 128>}, {pipeline_mode = #tpu.pipeline_mode<synchronous>, transform_indices = @transform_6, window_bounds = array<i64: 1, 128>}, {transform_indices = @transform_7, window_bounds = array<i64: 1, 16, 16, 128>}, {transform_indices = @transform_8, window_bounds = array<i64: 1, 1, 128>}]} {
    %c0 = arith.constant 0 : index
    %c0_0 = arith.constant 0 : index
    %c0_1 = arith.constant 0 : index
    %c0_2 = arith.constant 0 : index
    %0 = vector.load %arg1[%c0, %c0_0, %c0_1, %c0_2] : memref<1x16x16x128xbf16, #tpu.memory_space<vmem>>, vector<1x16x16x128xbf16>
    %1 = vector.shape_cast %0 : vector<1x16x16x128xbf16> to vector<256x128xbf16>
    %c0_3 = arith.constant 0 : index
    %c0_4 = arith.constant 0 : index
    %2 = vector.load %arg2[%c0_3, %c0_4] : memref<128x128xbf16, #tpu.memory_space<vmem>>, vector<128x128xbf16>
    %cst = arith.constant dense<0.000000e+00> : vector<256x128xf32>
    %3 = tpu.matmul %1, %2, %cst {dimension_numbers = #tpu.dot_dimension_numbers<[1], [0], [0], [1], [0, 0, 1, 1], [], []>} : vector<256x128xbf16>, vector<128x128xbf16>, vector<256x128xf32> -> vector<256x128xf32>
    %c0_5 = arith.constant 0 : index
    %c0_6 = arith.constant 0 : index
    %4 = vector.load %arg3[%c0_5, %c0_6] : memref<1x128xf32, #tpu.memory_space<vmem>>, vector<1x128xf32>
    %5 = vector.broadcast %4 : vector<1x128xf32> to vector<256x128xf32>
    %6 = arith.addf %3, %5 : vector<256x128xf32>
    %cst_7 = arith.constant 0.000000e+00 : f32
    %7 = vector.broadcast %cst_7 : f32 to vector<256x128xf32>
    %8 = arith.maximumf %6, %7 : vector<256x128xf32>
    %cst_8 = arith.constant 0.000000e+00 : f32
    %9 = vector.broadcast %cst_8 : f32 to vector<1x18x128xf32>
    %c0_9 = arith.constant 0 : index
    %c7 = arith.constant 7 : index
    %c0_10 = arith.constant 0 : index
    %10 = vector.load %arg10[%c0_9, %c7, %c0_10] : memref<18x32x128xf32, #tpu.memory_space<vmem>>, vector<1x18x128xf32>
    tpu.vector_store %arg10[%c0_9, %c7, %c0_10], %9 {strides = array<i32>} : memref<18x32x128xf32, #tpu.memory_space<vmem>>, vector<1x18x128xf32>,
    %c17 = arith.constant 17 : index
    %c7_11 = arith.constant 7 : index
    %c0_12 = arith.constant 0 : index
    %11 = vector.load %arg10[%c17, %c7_11, %c0_12] : memref<18x32x128xf32, #tpu.memory_space<vmem>>, vector<1x18x128xf32>
    tpu.vector_store %arg10[%c17, %c7_11, %c0_12], %9 {strides = array<i32>} : memref<18x32x128xf32, #tpu.memory_space<vmem>>, vector<1x18x128xf32>,
    %cst_13 = arith.constant 0.000000e+00 : f32
    %12 = vector.broadcast %cst_13 : f32 to vector<16x1x128xf32>
    %c1 = arith.constant 1 : index
    %c7_14 = arith.constant 7 : index
    %c0_15 = arith.constant 0 : index
    %13 = vector.load %arg10[%c1, %c7_14, %c0_15] : memref<18x32x128xf32, #tpu.memory_space<vmem>>, vector<16x1x128xf32>
    tpu.vector_store %arg10[%c1, %c7_14, %c0_15], %12 {strides = array<i32>} : memref<18x32x128xf32, #tpu.memory_space<vmem>>, vector<16x1x128xf32>,
    %c1_16 = arith.constant 1 : index
    %c24 = arith.constant 24 : index
    %c0_17 = arith.constant 0 : index
    %14 = vector.load %arg10[%c1_16, %c24, %c0_17] : memref<18x32x128xf32, #tpu.memory_space<vmem>>, vector<16x1x128xf32>
    tpu.vector_store %arg10[%c1_16, %c24, %c0_17], %12 {strides = array<i32>} : memref<18x32x128xf32, #tpu.memory_space<vmem>>, vector<16x1x128xf32>,
    %15 = vector.shape_cast %8 : vector<256x128xf32> to vector<16x16x128xf32>
    %c1_18 = arith.constant 1 : index
    %c8 = arith.constant 8 : index
    %c0_19 = arith.constant 0 : index
    %16 = vector.load %arg10[%c1_18, %c8, %c0_19] : memref<18x32x128xf32, #tpu.memory_space<vmem>>, vector<16x16x128xf32>
    tpu.vector_store %arg10[%c1_18, %c8, %c0_19], %15 {strides = array<i32>} : memref<18x32x128xf32, #tpu.memory_space<vmem>>, vector<16x16x128xf32>,
    %c0_20 = arith.constant 0 : index
    %c0_21 = arith.constant 0 : index
    %17 = vector.load %arg4[%c0_20, %c0_21] : memref<9x128xf32, #tpu.memory_space<vmem>>, vector<9x128xf32>
    %18 = vector.extract_strided_slice %17 {offsets = [0, 0], sizes = [1, 128], strides = [1, 1]} : vector<9x128xf32> to vector<1x128xf32>
    %19 = vector.extract_strided_slice %17 {offsets = [1, 0], sizes = [1, 128], strides = [1, 1]} : vector<9x128xf32> to vector<1x128xf32>
    %20 = vector.extract_strided_slice %17 {offsets = [2, 0], sizes = [1, 128], strides = [1, 1]} : vector<9x128xf32> to vector<1x128xf32>
    %21 = vector.extract_strided_slice %17 {offsets = [3, 0], sizes = [1, 128], strides = [1, 1]} : vector<9x128xf32> to vector<1x128xf32>
    %22 = vector.extract_strided_slice %17 {offsets = [4, 0], sizes = [1, 128], strides = [1, 1]} : vector<9x128xf32> to vector<1x128xf32>
    %23 = vector.extract_strided_slice %17 {offsets = [5, 0], sizes = [1, 128], strides = [1, 1]} : vector<9x128xf32> to vector<1x128xf32>
    %24 = vector.extract_strided_slice %17 {offsets = [6, 0], sizes = [1, 128], strides = [1, 1]} : vector<9x128xf32> to vector<1x128xf32>
    %25 = vector.extract_strided_slice %17 {offsets = [7, 0], sizes = [1, 128], strides = [1, 1]} : vector<9x128xf32> to vector<1x128xf32>
    %26 = vector.extract_strided_slice %17 {offsets = [8, 0], sizes = [1, 128], strides = [1, 1]} : vector<9x128xf32> to vector<1x128xf32>
    %c0_22 = arith.constant 0 : index
    %c0_23 = arith.constant 0 : index
    %27 = vector.load %arg5[%c0_22, %c0_23] : memref<1x128xf32, #tpu.memory_space<vmem>>, vector<1x128xf32>
    %c0_24 = arith.constant 0 : index
    %c0_25 = arith.constant 0 : index
    %c0_26 = arith.constant 0 : index
    %28 = vector.load %arg10[%c0_24, %c0_25, %c0_26] : memref<18x32x128xf32, #tpu.memory_space<vmem>>, vector<1x32x128xf32>
    %29 = vector.shape_cast %28 : vector<1x32x128xf32> to vector<32x128xf32>
    %c1_27 = arith.constant 1 : index
    %c0_28 = arith.constant 0 : index
    %c0_29 = arith.constant 0 : index
    %30 = vector.load %arg10[%c1_27, %c0_28, %c0_29] : memref<18x32x128xf32, #tpu.memory_space<vmem>>, vector<1x32x128xf32>
    %31 = vector.shape_cast %30 : vector<1x32x128xf32> to vector<32x128xf32>
    %c2 = arith.constant 2 : index
    %c0_30 = arith.constant 0 : index
    %c0_31 = arith.constant 0 : index
    %32 = vector.load %arg10[%c2, %c0_30, %c0_31] : memref<18x32x128xf32, #tpu.memory_space<vmem>>, vector<1x32x128xf32>
    %33 = vector.shape_cast %32 : vector<1x32x128xf32> to vector<32x128xf32>
    %34 = vector.extract_strided_slice %29 {offsets = [7, 0], sizes = [16, 128], strides = [1, 1]} : vector<32x128xf32> to vector<16x128xf32>
    %35 = vector.broadcast %18 : vector<1x128xf32> to vector<16x128xf32>
    %36 = arith.mulf %34, %35 : vector<16x128xf32>
    %37 = vector.extract_strided_slice %29 {offsets = [8, 0], sizes = [16, 128], strides = [1, 1]} : vector<32x128xf32> to vector<16x128xf32>
    %38 = vector.broadcast %19 : vector<1x128xf32> to vector<16x128xf32>
    %39 = arith.mulf %37, %38 : vector<16x128xf32>
    %40 = arith.addf %36, %39 : vector<16x128xf32>
    %41 = vector.extract_strided_slice %29 {offsets = [9, 0], sizes = [16, 128], strides = [1, 1]} : vector<32x128xf32> to vector<16x128xf32>
    %42 = vector.broadcast %20 : vector<1x128xf32> to vector<16x128xf32>
    %43 = arith.mulf %41, %42 : vector<16x128xf32>
    %44 = arith.addf %40, %43 : vector<16x128xf32>
    %45 = vector.extract_strided_slice %31 {offsets = [7, 0], sizes = [16, 128], strides = [1, 1]} : vector<32x128xf32> to vector<16x128xf32>
    %46 = vector.broadcast %21 : vector<1x128xf32> to vector<16x128xf32>
    %47 = arith.mulf %45, %46 : vector<16x128xf32>
    %48 = arith.addf %44, %47 : vector<16x128xf32>
    %49 = vector.extract_strided_slice %31 {offsets = [8, 0], sizes = [16, 128], strides = [1, 1]} : vector<32x128xf32> to vector<16x128xf32>
    %50 = vector.broadcast %22 : vector<1x128xf32> to vector<16x128xf32>
    %51 = arith.mulf %49, %50 : vector<16x128xf32>
    %52 = arith.addf %48, %51 : vector<16x128xf32>
    %53 = vector.extract_strided_slice %31 {offsets = [9, 0], sizes = [16, 128], strides = [1, 1]} : vector<32x128xf32> to vector<16x128xf32>
    %54 = vector.broadcast %23 : vector<1x128xf32> to vector<16x128xf32>
    %55 = arith.mulf %53, %54 : vector<16x128xf32>
    %56 = arith.addf %52, %55 : vector<16x128xf32>
    %57 = vector.extract_strided_slice %33 {offsets = [7, 0], sizes = [16, 128], strides = [1, 1]} : vector<32x128xf32> to vector<16x128xf32>
    %58 = vector.broadcast %24 : vector<1x128xf32> to vector<16x128xf32>
    %59 = arith.mulf %57, %58 : vector<16x128xf32>
    %60 = arith.addf %56, %59 : vector<16x128xf32>
    %61 = vector.extract_strided_slice %33 {offsets = [8, 0], sizes = [16, 128], strides = [1, 1]} : vector<32x128xf32> to vector<16x128xf32>
    %62 = vector.broadcast %25 : vector<1x128xf32> to vector<16x128xf32>
    %63 = arith.mulf %61, %62 : vector<16x128xf32>
    %64 = arith.addf %60, %63 : vector<16x128xf32>
    %65 = vector.extract_strided_slice %33 {offsets = [9, 0], sizes = [16, 128], strides = [1, 1]} : vector<32x128xf32> to vector<16x128xf32>
    %66 = vector.broadcast %26 : vector<1x128xf32> to vector<16x128xf32>
    %67 = arith.mulf %65, %66 : vector<16x128xf32>
    %68 = arith.addf %64, %67 : vector<16x128xf32>
    %69 = vector.broadcast %27 : vector<1x128xf32> to vector<16x128xf32>
    %70 = arith.addf %68, %69 : vector<16x128xf32>
    %cst_32 = arith.constant 0.000000e+00 : f32
    %71 = vector.broadcast %cst_32 : f32 to vector<16x128xf32>
    %72 = arith.maximumf %70, %71 : vector<16x128xf32>
    %73 = arith.truncf %72 : vector<16x128xf32> to vector<16x128xbf16>
    %c0_33 = arith.constant 0 : index
    %c0_34 = arith.constant 0 : index
    %c0_35 = arith.constant 0 : index
    %74 = vector.load %arg11[%c0_33, %c0_34, %c0_35] : memref<16x16x128xbf16, #tpu.memory_space<vmem>>, vector<1x16x128xbf16>
    %75 = vector.shape_cast %74 : vector<1x16x128xbf16> to vector<16x128xbf16>
    %76 = vector.shape_cast %73 : vector<16x128xbf16> to vector<1x16x128xbf16>
    tpu.vector_store %arg11[%c0_33, %c0_34, %c0_35], %76 {strides = array<i32>} : memref<16x16x128xbf16, #tpu.memory_space<vmem>>, vector<1x16x128xbf16>,
    %c1_36 = arith.constant 1 : index
    %c0_37 = arith.constant 0 : index
    %c0_38 = arith.constant 0 : index
    %77 = vector.load %arg10[%c1_36, %c0_37, %c0_38] : memref<18x32x128xf32, #tpu.memory_space<vmem>>, vector<1x32x128xf32>
    %78 = vector.shape_cast %77 : vector<1x32x128xf32> to vector<32x128xf32>
    %c2_39 = arith.constant 2 : index
    %c0_40 = arith.constant 0 : index
    %c0_41 = arith.constant 0 : index
    %79 = vector.load %arg10[%c2_39, %c0_40, %c0_41] : memref<18x32x128xf32, #tpu.memory_space<vmem>>, vector<1x32x128xf32>
    %80 = vector.shape_cast %79 : vector<1x32x128xf32> to vector<32x128xf32>
    %c3 = arith.constant 3 : index
    %c0_42 = arith.constant 0 : index
    %c0_43 = arith.constant 0 : index
    %81 = vector.load %arg10[%c3, %c0_42, %c0_43] : memref<18x32x128xf32, #tpu.memory_space<vmem>>, vector<1x32x128xf32>
    %82 = vector.shape_cast %81 : vector<1x32x128xf32> to vector<32x128xf32>
    %83 = vector.extract_strided_slice %78 {offsets = [7, 0], sizes = [16, 128], strides = [1, 1]} : vector<32x128xf32> to vector<16x128xf32>
    %84 = vector.broadcast %18 : vector<1x128xf32> to vector<16x128xf32>
    %85 = arith.mulf %83, %84 : vector<16x128xf32>
    %86 = vector.extract_strided_slice %78 {offsets = [8, 0], sizes = [16, 128], strides = [1, 1]} : vector<32x128xf32> to vector<16x128xf32>
    %87 = vector.broadcast %19 : vector<1x128xf32> to vector<16x128xf32>
    %88 = arith.mulf %86, %87 : vector<16x128xf32>
    %89 = arith.addf %85, %88 : vector<16x128xf32>
    %90 = vector.extract_strided_slice %78 {offsets = [9, 0], sizes = [16, 128], strides = [1, 1]} : vector<32x128xf32> to vector<16x128xf32>
    %91 = vector.broadcast %20 : vector<1x128xf32> to vector<16x128xf32>
    %92 = arith.mulf %90, %91 : vector<16x128xf32>
    %93 = arith.addf %89, %92 : vector<16x128xf32>
    %94 = vector.extract_strided_slice %80 {offsets = [7, 0], sizes = [16, 128], strides = [1, 1]} : vector<32x128xf32> to vector<16x128xf32>
    %95 = vector.broadcast %21 : vector<1x128xf32> to vector<16x128xf32>
    %96 = arith.mulf %94, %95 : vector<16x128xf32>
    %97 = arith.addf %93, %96 : vector<16x128xf32>
    %98 = vector.extract_strided_slice %80 {offsets = [8, 0], sizes = [16, 128], strides = [1, 1]} : vector<32x128xf32> to vector<16x128xf32>
    %99 = vector.broadcast %22 : vector<1x128xf32> to vector<16x128xf32>
    %100 = arith.mulf %98, %99 : vector<16x128xf32>
    %101 = arith.addf %97, %100 : vector<16x128xf32>
    %102 = vector.extract_strided_slice %80 {offsets = [9, 0], sizes = [16, 128], strides = [1, 1]} : vector<32x128xf32> to vector<16x128xf32>
    %103 = vector.broadcast %23 : vector<1x128xf32> to vector<16x128xf32>
    %104 = arith.mulf %102, %103 : vector<16x128xf32>
    %105 = arith.addf %101, %104 : vector<16x128xf32>
    %106 = vector.extract_strided_slice %82 {offsets = [7, 0], sizes = [16, 128], strides = [1, 1]} : vector<32x128xf32> to vector<16x128xf32>
    %107 = vector.broadcast %24 : vector<1x128xf32> to vector<16x128xf32>
    %108 = arith.mulf %106, %107 : vector<16x128xf32>
    %109 = arith.addf %105, %108 : vector<16x128xf32>
    %110 = vector.extract_strided_slice %82 {offsets = [8, 0], sizes = [16, 128], strides = [1, 1]} : vector<32x128xf32> to vector<16x128xf32>
    %111 = vector.broadcast %25 : vector<1x128xf32> to vector<16x128xf32>
    %112 = arith.mulf %110, %111 : vector<16x128xf32>
    %113 = arith.addf %109, %112 : vector<16x128xf32>
    %114 = vector.extract_strided_slice %82 {offsets = [9, 0], sizes = [16, 128], strides = [1, 1]} : vector<32x128xf32> to vector<16x128xf32>
    %115 = vector.broadcast %26 : vector<1x128xf32> to vector<16x128xf32>
    %116 = arith.mulf %114, %115 : vector<16x128xf32>
    %117 = arith.addf %113, %116 : vector<16x128xf32>
    %118 = vector.broadcast %27 : vector<1x128xf32> to vector<16x128xf32>
    %119 = arith.addf %117, %118 : vector<16x128xf32>
    %cst_44 = arith.constant 0.000000e+00 : f32
    %120 = vector.broadcast %cst_44 : f32 to vector<16x128xf32>
    %121 = arith.maximumf %119, %120 : vector<16x128xf32>
    %122 = arith.truncf %121 : vector<16x128xf32> to vector<16x128xbf16>
    %c1_45 = arith.constant 1 : index
    %c0_46 = arith.constant 0 : index
    %c0_47 = arith.constant 0 : index
    %123 = vector.load %arg11[%c1_45, %c0_46, %c0_47] : memref<16x16x128xbf16, #tpu.memory_space<vmem>>, vector<1x16x128xbf16>
    %124 = vector.shape_cast %123 : vector<1x16x128xbf16> to vector<16x128xbf16>
    %125 = vector.shape_cast %122 : vector<16x128xbf16> to vector<1x16x128xbf16>
    tpu.vector_store %arg11[%c1_45, %c0_46, %c0_47], %125 {strides = array<i32>} : memref<16x16x128xbf16, #tpu.memory_space<vmem>>, vector<1x16x128xbf16>,
    %c2_48 = arith.constant 2 : index
    %c0_49 = arith.constant 0 : index
    %c0_50 = arith.constant 0 : index
    %126 = vector.load %arg10[%c2_48, %c0_49, %c0_50] : memref<18x32x128xf32, #tpu.memory_space<vmem>>, vector<1x32x128xf32>
    %127 = vector.shape_cast %126 : vector<1x32x128xf32> to vector<32x128xf32>
    %c3_51 = arith.constant 3 : index
    %c0_52 = arith.constant 0 : index
    %c0_53 = arith.constant 0 : index
    %128 = vector.load %arg10[%c3_51, %c0_52, %c0_53] : memref<18x32x128xf32, #tpu.memory_space<vmem>>, vector<1x32x128xf32>
    %129 = vector.shape_cast %128 : vector<1x32x128xf32> to vector<32x128xf32>
    %c4 = arith.constant 4 : index
    %c0_54 = arith.constant 0 : index
    %c0_55 = arith.constant 0 : index
    %130 = vector.load %arg10[%c4, %c0_54, %c0_55] : memref<18x32x128xf32, #tpu.memory_space<vmem>>, vector<1x32x128xf32>
    %131 = vector.shape_cast %130 : vector<1x32x128xf32> to vector<32x128xf32>
    %132 = vector.extract_strided_slice %127 {offsets = [7, 0], sizes = [16, 128], strides = [1, 1]} : vector<32x128xf32> to vector<16x128xf32>
    %133 = vector.broadcast %18 : vector<1x128xf32> to vector<16x128xf32>
    %134 = arith.mulf %132, %133 : vector<16x128xf32>
    %135 = vector.extract_strided_slice %127 {offsets = [8, 0], sizes = [16, 128], strides = [1, 1]} : vector<32x128xf32> to vector<16x128xf32>
    %136 = vector.broadcast %19 : vector<1x128xf32> to vector<16x128xf32>
    %137 = arith.mulf %135, %136 : vector<16x128xf32>
    %138 = arith.addf %134, %137 : vector<16x128xf32>
    %139 = vector.extract_strided_slice %127 {offsets = [9, 0], sizes = [16, 128], strides = [1, 1]} : vector<32x128xf32> to vector<16x128xf32>
    %140 = vector.broadcast %20 : vector<1x128xf32> to vector<16x128xf32>
    %141 = arith.mulf %139, %140 : vector<16x128xf32>
    %142 = arith.addf %138, %141 : vector<16x128xf32>
    %143 = vector.extract_strided_slice %129 {offsets = [7, 0], sizes = [16, 128], strides = [1, 1]} : vector<32x128xf32> to vector<16x128xf32>
    %144 = vector.broadcast %21 : vector<1x128xf32> to vector<16x128xf32>
    %145 = arith.mulf %143, %144 : vector<16x128xf32>
    %146 = arith.addf %142, %145 : vector<16x128xf32>
    %147 = vector.extract_strided_slice %129 {offsets = [8, 0], sizes = [16, 128], strides = [1, 1]} : vector<32x128xf32> to vector<16x128xf32>
    %148 = vector.broadcast %22 : vector<1x128xf32> to vector<16x128xf32>
    %149 = arith.mulf %147, %148 : vector<16x128xf32>
    %150 = arith.addf %146, %149 : vector<16x128xf32>
    %151 = vector.extract_strided_slice %129 {offsets = [9, 0], sizes = [16, 128], strides = [1, 1]} : vector<32x128xf32> to vector<16x128xf32>
    %152 = vector.broadcast %23 : vector<1x128xf32> to vector<16x128xf32>
    %153 = arith.mulf %151, %152 : vector<16x128xf32>
    %154 = arith.addf %150, %153 : vector<16x128xf32>
    %155 = vector.extract_strided_slice %131 {offsets = [7, 0], sizes = [16, 128], strides = [1, 1]} : vector<32x128xf32> to vector<16x128xf32>
    %156 = vector.broadcast %24 : vector<1x128xf32> to vector<16x128xf32>
    %157 = arith.mulf %155, %156 : vector<16x128xf32>
    %158 = arith.addf %154, %157 : vector<16x128xf32>
    %159 = vector.extract_strided_slice %131 {offsets = [8, 0], sizes = [16, 128], strides = [1, 1]} : vector<32x128xf32> to vector<16x128xf32>
    %160 = vector.broadcast %25 : vector<1x128xf32> to vector<16x128xf32>
    %161 = arith.mulf %159, %160 : vector<16x128xf32>
    %162 = arith.addf %158, %161 : vector<16x128xf32>
    %163 = vector.extract_strided_slice %131 {offsets = [9, 0], sizes = [16, 128], strides = [1, 1]} : vector<32x128xf32> to vector<16x128xf32>
    %164 = vector.broadcast %26 : vector<1x128xf32> to vector<16x128xf32>
    %165 = arith.mulf %163, %164 : vector<16x128xf32>
    %166 = arith.addf %162, %165 : vector<16x128xf32>
    %167 = vector.broadcast %27 : vector<1x128xf32> to vector<16x128xf32>
    %168 = arith.addf %166, %167 : vector<16x128xf32>
    %cst_56 = arith.constant 0.000000e+00 : f32
    %169 = vector.broadcast %cst_56 : f32 to vector<16x128xf32>
    %170 = arith.maximumf %168, %169 : vector<16x128xf32>
    %171 = arith.truncf %170 : vector<16x128xf32> to vector<16x128xbf16>
    %c2_57 = arith.constant 2 : index
    %c0_58 = arith.constant 0 : index
    %c0_59 = arith.constant 0 : index
    %172 = vector.load %arg11[%c2_57, %c0_58, %c0_59] : memref<16x16x128xbf16, #tpu.memory_space<vmem>>, vector<1x16x128xbf16>
    %173 = vector.shape_cast %172 : vector<1x16x128xbf16> to vector<16x128xbf16>
    %174 = vector.shape_cast %171 : vector<16x128xbf16> to vector<1x16x128xbf16>
    tpu.vector_store %arg11[%c2_57, %c0_58, %c0_59], %174 {strides = array<i32>} : memref<16x16x128xbf16, #tpu.memory_space<vmem>>, vector<1x16x128xbf16>,
    %c3_60 = arith.constant 3 : index
    %c0_61 = arith.constant 0 : index
    %c0_62 = arith.constant 0 : index
    %175 = vector.load %arg10[%c3_60, %c0_61, %c0_62] : memref<18x32x128xf32, #tpu.memory_space<vmem>>, vector<1x32x128xf32>
    %176 = vector.shape_cast %175 : vector<1x32x128xf32> to vector<32x128xf32>
    %c4_63 = arith.constant 4 : index
    %c0_64 = arith.constant 0 : index
    %c0_65 = arith.constant 0 : index
    %177 = vector.load %arg10[%c4_63, %c0_64, %c0_65] : memref<18x32x128xf32, #tpu.memory_space<vmem>>, vector<1x32x128xf32>
    %178 = vector.shape_cast %177 : vector<1x32x128xf32> to vector<32x128xf32>
    %c5 = arith.constant 5 : index
    %c0_66 = arith.constant 0 : index
    %c0_67 = arith.constant 0 : index
    %179 = vector.load %arg10[%c5, %c0_66, %c0_67] : memref<18x32x128xf32, #tpu.memory_space<vmem>>, vector<1x32x128xf32>
    %180 = vector.shape_cast %179 : vector<1x32x128xf32> to vector<32x128xf32>
    %181 = vector.extract_strided_slice %176 {offsets = [7, 0], sizes = [16, 128], strides = [1, 1]} : vector<32x128xf32> to vector<16x128xf32>
    %182 = vector.broadcast %18 : vector<1x128xf32> to vector<16x128xf32>
    %183 = arith.mulf %181, %182 : vector<16x128xf32>
    %184 = vector.extract_strided_slice %176 {offsets = [8, 0], sizes = [16, 128], strides = [1, 1]} : vector<32x128xf32> to vector<16x128xf32>
    %185 = vector.broadcast %19 : vector<1x128xf32> to vector<16x128xf32>
    %186 = arith.mulf %184, %185 : vector<16x128xf32>
    %187 = arith.addf %183, %186 : vector<16x128xf32>
    %188 = vector.extract_strided_slice %176 {offsets = [9, 0], sizes = [16, 128], strides = [1, 1]} : vector<32x128xf32> to vector<16x128xf32>
    %189 = vector.broadcast %20 : vector<1x128xf32> to vector<16x128xf32>
    %190 = arith.mulf %188, %189 : vector<16x128xf32>
    %191 = arith.addf %187, %190 : vector<16x128xf32>
    %192 = vector.extract_strided_slice %178 {offsets = [7, 0], sizes = [16, 128], strides = [1, 1]} : vector<32x128xf32> to vector<16x128xf32>
    %193 = vector.broadcast %21 : vector<1x128xf32> to vector<16x128xf32>
    %194 = arith.mulf %192, %193 : vector<16x128xf32>
    %195 = arith.addf %191, %194 : vector<16x128xf32>
    %196 = vector.extract_strided_slice %178 {offsets = [8, 0], sizes = [16, 128], strides = [1, 1]} : vector<32x128xf32> to vector<16x128xf32>
    %197 = vector.broadcast %22 : vector<1x128xf32> to vector<16x128xf32>
    %198 = arith.mulf %196, %197 : vector<16x128xf32>
    %199 = arith.addf %195, %198 : vector<16x128xf32>
    %200 = vector.extract_strided_slice %178 {offsets = [9, 0], sizes = [16, 128], strides = [1, 1]} : vector<32x128xf32> to vector<16x128xf32>
    %201 = vector.broadcast %23 : vector<1x128xf32> to vector<16x128xf32>
    %202 = arith.mulf %200, %201 : vector<16x128xf32>
    %203 = arith.addf %199, %202 : vector<16x128xf32>
    %204 = vector.extract_strided_slice %180 {offsets = [7, 0], sizes = [16, 128], strides = [1, 1]} : vector<32x128xf32> to vector<16x128xf32>
    %205 = vector.broadcast %24 : vector<1x128xf32> to vector<16x128xf32>
    %206 = arith.mulf %204, %205 : vector<16x128xf32>
    %207 = arith.addf %203, %206 : vector<16x128xf32>
    %208 = vector.extract_strided_slice %180 {offsets = [8, 0], sizes = [16, 128], strides = [1, 1]} : vector<32x128xf32> to vector<16x128xf32>
    %209 = vector.broadcast %25 : vector<1x128xf32> to vector<16x128xf32>
    %210 = arith.mulf %208, %209 : vector<16x128xf32>
    %211 = arith.addf %207, %210 : vector<16x128xf32>
    %212 = vector.extract_strided_slice %180 {offsets = [9, 0], sizes = [16, 128], strides = [1, 1]} : vector<32x128xf32> to vector<16x128xf32>
    %213 = vector.broadcast %26 : vector<1x128xf32> to vector<16x128xf32>
    %214 = arith.mulf %212, %213 : vector<16x128xf32>
    %215 = arith.addf %211, %214 : vector<16x128xf32>
    %216 = vector.broadcast %27 : vector<1x128xf32> to vector<16x128xf32>
    %217 = arith.addf %215, %216 : vector<16x128xf32>
    %cst_68 = arith.constant 0.000000e+00 : f32
    %218 = vector.broadcast %cst_68 : f32 to vector<16x128xf32>
    %219 = arith.maximumf %217, %218 : vector<16x128xf32>
    %220 = arith.truncf %219 : vector<16x128xf32> to vector<16x128xbf16>
    %c3_69 = arith.constant 3 : index
    %c0_70 = arith.constant 0 : index
    %c0_71 = arith.constant 0 : index
    %221 = vector.load %arg11[%c3_69, %c0_70, %c0_71] : memref<16x16x128xbf16, #tpu.memory_space<vmem>>, vector<1x16x128xbf16>
    %222 = vector.shape_cast %221 : vector<1x16x128xbf16> to vector<16x128xbf16>
    %223 = vector.shape_cast %220 : vector<16x128xbf16> to vector<1x16x128xbf16>
    tpu.vector_store %arg11[%c3_69, %c0_70, %c0_71], %223 {strides = array<i32>} : memref<16x16x128xbf16, #tpu.memory_space<vmem>>, vector<1x16x128xbf16>,
    %c4_72 = arith.constant 4 : index
    %c0_73 = arith.constant 0 : index
    %c0_74 = arith.constant 0 : index
    %224 = vector.load %arg10[%c4_72, %c0_73, %c0_74] : memref<18x32x128xf32, #tpu.memory_space<vmem>>, vector<1x32x128xf32>
    %225 = vector.shape_cast %224 : vector<1x32x128xf32> to vector<32x128xf32>
    %c5_75 = arith.constant 5 : index
    %c0_76 = arith.constant 0 : index
    %c0_77 = arith.constant 0 : index
    %226 = vector.load %arg10[%c5_75, %c0_76, %c0_77] : memref<18x32x128xf32, #tpu.memory_space<vmem>>, vector<1x32x128xf32>
    %227 = vector.shape_cast %226 : vector<1x32x128xf32> to vector<32x128xf32>
    %c6 = arith.constant 6 : index
    %c0_78 = arith.constant 0 : index
    %c0_79 = arith.constant 0 : index
    %228 = vector.load %arg10[%c6, %c0_78, %c0_79] : memref<18x32x128xf32, #tpu.memory_space<vmem>>, vector<1x32x128xf32>
    %229 = vector.shape_cast %228 : vector<1x32x128xf32> to vector<32x128xf32>
    %230 = vector.extract_strided_slice %225 {offsets = [7, 0], sizes = [16, 128], strides = [1, 1]} : vector<32x128xf32> to vector<16x128xf32>
    %231 = vector.broadcast %18 : vector<1x128xf32> to vector<16x128xf32>
    %232 = arith.mulf %230, %231 : vector<16x128xf32>
    %233 = vector.extract_strided_slice %225 {offsets = [8, 0], sizes = [16, 128], strides = [1, 1]} : vector<32x128xf32> to vector<16x128xf32>
    %234 = vector.broadcast %19 : vector<1x128xf32> to vector<16x128xf32>
    %235 = arith.mulf %233, %234 : vector<16x128xf32>
    %236 = arith.addf %232, %235 : vector<16x128xf32>
    %237 = vector.extract_strided_slice %225 {offsets = [9, 0], sizes = [16, 128], strides = [1, 1]} : vector<32x128xf32> to vector<16x128xf32>
    %238 = vector.broadcast %20 : vector<1x128xf32> to vector<16x128xf32>
    %239 = arith.mulf %237, %238 : vector<16x128xf32>
    %240 = arith.addf %236, %239 : vector<16x128xf32>
    %241 = vector.extract_strided_slice %227 {offsets = [7, 0], sizes = [16, 128], strides = [1, 1]} : vector<32x128xf32> to vector<16x128xf32>
    %242 = vector.broadcast %21 : vector<1x128xf32> to vector<16x128xf32>
    %243 = arith.mulf %241, %242 : vector<16x128xf32>
    %244 = arith.addf %240, %243 : vector<16x128xf32>
    %245 = vector.extract_strided_slice %227 {offsets = [8, 0], sizes = [16, 128], strides = [1, 1]} : vector<32x128xf32> to vector<16x128xf32>
    %246 = vector.broadcast %22 : vector<1x128xf32> to vector<16x128xf32>
    %247 = arith.mulf %245, %246 : vector<16x128xf32>
    %248 = arith.addf %244, %247 : vector<16x128xf32>
    %249 = vector.extract_strided_slice %227 {offsets = [9, 0], sizes = [16, 128], strides = [1, 1]} : vector<32x128xf32> to vector<16x128xf32>
    %250 = vector.broadcast %23 : vector<1x128xf32> to vector<16x128xf32>
    %251 = arith.mulf %249, %250 : vector<16x128xf32>
    %252 = arith.addf %248, %251 : vector<16x128xf32>
    %253 = vector.extract_strided_slice %229 {offsets = [7, 0], sizes = [16, 128], strides = [1, 1]} : vector<32x128xf32> to vector<16x128xf32>
    %254 = vector.broadcast %24 : vector<1x128xf32> to vector<16x128xf32>
    %255 = arith.mulf %253, %254 : vector<16x128xf32>
    %256 = arith.addf %252, %255 : vector<16x128xf32>
    %257 = vector.extract_strided_slice %229 {offsets = [8, 0], sizes = [16, 128], strides = [1, 1]} : vector<32x128xf32> to vector<16x128xf32>
    %258 = vector.broadcast %25 : vector<1x128xf32> to vector<16x128xf32>
    %259 = arith.mulf %257, %258 : vector<16x128xf32>
    %260 = arith.addf %256, %259 : vector<16x128xf32>
    %261 = vector.extract_strided_slice %229 {offsets = [9, 0], sizes = [16, 128], strides = [1, 1]} : vector<32x128xf32> to vector<16x128xf32>
    %262 = vector.broadcast %26 : vector<1x128xf32> to vector<16x128xf32>
    %263 = arith.mulf %261, %262 : vector<16x128xf32>
    %264 = arith.addf %260, %263 : vector<16x128xf32>
    %265 = vector.broadcast %27 : vector<1x128xf32> to vector<16x128xf32>
    %266 = arith.addf %264, %265 : vector<16x128xf32>
    %cst_80 = arith.constant 0.000000e+00 : f32
    %267 = vector.broadcast %cst_80 : f32 to vector<16x128xf32>
    %268 = arith.maximumf %266, %267 : vector<16x128xf32>
    %269 = arith.truncf %268 : vector<16x128xf32> to vector<16x128xbf16>
    %c4_81 = arith.constant 4 : index
    %c0_82 = arith.constant 0 : index
    %c0_83 = arith.constant 0 : index
    %270 = vector.load %arg11[%c4_81, %c0_82, %c0_83] : memref<16x16x128xbf16, #tpu.memory_space<vmem>>, vector<1x16x128xbf16>
    %271 = vector.shape_cast %270 : vector<1x16x128xbf16> to vector<16x128xbf16>
    %272 = vector.shape_cast %269 : vector<16x128xbf16> to vector<1x16x128xbf16>
    tpu.vector_store %arg11[%c4_81, %c0_82, %c0_83], %272 {strides = array<i32>} : memref<16x16x128xbf16, #tpu.memory_space<vmem>>, vector<1x16x128xbf16>,
    %c5_84 = arith.constant 5 : index
    %c0_85 = arith.constant 0 : index
    %c0_86 = arith.constant 0 : index
    %273 = vector.load %arg10[%c5_84, %c0_85, %c0_86] : memref<18x32x128xf32, #tpu.memory_space<vmem>>, vector<1x32x128xf32>
    %274 = vector.shape_cast %273 : vector<1x32x128xf32> to vector<32x128xf32>
    %c6_87 = arith.constant 6 : index
    %c0_88 = arith.constant 0 : index
    %c0_89 = arith.constant 0 : index
    %275 = vector.load %arg10[%c6_87, %c0_88, %c0_89] : memref<18x32x128xf32, #tpu.memory_space<vmem>>, vector<1x32x128xf32>
    %276 = vector.shape_cast %275 : vector<1x32x128xf32> to vector<32x128xf32>
    %c7_90 = arith.constant 7 : index
    %c0_91 = arith.constant 0 : index
    %c0_92 = arith.constant 0 : index
    %277 = vector.load %arg10[%c7_90, %c0_91, %c0_92] : memref<18x32x128xf32, #tpu.memory_space<vmem>>, vector<1x32x128xf32>
    %278 = vector.shape_cast %277 : vector<1x32x128xf32> to vector<32x128xf32>
    %279 = vector.extract_strided_slice %274 {offsets = [7, 0], sizes = [16, 128], strides = [1, 1]} : vector<32x128xf32> to vector<16x128xf32>
    %280 = vector.broadcast %18 : vector<1x128xf32> to vector<16x128xf32>
    %281 = arith.mulf %279, %280 : vector<16x128xf32>
    %282 = vector.extract_strided_slice %274 {offsets = [8, 0], sizes = [16, 128], strides = [1, 1]} : vector<32x128xf32> to vector<16x128xf32>
    %283 = vector.broadcast %19 : vector<1x128xf32> to vector<16x128xf32>
    %284 = arith.mulf %282, %283 : vector<16x128xf32>
    %285 = arith.addf %281, %284 : vector<16x128xf32>
    %286 = vector.extract_strided_slice %274 {offsets = [9, 0], sizes = [16, 128], strides = [1, 1]} : vector<32x128xf32> to vector<16x128xf32>
    %287 = vector.broadcast %20 : vector<1x128xf32> to vector<16x128xf32>
    %288 = arith.mulf %286, %287 : vector<16x128xf32>
    %289 = arith.addf %285, %288 : vector<16x128xf32>
    %290 = vector.extract_strided_slice %276 {offsets = [7, 0], sizes = [16, 128], strides = [1, 1]} : vector<32x128xf32> to vector<16x128xf32>
    %291 = vector.broadcast %21 : vector<1x128xf32> to vector<16x128xf32>
    %292 = arith.mulf %290, %291 : vector<16x128xf32>
    %293 = arith.addf %289, %292 : vector<16x128xf32>
    %294 = vector.extract_strided_slice %276 {offsets = [8, 0], sizes = [16, 128], strides = [1, 1]} : vector<32x128xf32> to vector<16x128xf32>
    %295 = vector.broadcast %22 : vector<1x128xf32> to vector<16x128xf32>
    %296 = arith.mulf %294, %295 : vector<16x128xf32>
    %297 = arith.addf %293, %296 : vector<16x128xf32>
    %298 = vector.extract_strided_slice %276 {offsets = [9, 0], sizes = [16, 128], strides = [1, 1]} : vector<32x128xf32> to vector<16x128xf32>
    %299 = vector.broadcast %23 : vector<1x128xf32> to vector<16x128xf32>
    %300 = arith.mulf %298, %299 : vector<16x128xf32>
    %301 = arith.addf %297, %300 : vector<16x128xf32>
    %302 = vector.extract_strided_slice %278 {offsets = [7, 0], sizes = [16, 128], strides = [1, 1]} : vector<32x128xf32> to vector<16x128xf32>
    %303 = vector.broadcast %24 : vector<1x128xf32> to vector<16x128xf32>
    %304 = arith.mulf %302, %303 : vector<16x128xf32>
    %305 = arith.addf %301, %304 : vector<16x128xf32>
    %306 = vector.extract_strided_slice %278 {offsets = [8, 0], sizes = [16, 128], strides = [1, 1]} : vector<32x128xf32> to vector<16x128xf32>
    %307 = vector.broadcast %25 : vector<1x128xf32> to vector<16x128xf32>
    %308 = arith.mulf %306, %307 : vector<16x128xf32>
    %309 = arith.addf %305, %308 : vector<16x128xf32>
    %310 = vector.extract_strided_slice %278 {offsets = [9, 0], sizes = [16, 128], strides = [1, 1]} : vector<32x128xf32> to vector<16x128xf32>
    %311 = vector.broadcast %26 : vector<1x128xf32> to vector<16x128xf32>
    %312 = arith.mulf %310, %311 : vector<16x128xf32>
    %313 = arith.addf %309, %312 : vector<16x128xf32>
    %314 = vector.broadcast %27 : vector<1x128xf32> to vector<16x128xf32>
    %315 = arith.addf %313, %314 : vector<16x128xf32>
    %cst_93 = arith.constant 0.000000e+00 : f32
    %316 = vector.broadcast %cst_93 : f32 to vector<16x128xf32>
    %317 = arith.maximumf %315, %316 : vector<16x128xf32>
    %318 = arith.truncf %317 : vector<16x128xf32> to vector<16x128xbf16>
    %c5_94 = arith.constant 5 : index
    %c0_95 = arith.constant 0 : index
    %c0_96 = arith.constant 0 : index
    %319 = vector.load %arg11[%c5_94, %c0_95, %c0_96] : memref<16x16x128xbf16, #tpu.memory_space<vmem>>, vector<1x16x128xbf16>
    %320 = vector.shape_cast %319 : vector<1x16x128xbf16> to vector<16x128xbf16>
    %321 = vector.shape_cast %318 : vector<16x128xbf16> to vector<1x16x128xbf16>
    tpu.vector_store %arg11[%c5_94, %c0_95, %c0_96], %321 {strides = array<i32>} : memref<16x16x128xbf16, #tpu.memory_space<vmem>>, vector<1x16x128xbf16>,
    %c6_97 = arith.constant 6 : index
    %c0_98 = arith.constant 0 : index
    %c0_99 = arith.constant 0 : index
    %322 = vector.load %arg10[%c6_97, %c0_98, %c0_99] : memref<18x32x128xf32, #tpu.memory_space<vmem>>, vector<1x32x128xf32>
    %323 = vector.shape_cast %322 : vector<1x32x128xf32> to vector<32x128xf32>
    %c7_100 = arith.constant 7 : index
    %c0_101 = arith.constant 0 : index
    %c0_102 = arith.constant 0 : index
    %324 = vector.load %arg10[%c7_100, %c0_101, %c0_102] : memref<18x32x128xf32, #tpu.memory_space<vmem>>, vector<1x32x128xf32>
    %325 = vector.shape_cast %324 : vector<1x32x128xf32> to vector<32x128xf32>
    %c8_103 = arith.constant 8 : index
    %c0_104 = arith.constant 0 : index
    %c0_105 = arith.constant 0 : index
    %326 = vector.load %arg10[%c8_103, %c0_104, %c0_105] : memref<18x32x128xf32, #tpu.memory_space<vmem>>, vector<1x32x128xf32>
    %327 = vector.shape_cast %326 : vector<1x32x128xf32> to vector<32x128xf32>
    %328 = vector.extract_strided_slice %323 {offsets = [7, 0], sizes = [16, 128], strides = [1, 1]} : vector<32x128xf32> to vector<16x128xf32>
    %329 = vector.broadcast %18 : vector<1x128xf32> to vector<16x128xf32>
    %330 = arith.mulf %328, %329 : vector<16x128xf32>
    %331 = vector.extract_strided_slice %323 {offsets = [8, 0], sizes = [16, 128], strides = [1, 1]} : vector<32x128xf32> to vector<16x128xf32>
    %332 = vector.broadcast %19 : vector<1x128xf32> to vector<16x128xf32>
    %333 = arith.mulf %331, %332 : vector<16x128xf32>
    %334 = arith.addf %330, %333 : vector<16x128xf32>
    %335 = vector.extract_strided_slice %323 {offsets = [9, 0], sizes = [16, 128], strides = [1, 1]} : vector<32x128xf32> to vector<16x128xf32>
    %336 = vector.broadcast %20 : vector<1x128xf32> to vector<16x128xf32>
    %337 = arith.mulf %335, %336 : vector<16x128xf32>
    %338 = arith.addf %334, %337 : vector<16x128xf32>
    %339 = vector.extract_strided_slice %325 {offsets = [7, 0], sizes = [16, 128], strides = [1, 1]} : vector<32x128xf32> to vector<16x128xf32>
    %340 = vector.broadcast %21 : vector<1x128xf32> to vector<16x128xf32>
    %341 = arith.mulf %339, %340 : vector<16x128xf32>
    %342 = arith.addf %338, %341 : vector<16x128xf32>
    %343 = vector.extract_strided_slice %325 {offsets = [8, 0], sizes = [16, 128], strides = [1, 1]} : vector<32x128xf32> to vector<16x128xf32>
    %344 = vector.broadcast %22 : vector<1x128xf32> to vector<16x128xf32>
    %345 = arith.mulf %343, %344 : vector<16x128xf32>
    %346 = arith.addf %342, %345 : vector<16x128xf32>
    %347 = vector.extract_strided_slice %325 {offsets = [9, 0], sizes = [16, 128], strides = [1, 1]} : vector<32x128xf32> to vector<16x128xf32>
    %348 = vector.broadcast %23 : vector<1x128xf32> to vector<16x128xf32>
    %349 = arith.mulf %347, %348 : vector<16x128xf32>
    %350 = arith.addf %346, %349 : vector<16x128xf32>
    %351 = vector.extract_strided_slice %327 {offsets = [7, 0], sizes = [16, 128], strides = [1, 1]} : vector<32x128xf32> to vector<16x128xf32>
    %352 = vector.broadcast %24 : vector<1x128xf32> to vector<16x128xf32>
    %353 = arith.mulf %351, %352 : vector<16x128xf32>
    %354 = arith.addf %350, %353 : vector<16x128xf32>
    %355 = vector.extract_strided_slice %327 {offsets = [8, 0], sizes = [16, 128], strides = [1, 1]} : vector<32x128xf32> to vector<16x128xf32>
    %356 = vector.broadcast %25 : vector<1x128xf32> to vector<16x128xf32>
    %357 = arith.mulf %355, %356 : vector<16x128xf32>
    %358 = arith.addf %354, %357 : vector<16x128xf32>
    %359 = vector.extract_strided_slice %327 {offsets = [9, 0], sizes = [16, 128], strides = [1, 1]} : vector<32x128xf32> to vector<16x128xf32>
    %360 = vector.broadcast %26 : vector<1x128xf32> to vector<16x128xf32>
    %361 = arith.mulf %359, %360 : vector<16x128xf32>
    %362 = arith.addf %358, %361 : vector<16x128xf32>
    %363 = vector.broadcast %27 : vector<1x128xf32> to vector<16x128xf32>
    %364 = arith.addf %362, %363 : vector<16x128xf32>
    %cst_106 = arith.constant 0.000000e+00 : f32
    %365 = vector.broadcast %cst_106 : f32 to vector<16x128xf32>
    %366 = arith.maximumf %364, %365 : vector<16x128xf32>
    %367 = arith.truncf %366 : vector<16x128xf32> to vector<16x128xbf16>
    %c6_107 = arith.constant 6 : index
    %c0_108 = arith.constant 0 : index
    %c0_109 = arith.constant 0 : index
    %368 = vector.load %arg11[%c6_107, %c0_108, %c0_109] : memref<16x16x128xbf16, #tpu.memory_space<vmem>>, vector<1x16x128xbf16>
    %369 = vector.shape_cast %368 : vector<1x16x128xbf16> to vector<16x128xbf16>
    %370 = vector.shape_cast %367 : vector<16x128xbf16> to vector<1x16x128xbf16>
    tpu.vector_store %arg11[%c6_107, %c0_108, %c0_109], %370 {strides = array<i32>} : memref<16x16x128xbf16, #tpu.memory_space<vmem>>, vector<1x16x128xbf16>,
    %c7_110 = arith.constant 7 : index
    %c0_111 = arith.constant 0 : index
    %c0_112 = arith.constant 0 : index
    %371 = vector.load %arg10[%c7_110, %c0_111, %c0_112] : memref<18x32x128xf32, #tpu.memory_space<vmem>>, vector<1x32x128xf32>
    %372 = vector.shape_cast %371 : vector<1x32x128xf32> to vector<32x128xf32>
    %c8_113 = arith.constant 8 : index
    %c0_114 = arith.constant 0 : index
    %c0_115 = arith.constant 0 : index
    %373 = vector.load %arg10[%c8_113, %c0_114, %c0_115] : memref<18x32x128xf32, #tpu.memory_space<vmem>>, vector<1x32x128xf32>
    %374 = vector.shape_cast %373 : vector<1x32x128xf32> to vector<32x128xf32>
    %c9 = arith.constant 9 : index
    %c0_116 = arith.constant 0 : index
    %c0_117 = arith.constant 0 : index
    %375 = vector.load %arg10[%c9, %c0_116, %c0_117] : memref<18x32x128xf32, #tpu.memory_space<vmem>>, vector<1x32x128xf32>
    %376 = vector.shape_cast %375 : vector<1x32x128xf32> to vector<32x128xf32>
    %377 = vector.extract_strided_slice %372 {offsets = [7, 0], sizes = [16, 128], strides = [1, 1]} : vector<32x128xf32> to vector<16x128xf32>
    %378 = vector.broadcast %18 : vector<1x128xf32> to vector<16x128xf32>
    %379 = arith.mulf %377, %378 : vector<16x128xf32>
    %380 = vector.extract_strided_slice %372 {offsets = [8, 0], sizes = [16, 128], strides = [1, 1]} : vector<32x128xf32> to vector<16x128xf32>
    %381 = vector.broadcast %19 : vector<1x128xf32> to vector<16x128xf32>
    %382 = arith.mulf %380, %381 : vector<16x128xf32>
    %383 = arith.addf %379, %382 : vector<16x128xf32>
    %384 = vector.extract_strided_slice %372 {offsets = [9, 0], sizes = [16, 128], strides = [1, 1]} : vector<32x128xf32> to vector<16x128xf32>
    %385 = vector.broadcast %20 : vector<1x128xf32> to vector<16x128xf32>
    %386 = arith.mulf %384, %385 : vector<16x128xf32>
    %387 = arith.addf %383, %386 : vector<16x128xf32>
    %388 = vector.extract_strided_slice %374 {offsets = [7, 0], sizes = [16, 128], strides = [1, 1]} : vector<32x128xf32> to vector<16x128xf32>
    %389 = vector.broadcast %21 : vector<1x128xf32> to vector<16x128xf32>
    %390 = arith.mulf %388, %389 : vector<16x128xf32>
    %391 = arith.addf %387, %390 : vector<16x128xf32>
    %392 = vector.extract_strided_slice %374 {offsets = [8, 0], sizes = [16, 128], strides = [1, 1]} : vector<32x128xf32> to vector<16x128xf32>
    %393 = vector.broadcast %22 : vector<1x128xf32> to vector<16x128xf32>
    %394 = arith.mulf %392, %393 : vector<16x128xf32>
    %395 = arith.addf %391, %394 : vector<16x128xf32>
    %396 = vector.extract_strided_slice %374 {offsets = [9, 0], sizes = [16, 128], strides = [1, 1]} : vector<32x128xf32> to vector<16x128xf32>
    %397 = vector.broadcast %23 : vector<1x128xf32> to vector<16x128xf32>
    %398 = arith.mulf %396, %397 : vector<16x128xf32>
    %399 = arith.addf %395, %398 : vector<16x128xf32>
    %400 = vector.extract_strided_slice %376 {offsets = [7, 0], sizes = [16, 128], strides = [1, 1]} : vector<32x128xf32> to vector<16x128xf32>
    %401 = vector.broadcast %24 : vector<1x128xf32> to vector<16x128xf32>
    %402 = arith.mulf %400, %401 : vector<16x128xf32>
    %403 = arith.addf %399, %402 : vector<16x128xf32>
    %404 = vector.extract_strided_slice %376 {offsets = [8, 0], sizes = [16, 128], strides = [1, 1]} : vector<32x128xf32> to vector<16x128xf32>
    %405 = vector.broadcast %25 : vector<1x128xf32> to vector<16x128xf32>
    %406 = arith.mulf %404, %405 : vector<16x128xf32>
    %407 = arith.addf %403, %406 : vector<16x128xf32>
    %408 = vector.extract_strided_slice %376 {offsets = [9, 0], sizes = [16, 128], strides = [1, 1]} : vector<32x128xf32> to vector<16x128xf32>
    %409 = vector.broadcast %26 : vector<1x128xf32> to vector<16x128xf32>
    %410 = arith.mulf %408, %409 : vector<16x128xf32>
    %411 = arith.addf %407, %410 : vector<16x128xf32>
    %412 = vector.broadcast %27 : vector<1x128xf32> to vector<16x128xf32>
    %413 = arith.addf %411, %412 : vector<16x128xf32>
    %cst_118 = arith.constant 0.000000e+00 : f32
    %414 = vector.broadcast %cst_118 : f32 to vector<16x128xf32>
    %415 = arith.maximumf %413, %414 : vector<16x128xf32>
    %416 = arith.truncf %415 : vector<16x128xf32> to vector<16x128xbf16>
    %c7_119 = arith.constant 7 : index
    %c0_120 = arith.constant 0 : index
    %c0_121 = arith.constant 0 : index
    %417 = vector.load %arg11[%c7_119, %c0_120, %c0_121] : memref<16x16x128xbf16, #tpu.memory_space<vmem>>, vector<1x16x128xbf16>
    %418 = vector.shape_cast %417 : vector<1x16x128xbf16> to vector<16x128xbf16>
    %419 = vector.shape_cast %416 : vector<16x128xbf16> to vector<1x16x128xbf16>
    tpu.vector_store %arg11[%c7_119, %c0_120, %c0_121], %419 {strides = array<i32>} : memref<16x16x128xbf16, #tpu.memory_space<vmem>>, vector<1x16x128xbf16>,
    %c8_122 = arith.constant 8 : index
    %c0_123 = arith.constant 0 : index
    %c0_124 = arith.constant 0 : index
    %420 = vector.load %arg10[%c8_122, %c0_123, %c0_124] : memref<18x32x128xf32, #tpu.memory_space<vmem>>, vector<1x32x128xf32>
    %421 = vector.shape_cast %420 : vector<1x32x128xf32> to vector<32x128xf32>
    %c9_125 = arith.constant 9 : index
    %c0_126 = arith.constant 0 : index
    %c0_127 = arith.constant 0 : index
    %422 = vector.load %arg10[%c9_125, %c0_126, %c0_127] : memref<18x32x128xf32, #tpu.memory_space<vmem>>, vector<1x32x128xf32>
    %423 = vector.shape_cast %422 : vector<1x32x128xf32> to vector<32x128xf32>
    %c10 = arith.constant 10 : index
    %c0_128 = arith.constant 0 : index
    %c0_129 = arith.constant 0 : index
    %424 = vector.load %arg10[%c10, %c0_128, %c0_129] : memref<18x32x128xf32, #tpu.memory_space<vmem>>, vector<1x32x128xf32>
    %425 = vector.shape_cast %424 : vector<1x32x128xf32> to vector<32x128xf32>
    %426 = vector.extract_strided_slice %421 {offsets = [7, 0], sizes = [16, 128], strides = [1, 1]} : vector<32x128xf32> to vector<16x128xf32>
    %427 = vector.broadcast %18 : vector<1x128xf32> to vector<16x128xf32>
    %428 = arith.mulf %426, %427 : vector<16x128xf32>
    %429 = vector.extract_strided_slice %421 {offsets = [8, 0], sizes = [16, 128], strides = [1, 1]} : vector<32x128xf32> to vector<16x128xf32>
    %430 = vector.broadcast %19 : vector<1x128xf32> to vector<16x128xf32>
    %431 = arith.mulf %429, %430 : vector<16x128xf32>
    %432 = arith.addf %428, %431 : vector<16x128xf32>
    %433 = vector.extract_strided_slice %421 {offsets = [9, 0], sizes = [16, 128], strides = [1, 1]} : vector<32x128xf32> to vector<16x128xf32>
    %434 = vector.broadcast %20 : vector<1x128xf32> to vector<16x128xf32>
    %435 = arith.mulf %433, %434 : vector<16x128xf32>
    %436 = arith.addf %432, %435 : vector<16x128xf32>
    %437 = vector.extract_strided_slice %423 {offsets = [7, 0], sizes = [16, 128], strides = [1, 1]} : vector<32x128xf32> to vector<16x128xf32>
    %438 = vector.broadcast %21 : vector<1x128xf32> to vector<16x128xf32>
    %439 = arith.mulf %437, %438 : vector<16x128xf32>
    %440 = arith.addf %436, %439 : vector<16x128xf32>
    %441 = vector.extract_strided_slice %423 {offsets = [8, 0], sizes = [16, 128], strides = [1, 1]} : vector<32x128xf32> to vector<16x128xf32>
    %442 = vector.broadcast %22 : vector<1x128xf32> to vector<16x128xf32>
    %443 = arith.mulf %441, %442 : vector<16x128xf32>
    %444 = arith.addf %440, %443 : vector<16x128xf32>
    %445 = vector.extract_strided_slice %423 {offsets = [9, 0], sizes = [16, 128], strides = [1, 1]} : vector<32x128xf32> to vector<16x128xf32>
    %446 = vector.broadcast %23 : vector<1x128xf32> to vector<16x128xf32>
    %447 = arith.mulf %445, %446 : vector<16x128xf32>
    %448 = arith.addf %444, %447 : vector<16x128xf32>
    %449 = vector.extract_strided_slice %425 {offsets = [7, 0], sizes = [16, 128], strides = [1, 1]} : vector<32x128xf32> to vector<16x128xf32>
    %450 = vector.broadcast %24 : vector<1x128xf32> to vector<16x128xf32>
    %451 = arith.mulf %449, %450 : vector<16x128xf32>
    %452 = arith.addf %448, %451 : vector<16x128xf32>
    %453 = vector.extract_strided_slice %425 {offsets = [8, 0], sizes = [16, 128], strides = [1, 1]} : vector<32x128xf32> to vector<16x128xf32>
    %454 = vector.broadcast %25 : vector<1x128xf32> to vector<16x128xf32>
    %455 = arith.mulf %453, %454 : vector<16x128xf32>
    %456 = arith.addf %452, %455 : vector<16x128xf32>
    %457 = vector.extract_strided_slice %425 {offsets = [9, 0], sizes = [16, 128], strides = [1, 1]} : vector<32x128xf32> to vector<16x128xf32>
    %458 = vector.broadcast %26 : vector<1x128xf32> to vector<16x128xf32>
    %459 = arith.mulf %457, %458 : vector<16x128xf32>
    %460 = arith.addf %456, %459 : vector<16x128xf32>
    %461 = vector.broadcast %27 : vector<1x128xf32> to vector<16x128xf32>
    %462 = arith.addf %460, %461 : vector<16x128xf32>
    %cst_130 = arith.constant 0.000000e+00 : f32
    %463 = vector.broadcast %cst_130 : f32 to vector<16x128xf32>
    %464 = arith.maximumf %462, %463 : vector<16x128xf32>
    %465 = arith.truncf %464 : vector<16x128xf32> to vector<16x128xbf16>
    %c8_131 = arith.constant 8 : index
    %c0_132 = arith.constant 0 : index
    %c0_133 = arith.constant 0 : index
    %466 = vector.load %arg11[%c8_131, %c0_132, %c0_133] : memref<16x16x128xbf16, #tpu.memory_space<vmem>>, vector<1x16x128xbf16>
    %467 = vector.shape_cast %466 : vector<1x16x128xbf16> to vector<16x128xbf16>
    %468 = vector.shape_cast %465 : vector<16x128xbf16> to vector<1x16x128xbf16>
    tpu.vector_store %arg11[%c8_131, %c0_132, %c0_133], %468 {strides = array<i32>} : memref<16x16x128xbf16, #tpu.memory_space<vmem>>, vector<1x16x128xbf16>,
    %c9_134 = arith.constant 9 : index
    %c0_135 = arith.constant 0 : index
    %c0_136 = arith.constant 0 : index
    %469 = vector.load %arg10[%c9_134, %c0_135, %c0_136] : memref<18x32x128xf32, #tpu.memory_space<vmem>>, vector<1x32x128xf32>
    %470 = vector.shape_cast %469 : vector<1x32x128xf32> to vector<32x128xf32>
    %c10_137 = arith.constant 10 : index
    %c0_138 = arith.constant 0 : index
    %c0_139 = arith.constant 0 : index
    %471 = vector.load %arg10[%c10_137, %c0_138, %c0_139] : memref<18x32x128xf32, #tpu.memory_space<vmem>>, vector<1x32x128xf32>
    %472 = vector.shape_cast %471 : vector<1x32x128xf32> to vector<32x128xf32>
    %c11 = arith.constant 11 : index
    %c0_140 = arith.constant 0 : index
    %c0_141 = arith.constant 0 : index
    %473 = vector.load %arg10[%c11, %c0_140, %c0_141] : memref<18x32x128xf32, #tpu.memory_space<vmem>>, vector<1x32x128xf32>
    %474 = vector.shape_cast %473 : vector<1x32x128xf32> to vector<32x128xf32>
    %475 = vector.extract_strided_slice %470 {offsets = [7, 0], sizes = [16, 128], strides = [1, 1]} : vector<32x128xf32> to vector<16x128xf32>
    %476 = vector.broadcast %18 : vector<1x128xf32> to vector<16x128xf32>
    %477 = arith.mulf %475, %476 : vector<16x128xf32>
    %478 = vector.extract_strided_slice %470 {offsets = [8, 0], sizes = [16, 128], strides = [1, 1]} : vector<32x128xf32> to vector<16x128xf32>
    %479 = vector.broadcast %19 : vector<1x128xf32> to vector<16x128xf32>
    %480 = arith.mulf %478, %479 : vector<16x128xf32>
    %481 = arith.addf %477, %480 : vector<16x128xf32>
    %482 = vector.extract_strided_slice %470 {offsets = [9, 0], sizes = [16, 128], strides = [1, 1]} : vector<32x128xf32> to vector<16x128xf32>
    %483 = vector.broadcast %20 : vector<1x128xf32> to vector<16x128xf32>
    %484 = arith.mulf %482, %483 : vector<16x128xf32>
    %485 = arith.addf %481, %484 : vector<16x128xf32>
    %486 = vector.extract_strided_slice %472 {offsets = [7, 0], sizes = [16, 128], strides = [1, 1]} : vector<32x128xf32> to vector<16x128xf32>
    %487 = vector.broadcast %21 : vector<1x128xf32> to vector<16x128xf32>
    %488 = arith.mulf %486, %487 : vector<16x128xf32>
    %489 = arith.addf %485, %488 : vector<16x128xf32>
    %490 = vector.extract_strided_slice %472 {offsets = [8, 0], sizes = [16, 128], strides = [1, 1]} : vector<32x128xf32> to vector<16x128xf32>
    %491 = vector.broadcast %22 : vector<1x128xf32> to vector<16x128xf32>
    %492 = arith.mulf %490, %491 : vector<16x128xf32>
    %493 = arith.addf %489, %492 : vector<16x128xf32>
    %494 = vector.extract_strided_slice %472 {offsets = [9, 0], sizes = [16, 128], strides = [1, 1]} : vector<32x128xf32> to vector<16x128xf32>
    %495 = vector.broadcast %23 : vector<1x128xf32> to vector<16x128xf32>
    %496 = arith.mulf %494, %495 : vector<16x128xf32>
    %497 = arith.addf %493, %496 : vector<16x128xf32>
    %498 = vector.extract_strided_slice %474 {offsets = [7, 0], sizes = [16, 128], strides = [1, 1]} : vector<32x128xf32> to vector<16x128xf32>
    %499 = vector.broadcast %24 : vector<1x128xf32> to vector<16x128xf32>
    %500 = arith.mulf %498, %499 : vector<16x128xf32>
    %501 = arith.addf %497, %500 : vector<16x128xf32>
    %502 = vector.extract_strided_slice %474 {offsets = [8, 0], sizes = [16, 128], strides = [1, 1]} : vector<32x128xf32> to vector<16x128xf32>
    %503 = vector.broadcast %25 : vector<1x128xf32> to vector<16x128xf32>
    %504 = arith.mulf %502, %503 : vector<16x128xf32>
    %505 = arith.addf %501, %504 : vector<16x128xf32>
    %506 = vector.extract_strided_slice %474 {offsets = [9, 0], sizes = [16, 128], strides = [1, 1]} : vector<32x128xf32> to vector<16x128xf32>
    %507 = vector.broadcast %26 : vector<1x128xf32> to vector<16x128xf32>
    %508 = arith.mulf %506, %507 : vector<16x128xf32>
    %509 = arith.addf %505, %508 : vector<16x128xf32>
    %510 = vector.broadcast %27 : vector<1x128xf32> to vector<16x128xf32>
    %511 = arith.addf %509, %510 : vector<16x128xf32>
    %cst_142 = arith.constant 0.000000e+00 : f32
    %512 = vector.broadcast %cst_142 : f32 to vector<16x128xf32>
    %513 = arith.maximumf %511, %512 : vector<16x128xf32>
    %514 = arith.truncf %513 : vector<16x128xf32> to vector<16x128xbf16>
    %c9_143 = arith.constant 9 : index
    %c0_144 = arith.constant 0 : index
    %c0_145 = arith.constant 0 : index
    %515 = vector.load %arg11[%c9_143, %c0_144, %c0_145] : memref<16x16x128xbf16, #tpu.memory_space<vmem>>, vector<1x16x128xbf16>
    %516 = vector.shape_cast %515 : vector<1x16x128xbf16> to vector<16x128xbf16>
    %517 = vector.shape_cast %514 : vector<16x128xbf16> to vector<1x16x128xbf16>
    tpu.vector_store %arg11[%c9_143, %c0_144, %c0_145], %517 {strides = array<i32>} : memref<16x16x128xbf16, #tpu.memory_space<vmem>>, vector<1x16x128xbf16>,
    %c10_146 = arith.constant 10 : index
    %c0_147 = arith.constant 0 : index
    %c0_148 = arith.constant 0 : index
    %518 = vector.load %arg10[%c10_146, %c0_147, %c0_148] : memref<18x32x128xf32, #tpu.memory_space<vmem>>, vector<1x32x128xf32>
    %519 = vector.shape_cast %518 : vector<1x32x128xf32> to vector<32x128xf32>
    %c11_149 = arith.constant 11 : index
    %c0_150 = arith.constant 0 : index
    %c0_151 = arith.constant 0 : index
    %520 = vector.load %arg10[%c11_149, %c0_150, %c0_151] : memref<18x32x128xf32, #tpu.memory_space<vmem>>, vector<1x32x128xf32>
    %521 = vector.shape_cast %520 : vector<1x32x128xf32> to vector<32x128xf32>
    %c12 = arith.constant 12 : index
    %c0_152 = arith.constant 0 : index
    %c0_153 = arith.constant 0 : index
    %522 = vector.load %arg10[%c12, %c0_152, %c0_153] : memref<18x32x128xf32, #tpu.memory_space<vmem>>, vector<1x32x128xf32>
    %523 = vector.shape_cast %522 : vector<1x32x128xf32> to vector<32x128xf32>
    %524 = vector.extract_strided_slice %519 {offsets = [7, 0], sizes = [16, 128], strides = [1, 1]} : vector<32x128xf32> to vector<16x128xf32>
    %525 = vector.broadcast %18 : vector<1x128xf32> to vector<16x128xf32>
    %526 = arith.mulf %524, %525 : vector<16x128xf32>
    %527 = vector.extract_strided_slice %519 {offsets = [8, 0], sizes = [16, 128], strides = [1, 1]} : vector<32x128xf32> to vector<16x128xf32>
    %528 = vector.broadcast %19 : vector<1x128xf32> to vector<16x128xf32>
    %529 = arith.mulf %527, %528 : vector<16x128xf32>
    %530 = arith.addf %526, %529 : vector<16x128xf32>
    %531 = vector.extract_strided_slice %519 {offsets = [9, 0], sizes = [16, 128], strides = [1, 1]} : vector<32x128xf32> to vector<16x128xf32>
    %532 = vector.broadcast %20 : vector<1x128xf32> to vector<16x128xf32>
    %533 = arith.mulf %531, %532 : vector<16x128xf32>
    %534 = arith.addf %530, %533 : vector<16x128xf32>
    %535 = vector.extract_strided_slice %521 {offsets = [7, 0], sizes = [16, 128], strides = [1, 1]} : vector<32x128xf32> to vector<16x128xf32>
    %536 = vector.broadcast %21 : vector<1x128xf32> to vector<16x128xf32>
    %537 = arith.mulf %535, %536 : vector<16x128xf32>
    %538 = arith.addf %534, %537 : vector<16x128xf32>
    %539 = vector.extract_strided_slice %521 {offsets = [8, 0], sizes = [16, 128], strides = [1, 1]} : vector<32x128xf32> to vector<16x128xf32>
    %540 = vector.broadcast %22 : vector<1x128xf32> to vector<16x128xf32>
    %541 = arith.mulf %539, %540 : vector<16x128xf32>
    %542 = arith.addf %538, %541 : vector<16x128xf32>
    %543 = vector.extract_strided_slice %521 {offsets = [9, 0], sizes = [16, 128], strides = [1, 1]} : vector<32x128xf32> to vector<16x128xf32>
    %544 = vector.broadcast %23 : vector<1x128xf32> to vector<16x128xf32>
    %545 = arith.mulf %543, %544 : vector<16x128xf32>
    %546 = arith.addf %542, %545 : vector<16x128xf32>
    %547 = vector.extract_strided_slice %523 {offsets = [7, 0], sizes = [16, 128], strides = [1, 1]} : vector<32x128xf32> to vector<16x128xf32>
    %548 = vector.broadcast %24 : vector<1x128xf32> to vector<16x128xf32>
    %549 = arith.mulf %547, %548 : vector<16x128xf32>
    %550 = arith.addf %546, %549 : vector<16x128xf32>
    %551 = vector.extract_strided_slice %523 {offsets = [8, 0], sizes = [16, 128], strides = [1, 1]} : vector<32x128xf32> to vector<16x128xf32>
    %552 = vector.broadcast %25 : vector<1x128xf32> to vector<16x128xf32>
    %553 = arith.mulf %551, %552 : vector<16x128xf32>
    %554 = arith.addf %550, %553 : vector<16x128xf32>
    %555 = vector.extract_strided_slice %523 {offsets = [9, 0], sizes = [16, 128], strides = [1, 1]} : vector<32x128xf32> to vector<16x128xf32>
    %556 = vector.broadcast %26 : vector<1x128xf32> to vector<16x128xf32>
    %557 = arith.mulf %555, %556 : vector<16x128xf32>
    %558 = arith.addf %554, %557 : vector<16x128xf32>
    %559 = vector.broadcast %27 : vector<1x128xf32> to vector<16x128xf32>
    %560 = arith.addf %558, %559 : vector<16x128xf32>
    %cst_154 = arith.constant 0.000000e+00 : f32
    %561 = vector.broadcast %cst_154 : f32 to vector<16x128xf32>
    %562 = arith.maximumf %560, %561 : vector<16x128xf32>
    %563 = arith.truncf %562 : vector<16x128xf32> to vector<16x128xbf16>
    %c10_155 = arith.constant 10 : index
    %c0_156 = arith.constant 0 : index
    %c0_157 = arith.constant 0 : index
    %564 = vector.load %arg11[%c10_155, %c0_156, %c0_157] : memref<16x16x128xbf16, #tpu.memory_space<vmem>>, vector<1x16x128xbf16>
    %565 = vector.shape_cast %564 : vector<1x16x128xbf16> to vector<16x128xbf16>
    %566 = vector.shape_cast %563 : vector<16x128xbf16> to vector<1x16x128xbf16>
    tpu.vector_store %arg11[%c10_155, %c0_156, %c0_157], %566 {strides = array<i32>} : memref<16x16x128xbf16, #tpu.memory_space<vmem>>, vector<1x16x128xbf16>,
    %c11_158 = arith.constant 11 : index
    %c0_159 = arith.constant 0 : index
    %c0_160 = arith.constant 0 : index
    %567 = vector.load %arg10[%c11_158, %c0_159, %c0_160] : memref<18x32x128xf32, #tpu.memory_space<vmem>>, vector<1x32x128xf32>
    %568 = vector.shape_cast %567 : vector<1x32x128xf32> to vector<32x128xf32>
    %c12_161 = arith.constant 12 : index
    %c0_162 = arith.constant 0 : index
    %c0_163 = arith.constant 0 : index
    %569 = vector.load %arg10[%c12_161, %c0_162, %c0_163] : memref<18x32x128xf32, #tpu.memory_space<vmem>>, vector<1x32x128xf32>
    %570 = vector.shape_cast %569 : vector<1x32x128xf32> to vector<32x128xf32>
    %c13 = arith.constant 13 : index
    %c0_164 = arith.constant 0 : index
    %c0_165 = arith.constant 0 : index
    %571 = vector.load %arg10[%c13, %c0_164, %c0_165] : memref<18x32x128xf32, #tpu.memory_space<vmem>>, vector<1x32x128xf32>
    %572 = vector.shape_cast %571 : vector<1x32x128xf32> to vector<32x128xf32>
    %573 = vector.extract_strided_slice %568 {offsets = [7, 0], sizes = [16, 128], strides = [1, 1]} : vector<32x128xf32> to vector<16x128xf32>
    %574 = vector.broadcast %18 : vector<1x128xf32> to vector<16x128xf32>
    %575 = arith.mulf %573, %574 : vector<16x128xf32>
    %576 = vector.extract_strided_slice %568 {offsets = [8, 0], sizes = [16, 128], strides = [1, 1]} : vector<32x128xf32> to vector<16x128xf32>
    %577 = vector.broadcast %19 : vector<1x128xf32> to vector<16x128xf32>
    %578 = arith.mulf %576, %577 : vector<16x128xf32>
    %579 = arith.addf %575, %578 : vector<16x128xf32>
    %580 = vector.extract_strided_slice %568 {offsets = [9, 0], sizes = [16, 128], strides = [1, 1]} : vector<32x128xf32> to vector<16x128xf32>
    %581 = vector.broadcast %20 : vector<1x128xf32> to vector<16x128xf32>
    %582 = arith.mulf %580, %581 : vector<16x128xf32>
    %583 = arith.addf %579, %582 : vector<16x128xf32>
    %584 = vector.extract_strided_slice %570 {offsets = [7, 0], sizes = [16, 128], strides = [1, 1]} : vector<32x128xf32> to vector<16x128xf32>
    %585 = vector.broadcast %21 : vector<1x128xf32> to vector<16x128xf32>
    %586 = arith.mulf %584, %585 : vector<16x128xf32>
    %587 = arith.addf %583, %586 : vector<16x128xf32>
    %588 = vector.extract_strided_slice %570 {offsets = [8, 0], sizes = [16, 128], strides = [1, 1]} : vector<32x128xf32> to vector<16x128xf32>
    %589 = vector.broadcast %22 : vector<1x128xf32> to vector<16x128xf32>
    %590 = arith.mulf %588, %589 : vector<16x128xf32>
    %591 = arith.addf %587, %590 : vector<16x128xf32>
    %592 = vector.extract_strided_slice %570 {offsets = [9, 0], sizes = [16, 128], strides = [1, 1]} : vector<32x128xf32> to vector<16x128xf32>
    %593 = vector.broadcast %23 : vector<1x128xf32> to vector<16x128xf32>
    %594 = arith.mulf %592, %593 : vector<16x128xf32>
    %595 = arith.addf %591, %594 : vector<16x128xf32>
    %596 = vector.extract_strided_slice %572 {offsets = [7, 0], sizes = [16, 128], strides = [1, 1]} : vector<32x128xf32> to vector<16x128xf32>
    %597 = vector.broadcast %24 : vector<1x128xf32> to vector<16x128xf32>
    %598 = arith.mulf %596, %597 : vector<16x128xf32>
    %599 = arith.addf %595, %598 : vector<16x128xf32>
    %600 = vector.extract_strided_slice %572 {offsets = [8, 0], sizes = [16, 128], strides = [1, 1]} : vector<32x128xf32> to vector<16x128xf32>
    %601 = vector.broadcast %25 : vector<1x128xf32> to vector<16x128xf32>
    %602 = arith.mulf %600, %601 : vector<16x128xf32>
    %603 = arith.addf %599, %602 : vector<16x128xf32>
    %604 = vector.extract_strided_slice %572 {offsets = [9, 0], sizes = [16, 128], strides = [1, 1]} : vector<32x128xf32> to vector<16x128xf32>
    %605 = vector.broadcast %26 : vector<1x128xf32> to vector<16x128xf32>
    %606 = arith.mulf %604, %605 : vector<16x128xf32>
    %607 = arith.addf %603, %606 : vector<16x128xf32>
    %608 = vector.broadcast %27 : vector<1x128xf32> to vector<16x128xf32>
    %609 = arith.addf %607, %608 : vector<16x128xf32>
    %cst_166 = arith.constant 0.000000e+00 : f32
    %610 = vector.broadcast %cst_166 : f32 to vector<16x128xf32>
    %611 = arith.maximumf %609, %610 : vector<16x128xf32>
    %612 = arith.truncf %611 : vector<16x128xf32> to vector<16x128xbf16>
    %c11_167 = arith.constant 11 : index
    %c0_168 = arith.constant 0 : index
    %c0_169 = arith.constant 0 : index
    %613 = vector.load %arg11[%c11_167, %c0_168, %c0_169] : memref<16x16x128xbf16, #tpu.memory_space<vmem>>, vector<1x16x128xbf16>
    %614 = vector.shape_cast %613 : vector<1x16x128xbf16> to vector<16x128xbf16>
    %615 = vector.shape_cast %612 : vector<16x128xbf16> to vector<1x16x128xbf16>
    tpu.vector_store %arg11[%c11_167, %c0_168, %c0_169], %615 {strides = array<i32>} : memref<16x16x128xbf16, #tpu.memory_space<vmem>>, vector<1x16x128xbf16>,
    %c12_170 = arith.constant 12 : index
    %c0_171 = arith.constant 0 : index
    %c0_172 = arith.constant 0 : index
    %616 = vector.load %arg10[%c12_170, %c0_171, %c0_172] : memref<18x32x128xf32, #tpu.memory_space<vmem>>, vector<1x32x128xf32>
    %617 = vector.shape_cast %616 : vector<1x32x128xf32> to vector<32x128xf32>
    %c13_173 = arith.constant 13 : index
    %c0_174 = arith.constant 0 : index
    %c0_175 = arith.constant 0 : index
    %618 = vector.load %arg10[%c13_173, %c0_174, %c0_175] : memref<18x32x128xf32, #tpu.memory_space<vmem>>, vector<1x32x128xf32>
    %619 = vector.shape_cast %618 : vector<1x32x128xf32> to vector<32x128xf32>
    %c14 = arith.constant 14 : index
    %c0_176 = arith.constant 0 : index
    %c0_177 = arith.constant 0 : index
    %620 = vector.load %arg10[%c14, %c0_176, %c0_177] : memref<18x32x128xf32, #tpu.memory_space<vmem>>, vector<1x32x128xf32>
    %621 = vector.shape_cast %620 : vector<1x32x128xf32> to vector<32x128xf32>
    %622 = vector.extract_strided_slice %617 {offsets = [7, 0], sizes = [16, 128], strides = [1, 1]} : vector<32x128xf32> to vector<16x128xf32>
    %623 = vector.broadcast %18 : vector<1x128xf32> to vector<16x128xf32>
    %624 = arith.mulf %622, %623 : vector<16x128xf32>
    %625 = vector.extract_strided_slice %617 {offsets = [8, 0], sizes = [16, 128], strides = [1, 1]} : vector<32x128xf32> to vector<16x128xf32>
    %626 = vector.broadcast %19 : vector<1x128xf32> to vector<16x128xf32>
    %627 = arith.mulf %625, %626 : vector<16x128xf32>
    %628 = arith.addf %624, %627 : vector<16x128xf32>
    %629 = vector.extract_strided_slice %617 {offsets = [9, 0], sizes = [16, 128], strides = [1, 1]} : vector<32x128xf32> to vector<16x128xf32>
    %630 = vector.broadcast %20 : vector<1x128xf32> to vector<16x128xf32>
    %631 = arith.mulf %629, %630 : vector<16x128xf32>
    %632 = arith.addf %628, %631 : vector<16x128xf32>
    %633 = vector.extract_strided_slice %619 {offsets = [7, 0], sizes = [16, 128], strides = [1, 1]} : vector<32x128xf32> to vector<16x128xf32>
    %634 = vector.broadcast %21 : vector<1x128xf32> to vector<16x128xf32>
    %635 = arith.mulf %633, %634 : vector<16x128xf32>
    %636 = arith.addf %632, %635 : vector<16x128xf32>
    %637 = vector.extract_strided_slice %619 {offsets = [8, 0], sizes = [16, 128], strides = [1, 1]} : vector<32x128xf32> to vector<16x128xf32>
    %638 = vector.broadcast %22 : vector<1x128xf32> to vector<16x128xf32>
    %639 = arith.mulf %637, %638 : vector<16x128xf32>
    %640 = arith.addf %636, %639 : vector<16x128xf32>
    %641 = vector.extract_strided_slice %619 {offsets = [9, 0], sizes = [16, 128], strides = [1, 1]} : vector<32x128xf32> to vector<16x128xf32>
    %642 = vector.broadcast %23 : vector<1x128xf32> to vector<16x128xf32>
    %643 = arith.mulf %641, %642 : vector<16x128xf32>
    %644 = arith.addf %640, %643 : vector<16x128xf32>
    %645 = vector.extract_strided_slice %621 {offsets = [7, 0], sizes = [16, 128], strides = [1, 1]} : vector<32x128xf32> to vector<16x128xf32>
    %646 = vector.broadcast %24 : vector<1x128xf32> to vector<16x128xf32>
    %647 = arith.mulf %645, %646 : vector<16x128xf32>
    %648 = arith.addf %644, %647 : vector<16x128xf32>
    %649 = vector.extract_strided_slice %621 {offsets = [8, 0], sizes = [16, 128], strides = [1, 1]} : vector<32x128xf32> to vector<16x128xf32>
    %650 = vector.broadcast %25 : vector<1x128xf32> to vector<16x128xf32>
    %651 = arith.mulf %649, %650 : vector<16x128xf32>
    %652 = arith.addf %648, %651 : vector<16x128xf32>
    %653 = vector.extract_strided_slice %621 {offsets = [9, 0], sizes = [16, 128], strides = [1, 1]} : vector<32x128xf32> to vector<16x128xf32>
    %654 = vector.broadcast %26 : vector<1x128xf32> to vector<16x128xf32>
    %655 = arith.mulf %653, %654 : vector<16x128xf32>
    %656 = arith.addf %652, %655 : vector<16x128xf32>
    %657 = vector.broadcast %27 : vector<1x128xf32> to vector<16x128xf32>
    %658 = arith.addf %656, %657 : vector<16x128xf32>
    %cst_178 = arith.constant 0.000000e+00 : f32
    %659 = vector.broadcast %cst_178 : f32 to vector<16x128xf32>
    %660 = arith.maximumf %658, %659 : vector<16x128xf32>
    %661 = arith.truncf %660 : vector<16x128xf32> to vector<16x128xbf16>
    %c12_179 = arith.constant 12 : index
    %c0_180 = arith.constant 0 : index
    %c0_181 = arith.constant 0 : index
    %662 = vector.load %arg11[%c12_179, %c0_180, %c0_181] : memref<16x16x128xbf16, #tpu.memory_space<vmem>>, vector<1x16x128xbf16>
    %663 = vector.shape_cast %662 : vector<1x16x128xbf16> to vector<16x128xbf16>
    %664 = vector.shape_cast %661 : vector<16x128xbf16> to vector<1x16x128xbf16>
    tpu.vector_store %arg11[%c12_179, %c0_180, %c0_181], %664 {strides = array<i32>} : memref<16x16x128xbf16, #tpu.memory_space<vmem>>, vector<1x16x128xbf16>,
    %c13_182 = arith.constant 13 : index
    %c0_183 = arith.constant 0 : index
    %c0_184 = arith.constant 0 : index
    %665 = vector.load %arg10[%c13_182, %c0_183, %c0_184] : memref<18x32x128xf32, #tpu.memory_space<vmem>>, vector<1x32x128xf32>
    %666 = vector.shape_cast %665 : vector<1x32x128xf32> to vector<32x128xf32>
    %c14_185 = arith.constant 14 : index
    %c0_186 = arith.constant 0 : index
    %c0_187 = arith.constant 0 : index
    %667 = vector.load %arg10[%c14_185, %c0_186, %c0_187] : memref<18x32x128xf32, #tpu.memory_space<vmem>>, vector<1x32x128xf32>
    %668 = vector.shape_cast %667 : vector<1x32x128xf32> to vector<32x128xf32>
    %c15 = arith.constant 15 : index
    %c0_188 = arith.constant 0 : index
    %c0_189 = arith.constant 0 : index
    %669 = vector.load %arg10[%c15, %c0_188, %c0_189] : memref<18x32x128xf32, #tpu.memory_space<vmem>>, vector<1x32x128xf32>
    %670 = vector.shape_cast %669 : vector<1x32x128xf32> to vector<32x128xf32>
    %671 = vector.extract_strided_slice %666 {offsets = [7, 0], sizes = [16, 128], strides = [1, 1]} : vector<32x128xf32> to vector<16x128xf32>
    %672 = vector.broadcast %18 : vector<1x128xf32> to vector<16x128xf32>
    %673 = arith.mulf %671, %672 : vector<16x128xf32>
    %674 = vector.extract_strided_slice %666 {offsets = [8, 0], sizes = [16, 128], strides = [1, 1]} : vector<32x128xf32> to vector<16x128xf32>
    %675 = vector.broadcast %19 : vector<1x128xf32> to vector<16x128xf32>
    %676 = arith.mulf %674, %675 : vector<16x128xf32>
    %677 = arith.addf %673, %676 : vector<16x128xf32>
    %678 = vector.extract_strided_slice %666 {offsets = [9, 0], sizes = [16, 128], strides = [1, 1]} : vector<32x128xf32> to vector<16x128xf32>
    %679 = vector.broadcast %20 : vector<1x128xf32> to vector<16x128xf32>
    %680 = arith.mulf %678, %679 : vector<16x128xf32>
    %681 = arith.addf %677, %680 : vector<16x128xf32>
    %682 = vector.extract_strided_slice %668 {offsets = [7, 0], sizes = [16, 128], strides = [1, 1]} : vector<32x128xf32> to vector<16x128xf32>
    %683 = vector.broadcast %21 : vector<1x128xf32> to vector<16x128xf32>
    %684 = arith.mulf %682, %683 : vector<16x128xf32>
    %685 = arith.addf %681, %684 : vector<16x128xf32>
    %686 = vector.extract_strided_slice %668 {offsets = [8, 0], sizes = [16, 128], strides = [1, 1]} : vector<32x128xf32> to vector<16x128xf32>
    %687 = vector.broadcast %22 : vector<1x128xf32> to vector<16x128xf32>
    %688 = arith.mulf %686, %687 : vector<16x128xf32>
    %689 = arith.addf %685, %688 : vector<16x128xf32>
    %690 = vector.extract_strided_slice %668 {offsets = [9, 0], sizes = [16, 128], strides = [1, 1]} : vector<32x128xf32> to vector<16x128xf32>
    %691 = vector.broadcast %23 : vector<1x128xf32> to vector<16x128xf32>
    %692 = arith.mulf %690, %691 : vector<16x128xf32>
    %693 = arith.addf %689, %692 : vector<16x128xf32>
    %694 = vector.extract_strided_slice %670 {offsets = [7, 0], sizes = [16, 128], strides = [1, 1]} : vector<32x128xf32> to vector<16x128xf32>
    %695 = vector.broadcast %24 : vector<1x128xf32> to vector<16x128xf32>
    %696 = arith.mulf %694, %695 : vector<16x128xf32>
    %697 = arith.addf %693, %696 : vector<16x128xf32>
    %698 = vector.extract_strided_slice %670 {offsets = [8, 0], sizes = [16, 128], strides = [1, 1]} : vector<32x128xf32> to vector<16x128xf32>
    %699 = vector.broadcast %25 : vector<1x128xf32> to vector<16x128xf32>
    %700 = arith.mulf %698, %699 : vector<16x128xf32>
    %701 = arith.addf %697, %700 : vector<16x128xf32>
    %702 = vector.extract_strided_slice %670 {offsets = [9, 0], sizes = [16, 128], strides = [1, 1]} : vector<32x128xf32> to vector<16x128xf32>
    %703 = vector.broadcast %26 : vector<1x128xf32> to vector<16x128xf32>
    %704 = arith.mulf %702, %703 : vector<16x128xf32>
    %705 = arith.addf %701, %704 : vector<16x128xf32>
    %706 = vector.broadcast %27 : vector<1x128xf32> to vector<16x128xf32>
    %707 = arith.addf %705, %706 : vector<16x128xf32>
    %cst_190 = arith.constant 0.000000e+00 : f32
    %708 = vector.broadcast %cst_190 : f32 to vector<16x128xf32>
    %709 = arith.maximumf %707, %708 : vector<16x128xf32>
    %710 = arith.truncf %709 : vector<16x128xf32> to vector<16x128xbf16>
    %c13_191 = arith.constant 13 : index
    %c0_192 = arith.constant 0 : index
    %c0_193 = arith.constant 0 : index
    %711 = vector.load %arg11[%c13_191, %c0_192, %c0_193] : memref<16x16x128xbf16, #tpu.memory_space<vmem>>, vector<1x16x128xbf16>
    %712 = vector.shape_cast %711 : vector<1x16x128xbf16> to vector<16x128xbf16>
    %713 = vector.shape_cast %710 : vector<16x128xbf16> to vector<1x16x128xbf16>
    tpu.vector_store %arg11[%c13_191, %c0_192, %c0_193], %713 {strides = array<i32>} : memref<16x16x128xbf16, #tpu.memory_space<vmem>>, vector<1x16x128xbf16>,
    %c14_194 = arith.constant 14 : index
    %c0_195 = arith.constant 0 : index
    %c0_196 = arith.constant 0 : index
    %714 = vector.load %arg10[%c14_194, %c0_195, %c0_196] : memref<18x32x128xf32, #tpu.memory_space<vmem>>, vector<1x32x128xf32>
    %715 = vector.shape_cast %714 : vector<1x32x128xf32> to vector<32x128xf32>
    %c15_197 = arith.constant 15 : index
    %c0_198 = arith.constant 0 : index
    %c0_199 = arith.constant 0 : index
    %716 = vector.load %arg10[%c15_197, %c0_198, %c0_199] : memref<18x32x128xf32, #tpu.memory_space<vmem>>, vector<1x32x128xf32>
    %717 = vector.shape_cast %716 : vector<1x32x128xf32> to vector<32x128xf32>
    %c16 = arith.constant 16 : index
    %c0_200 = arith.constant 0 : index
    %c0_201 = arith.constant 0 : index
    %718 = vector.load %arg10[%c16, %c0_200, %c0_201] : memref<18x32x128xf32, #tpu.memory_space<vmem>>, vector<1x32x128xf32>
    %719 = vector.shape_cast %718 : vector<1x32x128xf32> to vector<32x128xf32>
    %720 = vector.extract_strided_slice %715 {offsets = [7, 0], sizes = [16, 128], strides = [1, 1]} : vector<32x128xf32> to vector<16x128xf32>
    %721 = vector.broadcast %18 : vector<1x128xf32> to vector<16x128xf32>
    %722 = arith.mulf %720, %721 : vector<16x128xf32>
    %723 = vector.extract_strided_slice %715 {offsets = [8, 0], sizes = [16, 128], strides = [1, 1]} : vector<32x128xf32> to vector<16x128xf32>
    %724 = vector.broadcast %19 : vector<1x128xf32> to vector<16x128xf32>
    %725 = arith.mulf %723, %724 : vector<16x128xf32>
    %726 = arith.addf %722, %725 : vector<16x128xf32>
    %727 = vector.extract_strided_slice %715 {offsets = [9, 0], sizes = [16, 128], strides = [1, 1]} : vector<32x128xf32> to vector<16x128xf32>
    %728 = vector.broadcast %20 : vector<1x128xf32> to vector<16x128xf32>
    %729 = arith.mulf %727, %728 : vector<16x128xf32>
    %730 = arith.addf %726, %729 : vector<16x128xf32>
    %731 = vector.extract_strided_slice %717 {offsets = [7, 0], sizes = [16, 128], strides = [1, 1]} : vector<32x128xf32> to vector<16x128xf32>
    %732 = vector.broadcast %21 : vector<1x128xf32> to vector<16x128xf32>
    %733 = arith.mulf %731, %732 : vector<16x128xf32>
    %734 = arith.addf %730, %733 : vector<16x128xf32>
    %735 = vector.extract_strided_slice %717 {offsets = [8, 0], sizes = [16, 128], strides = [1, 1]} : vector<32x128xf32> to vector<16x128xf32>
    %736 = vector.broadcast %22 : vector<1x128xf32> to vector<16x128xf32>
    %737 = arith.mulf %735, %736 : vector<16x128xf32>
    %738 = arith.addf %734, %737 : vector<16x128xf32>
    %739 = vector.extract_strided_slice %717 {offsets = [9, 0], sizes = [16, 128], strides = [1, 1]} : vector<32x128xf32> to vector<16x128xf32>
    %740 = vector.broadcast %23 : vector<1x128xf32> to vector<16x128xf32>
    %741 = arith.mulf %739, %740 : vector<16x128xf32>
    %742 = arith.addf %738, %741 : vector<16x128xf32>
    %743 = vector.extract_strided_slice %719 {offsets = [7, 0], sizes = [16, 128], strides = [1, 1]} : vector<32x128xf32> to vector<16x128xf32>
    %744 = vector.broadcast %24 : vector<1x128xf32> to vector<16x128xf32>
    %745 = arith.mulf %743, %744 : vector<16x128xf32>
    %746 = arith.addf %742, %745 : vector<16x128xf32>
    %747 = vector.extract_strided_slice %719 {offsets = [8, 0], sizes = [16, 128], strides = [1, 1]} : vector<32x128xf32> to vector<16x128xf32>
    %748 = vector.broadcast %25 : vector<1x128xf32> to vector<16x128xf32>
    %749 = arith.mulf %747, %748 : vector<16x128xf32>
    %750 = arith.addf %746, %749 : vector<16x128xf32>
    %751 = vector.extract_strided_slice %719 {offsets = [9, 0], sizes = [16, 128], strides = [1, 1]} : vector<32x128xf32> to vector<16x128xf32>
    %752 = vector.broadcast %26 : vector<1x128xf32> to vector<16x128xf32>
    %753 = arith.mulf %751, %752 : vector<16x128xf32>
    %754 = arith.addf %750, %753 : vector<16x128xf32>
    %755 = vector.broadcast %27 : vector<1x128xf32> to vector<16x128xf32>
    %756 = arith.addf %754, %755 : vector<16x128xf32>
    %cst_202 = arith.constant 0.000000e+00 : f32
    %757 = vector.broadcast %cst_202 : f32 to vector<16x128xf32>
    %758 = arith.maximumf %756, %757 : vector<16x128xf32>
    %759 = arith.truncf %758 : vector<16x128xf32> to vector<16x128xbf16>
    %c14_203 = arith.constant 14 : index
    %c0_204 = arith.constant 0 : index
    %c0_205 = arith.constant 0 : index
    %760 = vector.load %arg11[%c14_203, %c0_204, %c0_205] : memref<16x16x128xbf16, #tpu.memory_space<vmem>>, vector<1x16x128xbf16>
    %761 = vector.shape_cast %760 : vector<1x16x128xbf16> to vector<16x128xbf16>
    %762 = vector.shape_cast %759 : vector<16x128xbf16> to vector<1x16x128xbf16>
    tpu.vector_store %arg11[%c14_203, %c0_204, %c0_205], %762 {strides = array<i32>} : memref<16x16x128xbf16, #tpu.memory_space<vmem>>, vector<1x16x128xbf16>,
    %c15_206 = arith.constant 15 : index
    %c0_207 = arith.constant 0 : index
    %c0_208 = arith.constant 0 : index
    %763 = vector.load %arg10[%c15_206, %c0_207, %c0_208] : memref<18x32x128xf32, #tpu.memory_space<vmem>>, vector<1x32x128xf32>
    %764 = vector.shape_cast %763 : vector<1x32x128xf32> to vector<32x128xf32>
    %c16_209 = arith.constant 16 : index
    %c0_210 = arith.constant 0 : index
    %c0_211 = arith.constant 0 : index
    %765 = vector.load %arg10[%c16_209, %c0_210, %c0_211] : memref<18x32x128xf32, #tpu.memory_space<vmem>>, vector<1x32x128xf32>
    %766 = vector.shape_cast %765 : vector<1x32x128xf32> to vector<32x128xf32>
    %c17_212 = arith.constant 17 : index
    %c0_213 = arith.constant 0 : index
    %c0_214 = arith.constant 0 : index
    %767 = vector.load %arg10[%c17_212, %c0_213, %c0_214] : memref<18x32x128xf32, #tpu.memory_space<vmem>>, vector<1x32x128xf32>
    %768 = vector.shape_cast %767 : vector<1x32x128xf32> to vector<32x128xf32>
    %769 = vector.extract_strided_slice %764 {offsets = [7, 0], sizes = [16, 128], strides = [1, 1]} : vector<32x128xf32> to vector<16x128xf32>
    %770 = vector.broadcast %18 : vector<1x128xf32> to vector<16x128xf32>
    %771 = arith.mulf %769, %770 : vector<16x128xf32>
    %772 = vector.extract_strided_slice %764 {offsets = [8, 0], sizes = [16, 128], strides = [1, 1]} : vector<32x128xf32> to vector<16x128xf32>
    %773 = vector.broadcast %19 : vector<1x128xf32> to vector<16x128xf32>
    %774 = arith.mulf %772, %773 : vector<16x128xf32>
    %775 = arith.addf %771, %774 : vector<16x128xf32>
    %776 = vector.extract_strided_slice %764 {offsets = [9, 0], sizes = [16, 128], strides = [1, 1]} : vector<32x128xf32> to vector<16x128xf32>
    %777 = vector.broadcast %20 : vector<1x128xf32> to vector<16x128xf32>
    %778 = arith.mulf %776, %777 : vector<16x128xf32>
    %779 = arith.addf %775, %778 : vector<16x128xf32>
    %780 = vector.extract_strided_slice %766 {offsets = [7, 0], sizes = [16, 128], strides = [1, 1]} : vector<32x128xf32> to vector<16x128xf32>
    %781 = vector.broadcast %21 : vector<1x128xf32> to vector<16x128xf32>
    %782 = arith.mulf %780, %781 : vector<16x128xf32>
    %783 = arith.addf %779, %782 : vector<16x128xf32>
    %784 = vector.extract_strided_slice %766 {offsets = [8, 0], sizes = [16, 128], strides = [1, 1]} : vector<32x128xf32> to vector<16x128xf32>
    %785 = vector.broadcast %22 : vector<1x128xf32> to vector<16x128xf32>
    %786 = arith.mulf %784, %785 : vector<16x128xf32>
    %787 = arith.addf %783, %786 : vector<16x128xf32>
    %788 = vector.extract_strided_slice %766 {offsets = [9, 0], sizes = [16, 128], strides = [1, 1]} : vector<32x128xf32> to vector<16x128xf32>
    %789 = vector.broadcast %23 : vector<1x128xf32> to vector<16x128xf32>
    %790 = arith.mulf %788, %789 : vector<16x128xf32>
    %791 = arith.addf %787, %790 : vector<16x128xf32>
    %792 = vector.extract_strided_slice %768 {offsets = [7, 0], sizes = [16, 128], strides = [1, 1]} : vector<32x128xf32> to vector<16x128xf32>
    %793 = vector.broadcast %24 : vector<1x128xf32> to vector<16x128xf32>
    %794 = arith.mulf %792, %793 : vector<16x128xf32>
    %795 = arith.addf %791, %794 : vector<16x128xf32>
    %796 = vector.extract_strided_slice %768 {offsets = [8, 0], sizes = [16, 128], strides = [1, 1]} : vector<32x128xf32> to vector<16x128xf32>
    %797 = vector.broadcast %25 : vector<1x128xf32> to vector<16x128xf32>
    %798 = arith.mulf %796, %797 : vector<16x128xf32>
    %799 = arith.addf %795, %798 : vector<16x128xf32>
    %800 = vector.extract_strided_slice %768 {offsets = [9, 0], sizes = [16, 128], strides = [1, 1]} : vector<32x128xf32> to vector<16x128xf32>
    %801 = vector.broadcast %26 : vector<1x128xf32> to vector<16x128xf32>
    %802 = arith.mulf %800, %801 : vector<16x128xf32>
    %803 = arith.addf %799, %802 : vector<16x128xf32>
    %804 = vector.broadcast %27 : vector<1x128xf32> to vector<16x128xf32>
    %805 = arith.addf %803, %804 : vector<16x128xf32>
    %cst_215 = arith.constant 0.000000e+00 : f32
    %806 = vector.broadcast %cst_215 : f32 to vector<16x128xf32>
    %807 = arith.maximumf %805, %806 : vector<16x128xf32>
    %808 = arith.truncf %807 : vector<16x128xf32> to vector<16x128xbf16>
    %c15_216 = arith.constant 15 : index
    %c0_217 = arith.constant 0 : index
    %c0_218 = arith.constant 0 : index
    %809 = vector.load %arg11[%c15_216, %c0_217, %c0_218] : memref<16x16x128xbf16, #tpu.memory_space<vmem>>, vector<1x16x128xbf16>
    %810 = vector.shape_cast %809 : vector<1x16x128xbf16> to vector<16x128xbf16>
    %811 = vector.shape_cast %808 : vector<16x128xbf16> to vector<1x16x128xbf16>
    tpu.vector_store %arg11[%c15_216, %c0_217, %c0_218], %811 {strides = array<i32>} : memref<16x16x128xbf16, #tpu.memory_space<vmem>>, vector<1x16x128xbf16>,
    %c0_219 = arith.constant 0 : index
    %c0_220 = arith.constant 0 : index
    %c0_221 = arith.constant 0 : index
    %812 = vector.load %arg11[%c0_219, %c0_220, %c0_221] : memref<16x16x128xbf16, #tpu.memory_space<vmem>>, vector<16x16x128xbf16>
    %813 = vector.shape_cast %812 : vector<16x16x128xbf16> to vector<256x128xbf16>
    %c0_222 = arith.constant 0 : index
    %c0_223 = arith.constant 0 : index
    %814 = vector.load %arg6[%c0_222, %c0_223] : memref<128x128xbf16, #tpu.memory_space<vmem>>, vector<128x128xbf16>
    %cst_224 = arith.constant dense<0.000000e+00> : vector<256x128xf32>
    %815 = tpu.matmul %813, %814, %cst_224 {dimension_numbers = #tpu.dot_dimension_numbers<[1], [0], [0], [1], [0, 0, 1, 1], [], []>} : vector<256x128xbf16>, vector<128x128xbf16>, vector<256x128xf32> -> vector<256x128xf32>
    %c0_225 = arith.constant 0 : index
    %c0_226 = arith.constant 0 : index
    %816 = vector.load %arg7[%c0_225, %c0_226] : memref<1x128xf32, #tpu.memory_space<vmem>>, vector<1x128xf32>
    %817 = vector.broadcast %816 : vector<1x128xf32> to vector<256x128xf32>
    %818 = arith.addf %815, %817 : vector<256x128xf32>
    %819 = vector.shape_cast %818 : vector<256x128xf32> to vector<1x16x16x128xf32>
    %820 = arith.truncf %819 : vector<1x16x16x128xf32> to vector<1x16x16x128xbf16>
    %c0_227 = arith.constant 0 : index
    %c0_228 = arith.constant 0 : index
    %c0_229 = arith.constant 0 : index
    %c0_230 = arith.constant 0 : index
    %821 = vector.load %arg8[%c0_227, %c0_228, %c0_229, %c0_230] : memref<1x16x16x128xbf16, #tpu.memory_space<vmem>>, vector<1x16x16x128xbf16>
    tpu.vector_store %arg8[%c0_227, %c0_228, %c0_229, %c0_230], %820 {strides = array<i32>} : memref<1x16x16x128xbf16, #tpu.memory_space<vmem>>, vector<1x16x16x128xbf16>,
    %cst_231 = arith.constant dense<0.000000e+00> : vector<128xf32>
    %822 = vector.multi_reduction <add>, %818, %cst_231 [0] : vector<256x128xf32> to vector<128xf32>
    %823 = vector.shape_cast %822 : vector<128xf32> to vector<1x1x128xf32>
    %c0_232 = arith.constant 0 : index
    %c0_233 = arith.constant 0 : index
    %c0_234 = arith.constant 0 : index
    %824 = vector.load %arg9[%c0_232, %c0_233, %c0_234] : memref<1x1x128xf32, #tpu.memory_space<vmem>>, vector<1x1x128xf32>
    tpu.vector_store %arg9[%c0_232, %c0_233, %c0_234], %823 {strides = array<i32>} : memref<1x1x128xf32, #tpu.memory_space<vmem>>, vector<1x1x128xf32>,
    return
  }
  func.func @transform_0(%arg0: i32) -> (i32, i32, i32, i32) {
    %c0_i32 = arith.constant 0 : i32
    %c0_i32_0 = arith.constant 0 : i32
    %c0_i32_1 = arith.constant 0 : i32
    %c0_i32_2 = arith.constant 0 : i32
    return %arg0, %c0_i32, %c0_i32_0, %c0_i32_1 : i32, i32, i32, i32
  }
  func.func @transform_1(%arg0: i32) -> (i32, i32) {
    %c0_i32 = arith.constant 0 : i32
    %c0_i32_0 = arith.constant 0 : i32
    %c0_i32_1 = arith.constant 0 : i32
    return %c0_i32, %c0_i32_0 : i32, i32
  }
  func.func @transform_2(%arg0: i32) -> (i32, i32) {
    %c0_i32 = arith.constant 0 : i32
    %c0_i32_0 = arith.constant 0 : i32
    %c0_i32_1 = arith.constant 0 : i32
    return %c0_i32, %c0_i32_0 : i32, i32
  }
  func.func @transform_3(%arg0: i32) -> (i32, i32) {
    %c0_i32 = arith.constant 0 : i32
    %c0_i32_0 = arith.constant 0 : i32
    %c0_i32_1 = arith.constant 0 : i32
    return %c0_i32, %c0_i32_0 : i32, i32
  }
  func.func @transform_4(%arg0: i32) -> (i32, i32) {
    %c0_i32 = arith.constant 0 : i32
    %c0_i32_0 = arith.constant 0 : i32
    %c0_i32_1 = arith.constant 0 : i32
    return %c0_i32, %c0_i32_0 : i32, i32
  }
  func.func @transform_5(%arg0: i32) -> (i32, i32) {
    %c0_i32 = arith.constant 0 : i32
    %c0_i32_0 = arith.constant 0 : i32
    %c0_i32_1 = arith.constant 0 : i32
    return %c0_i32, %c0_i32_0 : i32, i32
  }
  func.func @transform_6(%arg0: i32) -> (i32, i32) {
    %c0_i32 = arith.constant 0 : i32
    %c0_i32_0 = arith.constant 0 : i32
    %c0_i32_1 = arith.constant 0 : i32
    return %c0_i32, %c0_i32_0 : i32, i32
  }
  func.func @transform_7(%arg0: i32) -> (i32, i32, i32, i32) {
    %c0_i32 = arith.constant 0 : i32
    %c0_i32_0 = arith.constant 0 : i32
    %c0_i32_1 = arith.constant 0 : i32
    %c0_i32_2 = arith.constant 0 : i32
    return %arg0, %c0_i32, %c0_i32_0, %c0_i32_1 : i32, i32, i32, i32
  }
  func.func @transform_8(%arg0: i32) -> (i32, i32, i32) {
    %c0_i32 = arith.constant 0 : i32
    %c0_i32_0 = arith.constant 0 : i32
    %c0_i32_1 = arith.constant 0 : i32
    return %arg0, %c0_i32, %c0_i32_0 : i32, i32, i32
  }
}

</mosaic_0001>

<bundles_post_ra>
// kernel: tpu_custom_call.1
= control target key start
LH: loop header
LB: loop body
LE: loop exit
PB: predicated region body
PF: predicated region fallthrough
CT: control target
= control target key end

     0   :  { %s6257_s0 = inlined_call_operand.hbm [shape: bf16[2,16,16,128], index: 0, kind: input, shape index: {}]   ;;  %s6258_s1 = inlined_call_operand.hbm [shape: bf16[128,128], index: 1, kind: input, shape index: {}]   ;;  %s6259_s2 = inlined_call_operand.vmem [shape: f32[1,128], index: 2, kind: input, shape index: {}]   ;;  %s6260_s3 = inlined_call_operand.hbm [shape: f32[9,128], index: 3, kind: input, shape index: {}]   ;;  %s6261_s4 = inlined_call_operand.vmem [shape: f32[1,128], index: 4, kind: input, shape index: {}]   ;;  %s6262_s5 = inlined_call_operand.hbm [shape: bf16[128,128], index: 5, kind: input, shape index: {}]   ;;  %s6263_s6 = inlined_call_operand.vmem [shape: f32[1,128], index: 6, kind: input, shape index: {}]   ;;  %s6264_s7 = inlined_call_operand.hbm [shape: bf16[2,16,16,128], index: 7, kind: output, shape index: {0}]   ;;  %s6265_s8 = inlined_call_operand.hbm [shape: f32[2,1,128], index: 8, kind: output, shape index: {1}]  }
   0x1   :  { %6284 = sst [smem:[#allocation38_spill]] %s6258_s1 }
   0x2   :  { %14 = vsyncpa [#allocation5], 0 }
   0x3   :  { %16 = vsyncpa [#allocation5 + $0x1], 0 }
   0x4   :  { %17 = vsyncpa [#allocation8], 0 }
   0x5   :  { %18 = vsyncpa [#allocation11], 0 }
   0x6   :  { %19 = vsyncpa [#allocation6], 0 }
   0x7   :  { %21 = vsyncpa [#allocation6 + $0x1], 0 }
   0x8   :  { %22 = vsyncpa [#allocation14], 0 }
   0x9   :  { %24 = vsyncpa [#allocation14 + $0x1], 0  ;;  %s4601_s27 = smov 0   ;;  %s4603_s28 = smov 0  }
   0xa   :  { %s4605_s29 = smov 0   ;;  %s4607_s30 = smov 0  }
   0xb LB: > { %6285 = sst [smem:[#allocation20_spill]] %s4529_s27  ;;  %s4622_s9 = sadd.s32 4294967295, %s4541_s30   ;;  %s4541_s30 = sphi %s4607_s30, %s6359_s30   ;;  %s4537_s29 = sphi %s4605_s29, %s6358_s29   ;;  %s4533_s28 = sphi %s4603_s28, %s6357_s28   ;;  %s4529_s27 = sphi %s4601_s27, %s6356_s27  }
   0xc   : > { %s3832_s10 = sadd.s32 4294967294, %s4541_s30   ;;  %p50_p0 = scmp.ne.s32.totalorder %s4533_s28, %s4529_s27 }
   0xd   : > { %p6266_p1 = scmp.eq.s32.totalorder %s4622_s9, 0  ;;  %p206_p3 = scmp.eq.s32.totalorder %s3832_s10, 1 }
   0xe   : > { %p3833_p5 = scmp.ge.s32.totalorder %s4541_s30, 1  ;;  %p239_p7 = scmp.lt.s32.totalorder %s4541_s30, 3 }
   0xf   : > { %p4631_p4 = por %p6266_p1, %p50_p0  ;;  %p4636_p6 = por %p206_p3, %p50_p0 }
  0x10   : > { %p4641_p8 = pnand %p3833_p5, %p239_p7  ;;  %s4543_s14 = smov [#allocation7]  }
  0x11   : > { %s6286_s11 = scalar_select %p4631_p4, 1, 0 }
  0x12   : > { %s6287_s12 = scalar_select %p4636_p6, 1, 0 }
  0x13   : > { %s6289_s13 = scalar_select %p4641_p8, 1, 0 }
  0x14   : > { %6288 = sst [smem:[#allocation21_spill]] %s6287_s12  ;;  %s251_s15 = sshll.u32 %s4543_s14, 4  ;;  %s4645_s15 = int_to_ptr.vmem [resolvable:$true] %s251_s15 }
  0x15   : > { %p4212_p9 = pneg %p4641_p8  ;;  %s4544_s17 = smov [#allocation9]  }
  0x16   : > { %s267_s18 = sshll.u32 %s4544_s17, 4  ;;  %s6291_s1 = sld [smem:[#allocation38_spill]]  ;;  %s4656_s18 = int_to_ptr.vmem [resolvable:$true] %s267_s18 }
  0x17   : > { %p4652_p11 = pnand %p4212_p9, %p6266_p1 }
  0x19   : > { %p4666_p13 = pneg %p4652_p11 }
  0x1c   : > { %s4321_s21 = scalar_lea.hbm %s6291_s1, 1024 }
  0x1d   : > { %p4322_p12 = scmp.ne.s32.totalorder %s6291_s1, %s4321_s21  ;;  %p4328_p5 = scmp.lt.u32.totalorder %s4321_s21, %s6291_s1 }
  0x1f   : > { %p4324_p0 = pnand %p4666_p13, %p4322_p12 }
  0x21   : > { %p4325_p3 = pneg %p4324_p0 }
  0x23   : > { %p4330_p7 = pnand %p4328_p5, %p4325_p3 }
  0x25   : > { %4333 = shalt.err (!%p4330_p7)
}
  0x26   : > { %s4334_s10 = scalar_lea.vmem %s4645_s15, 1024  ;;  %p4342_p2 = scmp.lt.s32.totalorder %s4645_s15, %s4645_s15 }
  0x27   : > { %p4335_p9 = scmp.ne.s32.totalorder %s4645_s15, %s4334_s10  ;;  %p4343_p6 = scmp.lt.s32.totalorder %s4334_s10, %s4334_s10 }
  0x29   : > { %p4337_p10 = pnand %p4335_p9, %p4666_p13  ;;  %p4344_p12 = por %p4343_p6, %p4342_p2 }
  0x2b   : > { %p4338_p1 = pneg %p4337_p10 }
  0x2d   : > { %p4345_p0 = pnand %p4344_p12, %p4338_p1 }
  0x2f   : > { %4348 = shalt.err (!%p4345_p0)
}
  0x30   : > { %s6268_s14 = smov 64   ;;  %s6270_s17 = smov 4  }
  0x31   : > { %4215 = dma.hbm_to_vmem [thread:$0]  (!%p4652_p11), %s6291_s1, 1024, %s4645_s15, [#allocation8], %s6268_s14, %s6268_s14, %s6270_s17  }
  0x32   : > { %s4349_s23 = scalar_lea.hbm %s6260_s3, 256 }
  0x33   : > { %p4350_p1 = scmp.ne.s32.totalorder %s6260_s3, %s4349_s23  ;;  %p4356_p10 = scmp.lt.u32.totalorder %s4349_s23, %s6260_s3 }
  0x35   : > { %p4352_p2 = pnand %p4350_p1, %p4666_p13 }
  0x37   : > { %p4353_p6 = pneg %p4352_p2 }
  0x39   : > { %p4358_p3 = pnand %p4356_p10, %p4353_p6 }
  0x3b   : > { %4361 = shalt.err (!%p4358_p3)
}
  0x3c   : > { %s4362_s15 = scalar_lea.vmem %s4656_s18, 256  ;;  %p4370_p12 = scmp.lt.s32.totalorder %s4656_s18, %s4656_s18 }
  0x3d   : > { %p4363_p5 = scmp.ne.s32.totalorder %s4656_s18, %s4362_s15  ;;  %p4371_p0 = scmp.lt.s32.totalorder %s4362_s15, %s4362_s15 }
  0x3f   : > { %p4365_p7 = pnand %p4363_p5, %p4666_p13  ;;  %p4372_p1 = por %p4371_p0, %p4370_p12 }
  0x41   : > { %p4366_p9 = pneg %p4365_p7 }
  0x43   : > { %p4373_p2 = pnand %p4372_p1, %p4366_p9 }
  0x45   : > { %4376 = shalt.err (!%p4373_p2)
}
  0x46   : > { %s4547_s19 = smov 128   ;;  %s4548_s12 = smov 8  }
  0x47   : > { %4218 = dma.hbm_to_vmem [thread:$0]  (!%p4652_p11), %s6260_s3, 256, %s4656_s18, [#allocation8], %s4547_s19, %s4547_s19, %s4548_s12  }
  0x48   : > { %s4549_s22 = smov [#allocation10]   ;;  %s4714_s25 = sadd.s32 1, %s4541_s30  }
  0x49   : > { %s283_s23 = sshll.u32 %s4549_s22, 4  ;;  %s4377_s15 = scalar_lea.hbm %s6262_s5, 1024  ;;  %s284_s23 = int_to_ptr.vmem [resolvable:$true] %s283_s23 }
  0x4a   : > { %p4378_p6 = scmp.ne.s32.totalorder %s6262_s5, %s4377_s15  ;;  %p4384_p5 = scmp.lt.u32.totalorder %s4377_s15, %s6262_s5 }
  0x4c   : > { %p4380_p10 = pnand %p4378_p6, %p4666_p13 }
  0x4e   : > { %p4381_p3 = pneg %p4380_p10 }
  0x50   : > { %p4386_p7 = pnand %p4384_p5, %p4381_p3 }
  0x52   : > { %4389 = shalt.err (!%p4386_p7)
}
  0x53   : > { %s4390_s18 = scalar_lea.vmem %s284_s23, 1024  ;;  %p4398_p1 = scmp.lt.s32.totalorder %s284_s23, %s284_s23 }
  0x54   : > { %p4391_p9 = scmp.ne.s32.totalorder %s284_s23, %s4390_s18  ;;  %p4399_p2 = scmp.lt.s32.totalorder %s4390_s18, %s4390_s18 }
  0x56   : > { %p4393_p12 = pnand %p4391_p9, %p4666_p13  ;;  %p4400_p4 = por %p4399_p2, %p4398_p1 }
  0x58   : > { %p4394_p0 = pneg %p4393_p12 }
  0x5a   : > { %p4401_p8 = pnand %p4400_p4, %p4394_p0 }
  0x5c   : > { %4404 = shalt.err (!%p4401_p8)
}
  0x5d   : > { %s6293_s14 = smov 4   ;;  %s6294_s17 = smov 64  }
  0x5e   : > { %4221 = dma.hbm_to_vmem [thread:$0]  (!%p4652_p11), %s6262_s5, 1024, %s284_s23, [#allocation11], %s6294_s17, %s6294_s17, %s6293_s14  }
  0x5f   : > { %s34_s24 = ssub.s32 %s4541_s30, %s4714_s25  ;;  %s37_s16 = sadd.s32 1, %s4537_s29 }
  0x60   : > { %p35_p4 = scmp.eq.s32.totalorder %s34_s24, 0  ;;  %p44_p8 = scmp.ne.s32.totalorder %s4537_s29, %s4533_s28 }
  0x61   : > { %p45_p13 = scmp.eq.s32.totalorder %s4541_s30, 0  ;;  %p4236_p6 = scmp.lt.s32.totalorder %s4541_s30, 2 }
  0x62   : > { %s4745_s19 = scalar_select %p35_p4, %s4537_s29, %s37_s16  }
  0x63   : > { %p46_p10 = por %p45_p13, %p44_p8  ;;  %p6295_p3 = scmp.eq.s32.totalorder %s4622_s9, 1 }
  0x64   : > { %s300_s20 = sand.u32 1, %s4537_s29   ;;  %s3921_s21 = sshll.u32 %s4541_s30, 11 }
  0x65   : > { %p4749_p5 = por %p6295_p3, %p44_p8  ;;  %s3838_s22 = sshll.u32 %s300_s20, 7 }
  0x66   : > { %s4758_s23 = scalar_lea.hbm %s6257_s0, %s3921_s21  ;;  %s304_s15 = scalar_lea.vmem [#allocation4], %s3838_s22 }
  0x67   : > { %s311_s18 = sshll.u32 %s304_s15, 4  ;;  %p4760_p11 = pnand %p4236_p6, %p46_p10  ;;  %s4764_s18 = int_to_ptr.vmem [resolvable:$true] %s311_s18 }
  0x68   : > { %s4766_s27 = scalar_lea.sflag [#allocation5], %s300_s20  ;;  %s4405_s24 = scalar_lea.hbm %s4758_s23, 2048 }
  0x69   : > { %p4406_p7 = scmp.ne.s32.totalorder %s4758_s23, %s4405_s24  ;;  %p4407_p9 = pneg %p4760_p11 }
  0x6a   : > { %s4410_s22 = scalar_lea.hbm %s6257_s0, 4096  ;;  %p4411_p1 = scmp.lt.u32.totalorder %s4758_s23, %s6257_s0 }
  0x6b   : > { %p4408_p12 = pnand %p4407_p9, %p4406_p7  ;;  %p4412_p2 = scmp.lt.u32.totalorder %s4410_s22, %s4405_s24 }
  0x6c   : > { %p4414_p8 = scmp.lt.u32.totalorder %s4405_s24, %s4758_s23 }
  0x6d   : > { %p4409_p0 = pneg %p4408_p12  ;;  %p4413_p4 = por %p4412_p2, %p4411_p1 }
  0x6f   : > { %p4415_p13 = por %p4414_p8, %p4413_p4 }
  0x71   : > { %p4416_p6 = pnand %p4415_p13, %p4409_p0 }
  0x73   : > { %4419 = shalt.err (!%p4416_p6)
}
  0x74   : > { %s4420_s20 = scalar_lea.vmem %s4764_s18, 2048  ;;  %s4550_s15 = smov [#allocation4]  }
  0x75   : > { %p4421_p10 = scmp.ne.s32.totalorder %s4764_s18, %s4420_s20  ;;  %s4425_s16 = sshll.u32 %s4550_s15, 4  ;;  %s4426_s16 = int_to_ptr.vmem [resolvable:$false] %s4425_s16 }
  0x76   : > { %s4427_s21 = scalar_lea.vmem %s4426_s16, 4096  ;;  %p4428_p12 = scmp.lt.s32.totalorder %s4764_s18, %s4426_s16 }
  0x77   : > { %p4423_p3 = pnand %p4421_p10, %p4407_p9  ;;  %p4429_p1 = scmp.lt.s32.totalorder %s4427_s21, %s4420_s20 }
  0x79   : > { %p4424_p7 = pneg %p4423_p3  ;;  %p4430_p2 = por %p4429_p1, %p4428_p12 }
  0x7b   : > { %p4431_p4 = pnand %p4430_p2, %p4424_p7 }
  0x7d   : > { %4434 = shalt.err (!%p4431_p4)
}
  0x7e   : > { %4225 = dma.hbm_to_vmem [thread:$0]  (!%p4760_p11), %s4758_s23, 2048, %s4764_s18, %s4766_s27, %s6294_s17, %s6294_s17, %s6293_s14  }
  0x7f   : > { %p6298_p9 = scmp.ne.s32.totalorder %s6289_s13, 0 }
  0x81   : > { %323 = sbr.rel (%p6298_p9) target bundleno = 1032 (0x408), region = 48 }
  0x88   : > { %s4800_s24 = sand.u32 1, %s4533_s28   ;;  %p6299_p0 = scmp.ne.s32.totalorder %s6286_s11, 0 }
  0x89   : > { %s3842_s22 = sshll.u32 %s4800_s24, 7  ;;  %s326_s26 = scalar_lea.sflag [#allocation5], %s4800_s24 }
  0x8a   : > { %s4806_s1 = scalar_lea.vmem [#allocation4], %s3842_s22 }
  0x8b   : > { %4508 = dma.done.wait (%p6299_p0), %s326_s26, 2048  }
  0x8c   : > { %4510 = vsyncadd (%p6299_p0), %s326_s26, 4294965248  ;;  %p6300_p11 = scmp.eq.s32.totalorder %s4622_s9, 0 }
  0x8e   : > { %4512 = dma.done.wait (%p6300_p11), [#allocation8], 1280   ;;  %p6301_p8 = pmov %p6300_p11 }
  0x90   : > { %4514 = vsyncadd (%p6301_p8), [#allocation8], 4294966016  ;;  %p6302_p13 = pmov %p6301_p8 }
  0x91   : > { %p6303_p6 = pmov %p6301_p8 }
  0x92   : > { %4516 = dma.done.wait (%p6302_p13), [#allocation11], 1024  }
  0x93   : > { %4518 = vsyncadd (%p6303_p6), [#allocation11], 4294966272  ;;  %v4283_v0 = vld [vmem:[#allocation7] sm:$0xff]   ;;  %v4284_v1 = vld [vmem:[#allocation7 + $0x8] sm:$0xff]   ;;  %v4551_v24 = vmov 0.0   ;;  %v859_v33 = vlaneseq  ;;  %vm874_vm0 = vcmask 1046528  }
  0x94   : > { %4098 = vmatprep.subr.bf16.mxu0 %v4283_v0  ;;  %v4285_v2 = vld [vmem:[#allocation7 + $0x10] sm:$0xff]   ;;  %v4286_v3 = vld [vmem:[#allocation7 + $0x18] sm:$0xff]   ;;  %v4291_v4 = vld [vmem:[%s4806_s1] sm:$0xff]   ;;  %771 = vst [vmem:[#allocation2 + $0x7] sm:$0xff] %v4551_v24  ;;  %vm894_vm1 = vcmask 1045504   ;;  %s6128_s16 = scalar_lea.vmem [#allocation12], %s3842_s22 }
  0x95   : > { %4099 = vmatpush3.bf16.msra.mxu0 %v4283_v0  ;;  %4114 = vmatprep.mubr.bf16.mxu0 %v4291_v4  ;;  %v4287_v5 = vld [vmem:[#allocation7 + $0x20] sm:$0xff]   ;;  %v4288_v6 = vld [vmem:[#allocation7 + $0x28] sm:$0xff]   ;;  %v4289_v7 = vld [vmem:[#allocation7 + $0x30] sm:$0xff]   ;;  %772 = vst [vmem:[#allocation2 + $0xf] sm:$0xff] %v4551_v24  ;;  %v860_v34 = vshrl.u32 %v859_v33, 7  ;;  %s3954_s21 = sshll.u32 %s4622_s9, 11 }
  0x96   : > { %4100 = vmatprep.subr.bf16.mxu0 %v4284_v1  ;;  %v4290_v8 = vld [vmem:[#allocation7 + $0x38] sm:$0xff]   ;;  %v4292_v9 = vld [vmem:[%s4806_s1 + $0x8] sm:$0xff]   ;;  %v4293_v10 = vld [vmem:[%s4806_s1 + $0x10] sm:$0xff]   ;;  %773 = vst [vmem:[#allocation2 + $0x17] sm:$0x3] %v4551_v24  ;;  %s3689_s22 = sshll.u32 %s6128_s16, 4  ;;  %s6178_s11 = scalar_lea.hbm %s6264_s7, %s3954_s21  ;;  %s6180_s22 = int_to_ptr.vmem [resolvable:$true] %s3689_s22 }
  0x97   : > { %v4294_v11 = vld [vmem:[%s4806_s1 + $0x18] sm:$0xff]   ;;  %v4295_v12 = vld [vmem:[%s4806_s1 + $0x20] sm:$0xff]   ;;  %v4296_v13 = vld [vmem:[%s4806_s1 + $0x28] sm:$0xff]   ;;  %779 = vst [vmem:[#allocation2 + $0x27] sm:$0x1] %v4551_v24  ;;  %v868_v35 = vsub.s32 1, %v860_v34 }
  0x98   : > { %v4297_v14 = vld [vmem:[%s4806_s1 + $0x30] sm:$0xff]   ;;  %v4298_v15 = vld [vmem:[%s4806_s1 + $0x38] sm:$0xff]   ;;  %v4299_v16 = vld [vmem:[%s4806_s1 + $0x40] sm:$0xff]   ;;  %780 = vst [vmem:[#allocation2 + $0x47] sm:$0x1] %v4551_v24  ;;  %v886_v38 = vsub.s32 2, %v860_v34 }
  0x99   : > { %4101 = vmatpush3.bf16.msra.mxu0 %v4284_v1  ;;  %v4300_v17 = vld [vmem:[%s4806_s1 + $0x48] sm:$0xff]   ;;  %v4301_v18 = vld [vmem:[%s4806_s1 + $0x50] sm:$0xff]   ;;  %v4302_v19 = vld [vmem:[%s4806_s1 + $0x58] sm:$0xff]   ;;  %795 = vst [vmem:[#allocation2 + $0x38] sm:$0x1] %v4551_v24  ;;  %v861_v41 = vsub.s32 0, %v860_v34 }
  0x9a   : > { %4102 = vmatprep.subr.bf16.mxu0 %v4285_v2  ;;  %v4303_v20 = vld [vmem:[%s4806_s1 + $0x60] sm:$0xff]   ;;  %v4304_v21 = vld [vmem:[%s4806_s1 + $0x68] sm:$0xff]   ;;  %v4305_v22 = vld [vmem:[%s4806_s1 + $0x70] sm:$0xff]   ;;  %796 = vst [vmem:[#allocation2 + $0x58] sm:$0x1] %v4551_v24  ;;  %v908_v53 = vsub.s32 3, %v860_v34 }
  0x9b   : > { %v4306_v23 = vld [vmem:[%s4806_s1 + $0x78] sm:$0xff]   ;;  %775 = vst [vmem:[#allocation2 + $0x227] sm:$0xff] %v4551_v24  ;;  %776 = vst [vmem:[#allocation2 + $0x22f] sm:$0xff] %v4551_v24  ;;  %v4307_v25 = vld [vmem:[#allocation10] sm:$0xff]   ;;  %v935_v59 = vsub.s32 5, %v860_v34  ;;  %s3672_s13 = scalar_lea.sflag [#allocation6], %s4800_s24 }
  0x9c   : > { %777 = vst [vmem:[#allocation2 + $0x237] sm:$0x3] %v4551_v24  ;;  %781 = vst [vmem:[#allocation2 + $0x67] sm:$0x1] %v4551_v24  ;;  %4146 = vmatprep.subr.bf16.mxu1 %v4307_v25  ;;  %v4308_v26 = vld [vmem:[#allocation10 + $0x8] sm:$0xff]   ;;  %v4309_v27 = vld [vmem:[#allocation10 + $0x10] sm:$0xff]  }
  0x9d   : > { %4103 = vmatpush3.bf16.msra.mxu0 %v4285_v2  ;;  %782 = vst [vmem:[#allocation2 + $0x87] sm:$0x1] %v4551_v24  ;;  %783 = vst [vmem:[#allocation2 + $0xa7] sm:$0x1] %v4551_v24  ;;  %4147 = vmatpush3.bf16.msra.mxu1 %v4307_v25  ;;  %v4310_v28 = vld [vmem:[#allocation10 + $0x18] sm:$0xff]   ;;  %v4311_v29 = vld [vmem:[#allocation10 + $0x20] sm:$0xff]  }
  0x9e   : > { %4104 = vmatprep.subr.bf16.mxu0 %v4286_v3  ;;  %784 = vst [vmem:[#allocation2 + $0xc7] sm:$0x1] %v4551_v24  ;;  %785 = vst [vmem:[#allocation2 + $0xe7] sm:$0x1] %v4551_v24  ;;  %4148 = vmatprep.subr.bf16.mxu1 %v4308_v26  ;;  %v4312_v30 = vld [vmem:[#allocation10 + $0x28] sm:$0xff]   ;;  %v4313_v31 = vld [vmem:[#allocation10 + $0x30] sm:$0xff]  }
  0x9f   : > { %786 = vst [vmem:[#allocation2 + $0x107] sm:$0x1] %v4551_v24  ;;  %787 = vst [vmem:[#allocation2 + $0x127] sm:$0x1] %v4551_v24  ;;  %v4314_v32 = vld [vmem:[#allocation10 + $0x38] sm:$0xff]   ;;  %v843_v36 = vld [vmem:[#allocation9] sm:$0xff] }
  0xa0   : > { %788 = vst [vmem:[#allocation2 + $0x147] sm:$0x1] %v4551_v24  ;;  %789 = vst [vmem:[#allocation2 + $0x167] sm:$0x1] %v4551_v24  ;;  %v4836_v37 = vrot.slane %v843_v36, %v868_v35  ;;  %v847_v39 = vld [vmem:[#allocation2 + $0x8] sm:$0xff]  ;;  %v848_v40 = vld [vmem:[#allocation2 + $0x10] sm:$0xff]  ;;  %v4840_v44 = vrot.slane %v843_v36, %v886_v38  ;;  %v4842_v45 = vrot.slane %v843_v36, %v861_v41 }
  0xa1   : > { %4105 = vmatpush3.bf16.msra.mxu0 %v4286_v3  ;;  %790 = vst [vmem:[#allocation2 + $0x187] sm:$0x1] %v4551_v24  ;;  %791 = vst [vmem:[#allocation2 + $0x1a7] sm:$0x1] %v4551_v24  ;;  %4149 = vmatpush3.bf16.msra.mxu1 %v4308_v26  ;;  %v846_v46 = vld [vmem:[#allocation2] sm:$0xff]  ;;  %v849_v47 = vld [vmem:[#allocation2 + $0x18] sm:$0xff]  ;;  %v4851_v62 = vrot.slane %v843_v36, %v908_v53 }
  0xa2   : > { %4106 = vmatprep.subr.bf16.mxu0 %v4287_v5  ;;  %792 = vst [vmem:[#allocation2 + $0x1c7] sm:$0x1] %v4551_v24  ;;  %793 = vst [vmem:[#allocation2 + $0x1e7] sm:$0x1] %v4551_v24  ;;  %4150 = vmatprep.subr.bf16.mxu1 %v4309_v27  ;;  %v870_v42 = vmul.f32 %v4836_v37, %v847_v39  ;;  %v871_v43 = vmul.f32 %v4836_v37, %v848_v40  ;;  %v850_v63 = vld [vmem:[#allocation2 + $0x20] sm:$0xff]  ;;  %v853_v1 = vld [vmem:[#allocation2 + $0x38] sm:$0xff] }
  0xa3   : > { %794 = vst [vmem:[#allocation2 + $0x207] sm:$0x1] %v4551_v24  ;;  %797 = vst [vmem:[#allocation2 + $0x78] sm:$0x1] %v4551_v24  ;;  %v888_v50 = vmul.f32 %v4840_v44, %v847_v39  ;;  %v889_v51 = vmul.f32 %v4840_v44, %v848_v40  ;;  %v863_v52 = vmul.f32 %v4842_v45, %v846_v46  ;;  %v858_v2 = vld [vmem:[#allocation2 + $0x58] sm:$0xff]  ;;  %v855_v25 = vld [vmem:[#allocation2 + $0x40] sm:$0xff] }
  0xa4   : > { %798 = vst [vmem:[#allocation2 + $0x98] sm:$0x1] %v4551_v24  ;;  %799 = vst [vmem:[#allocation2 + $0xb8] sm:$0x1] %v4551_v24  ;;  %v875_v48 = vrot.slane %v870_v42, 1  ;;  %v876_v49 = vrot.slane %v871_v43, 1  ;;  %v890_v54 = vmul.f32 %v4840_v44, %v849_v47  ;;  %v864_v55 = vmul.f32 %v4842_v45, %v847_v39 }
  0xa5   : > { %4107 = vmatpush3.bf16.msra.mxu0 %v4287_v5  ;;  %800 = vst [vmem:[#allocation2 + $0xd8] sm:$0x1] %v4551_v24  ;;  %801 = vst [vmem:[#allocation2 + $0xf8] sm:$0x1] %v4551_v24  ;;  %4151 = vmatpush3.bf16.msra.mxu1 %v4309_v27  ;;  %v895_v57 = vrot.slane %v888_v50, 2  ;;  %v896_v58 = vrot.slane %v889_v51, 2  ;;  %v865_v60 = vmul.f32 %v4842_v45, %v848_v40 }
  0xa6   : > { %4108 = vmatprep.subr.bf16.mxu0 %v4288_v6  ;;  %802 = vst [vmem:[#allocation2 + $0x118] sm:$0x1] %v4551_v24  ;;  %803 = vst [vmem:[#allocation2 + $0x138] sm:$0x1] %v4551_v24  ;;  %4152 = vmatprep.subr.bf16.mxu1 %v4310_v28  ;;  %v877_v56 = vsel %vm874_vm0, %v875_v48, %v876_v49  ;;  %v881_v61 = vadd.f32 %v875_v48, %v863_v52  ;;  %v898_v0 = vrot.slane %v890_v54, 2  ;;  %v1045_v35 = vld [vmem:[#allocation2 + $0x60] sm:$0xff] }
  0xa7   : > { %804 = vst [vmem:[#allocation2 + $0x158] sm:$0x1] %v4551_v24  ;;  %805 = vst [vmem:[#allocation2 + $0x178] sm:$0x1] %v4551_v24  ;;  %v882_v3 = vadd.f32 %v877_v56, %v864_v55  ;;  %v897_v4 = vsel %vm894_vm1, %v895_v57, %v896_v58  ;;  %v918_v5 = vsub.s32 4, %v860_v34  ;;  %v4903_v38 = vmul.f32 %v4851_v62, %v855_v25  ;;  %v1191_v39 = vld [vmem:[#allocation2 + $0x80] sm:$0xff] }
  0xa8   : > { %806 = vst [vmem:[#allocation2 + $0x198] sm:$0x1] %v4551_v24  ;;  %807 = vst [vmem:[#allocation2 + $0x1b8] sm:$0x1] %v4551_v24  ;;  %v4916_v46 = vmul.f32 %v4842_v45, %v855_v25  ;;  %v4930_v53 = vmul.f32 %v1045_v35, %v4851_v62  ;;  %vm1016_vm2 = vsmask.f32 4352 }
  0xa9   : > { %4109 = vmatpush3.bf16.msra.mxu0 %v4288_v6  ;;  %808 = vst [vmem:[#allocation2 + $0x1d8] sm:$0x1] %v4551_v24  ;;  %809 = vst [vmem:[#allocation2 + $0x1f8] sm:$0x1] %v4551_v24  ;;  %4153 = vmatpush3.bf16.msra.mxu1 %v4310_v28  ;;  %v4854_v6 = vrot.slane %v843_v36, %v935_v59  ;;  %v1337_v59 = vld [vmem:[#allocation2 + $0xa0] sm:$0xff]  ;;  %s4435_s14 = scalar_lea.vmem %s6180_s22, 2048 }
  0xaa   : > { %4110 = vmatprep.subr.bf16.mxu0 %v4289_v7  ;;  %810 = vst [vmem:[#allocation2 + $0x218] sm:$0x1] %v4551_v24  ;;  %4154 = vmatprep.subr.bf16.mxu1 %v4311_v29  ;;  %p4436_p10 = scmp.ne.s32.totalorder %s6180_s22, %s4435_s14  ;;  %s4552_s17 = smov [#allocation12]  }
  0xab   : > { %v1194_v24 = vld [vmem:[#allocation2 + $0x98] sm:$0xff]  ;;  %s4439_s23 = sshll.u32 %s4552_s17, 4  ;;  %s4440_s23 = int_to_ptr.vmem [resolvable:$false] %s4439_s23 }
  0xac   : > { %v4919_v47 = vmul.f32 %v1194_v24, %v4854_v6  ;;  %v1486_v48 = vld [vmem:[#allocation2 + $0xd8] sm:$0xff]  ;;  %v4927_v52 = vmul.f32 %v1194_v24, %v4840_v44  ;;  %p4437_p3 = pnand %p4436_p10, %p4749_p5  ;;  %s4441_s18 = scalar_lea.vmem %s4440_s23, 4096 }
  0xad   : > { %4111 = vmatpush3.bf16.msra.mxu0 %v4289_v7  ;;  %4155 = vmatpush3.bf16.msra.mxu1 %v4311_v29  ;;  %v883_v7 = vadd.f32 %v876_v49, %v865_v60  ;;  %v4889_v29 = vmul.f32 %v4840_v44, %v858_v2  ;;  %v1629_v60 = vld [vmem:[#allocation2 + $0xe0] sm:$0xff]  ;;  %p4442_p12 = scmp.lt.s32.totalorder %s6180_s22, %s4440_s23  ;;  %p4443_p1 = scmp.lt.s32.totalorder %s4441_s18, %s4435_s14 }
  0xae   : > { %4112 = vmatprep.subr.bf16.mxu0 %v4290_v8  ;;  %4156 = vmatprep.subr.bf16.mxu1 %v4312_v30  ;;  %6304 = vst [vmem:[#allocation22_spill] sm:$0xff] %v4919_v47  ;;  %6306 = vst [vmem:[#allocation24_spill] sm:$0xff] %v4927_v52  ;;  %p4438_p7 = pneg %p4437_p3 }
  0xaf   : > { %p4444_p2 = por %p4443_p1, %p4442_p12 }
  0xb1   : > { %4113 = vmatpush3.bf16.msra.mxu0 %v4290_v8  ;;  %4157 = vmatpush3.bf16.msra.mxu1 %v4312_v30  ;;  %v903_v8 = vadd.f32 %v895_v57, %v881_v61  ;;  %v4942_v57 = vld [vmem:[%s6259_s2] ss:$0 sm:$0xff]  ;;  %p4445_p4 = pnand %p4444_p2, %p4438_p7 }
  0xb2   : > { %4158 = vmatprep.subr.bf16.mxu1 %v4313_v31 }
  0xb4   : > { %4115 = vmatmul.mubr.bf16.vlgmr.msra.gmra.mrb[0].mxu0 %v4292_v9  ;;  %v910_v9 = vmul.f32 %v4851_v62, %v850_v63 }
  0xb5   : > { %4118 = vmatprep.mubr.bf16.mxu0 %v4293_v10  ;;  %4159 = vmatpush3.bf16.msra.mxu1 %v4313_v31  ;;  %v956_v10 = vsub.s32 6, %v860_v34 }
  0xb6   : > { %4160 = vmatprep.subr.bf16.mxu1 %v4314_v32 }
  0xb9   : > { %4161 = vmatpush3.bf16.msra.mxu1 %v4314_v32  ;;  %v4896_v32 = vmul.f32 %v4842_v45, %v850_v63 }
  0xbc   : > { %4119 = vmatmul.mubr.bf16.gmra.mrb[4].mxu0 %v4294_v11  ;;  %v4857_v11 = vld [vmem:[#allocation9 + $0x8] ss:$0 sm:$0xff] }
  0xbd   : > { %4122 = vmatprep.mubr.bf16.mxu0 %v4295_v12  ;;  %v899_v12 = vsel %vm894_vm1, %v896_v58, %v898_v0  ;;  %v4906_v40 = vmul.f32 %v4857_v11, %v1194_v24  ;;  %v4947_v61 = vmul.f32 %v4857_v11, %v1486_v48  ;;  %v4953_v0 = vmul.f32 %v1045_v35, %v4842_v45 }
  0xbf   : > { %6308 = vst [vmem:[#allocation26_spill] sm:$0xff] %v4947_v61 }
  0xc4   : > { %4123 = vmatmul.mubr.bf16.gmra.mrb[8].mxu0 %v4296_v13  ;;  %v4861_v13 = vmul.f32 %v4854_v6, %v853_v1 }
  0xc5   : > { %4126 = vmatprep.mubr.bf16.mxu0 %v4297_v14  ;;  %v966_v14 = vsub.s32 7, %v860_v34  ;;  %v1340_v34 = vld [vmem:[#allocation2 + $0xb8] sm:$0xff] }
  0xc6   : > { %v4924_v51 = vmul.f32 %v4857_v11, %v1340_v34  ;;  %v4937_v56 = vmul.f32 %v1340_v34, %v4854_v6  ;;  %v4950_v63 = vmul.f32 %v1340_v34, %v4840_v44 }
  0xc7   : > { %v4883_v27 = vrot.slane %v843_v36, %v966_v14 }
  0xc8   : > { %6305 = vst [vmem:[#allocation23_spill] sm:$0xff] %v4924_v51  ;;  %6307 = vst [vmem:[#allocation25_spill] sm:$0xff] %v4937_v56 }
  0xc9   : > { %6309 = vst [vmem:[#allocation27_spill] sm:$0xff] %v4950_v63 }
  0xcc   : > { %4127 = vmatmul.mubr.bf16.gmra.mrb[12].mxu0 %v4298_v15  ;;  %v4864_v15 = vmul.f32 %v4857_v11, %v858_v2 }
  0xcd   : > { %4130 = vmatprep.mubr.bf16.mxu0 %v4299_v16  ;;  %v1048_v16 = vld [vmem:[#allocation2 + $0x78] sm:$0xff] }
  0xce   : > { %v4886_v28 = vmul.f32 %v4857_v11, %v1048_v16  ;;  %v4899_v33 = vmul.f32 %v1048_v16, %v4854_v6  ;;  %v4909_v41 = vmul.f32 %v1048_v16, %v4840_v44  ;;  %v4972_v16 = vmul.f32 %v1337_v59, %v4851_v62 }
  0xd0   : > { %6313 = vst [vmem:[#allocation31_spill] sm:$0xff] %v4972_v16 }
  0xd4   : > { %4131 = vmatmul.mubr.bf16.gmra.mrb[16].mxu0 %v4300_v17  ;;  %v4866_v17 = vadd.f32 %v897_v4, %v882_v3 }
  0xd5   : > { %4134 = vmatprep.mubr.bf16.mxu0 %v4301_v18  ;;  %v4868_v18 = vrot.slane %v843_v36, %v918_v5 }
  0xdc   : > { %4135 = vmatmul.mubr.bf16.gmra.mrb[20].mxu0 %v4302_v19  ;;  %v4871_v19 = vmul.f32 %v4840_v44, %v853_v1  ;;  %v4956_v1 = vmul.f32 %v1191_v39, %v4851_v62 }
  0xdd   : > { %4138 = vmatprep.mubr.bf16.mxu0 %v4303_v20  ;;  %v4873_v20 = vadd.f32 %v899_v12, %v883_v7  ;;  %v1483_v7 = vld [vmem:[#allocation2 + $0xc0] sm:$0xff] }
  0xde   : > { %v4988_v24 = vmul.f32 %v1483_v7, %v4851_v62  ;;  %v4991_v58 = vmul.f32 %v1483_v7, %v4842_v45 }
  0xe0   : > { %6316 = vst [vmem:[#allocation34_spill] sm:$0xff] %v4988_v24  ;;  %6317 = vst [vmem:[#allocation35_spill] sm:$0xff] %v4991_v58 }
  0xe4   : > { %4139 = vmatmul.mubr.bf16.gmra.mrb[24].mxu0 %v4304_v21  ;;  %v4875_v21 = vadd.f32 %v910_v9, %v903_v8  ;;  %v4964_v8 = vmul.f32 %v1191_v39, %v4842_v45  ;;  %v4981_v9 = vmul.f32 %v1337_v59, %v4842_v45 }
  0xe5   : > { %4142 = vmatprep.mubr.bf16.mxu0 %v4305_v22  ;;  %v4877_v22 = vrot.slane %v843_v36, %v956_v10  ;;  %v4968_v10 = vmul.f32 %v1486_v48, %v4854_v6 }
  0xe6   : > { %6311 = vst [vmem:[#allocation29_spill] sm:$0xff] %v4964_v8  ;;  %6315 = vst [vmem:[#allocation33_spill] sm:$0xff] %v4981_v9 }
  0xe7   : > { %v4892_v30 = vmul.f32 %v4877_v22, %v855_v25  ;;  %v4913_v43 = vmul.f32 %v1045_v35, %v4877_v22  ;;  %v4934_v55 = vmul.f32 %v1191_v39, %v4877_v22  ;;  %v4960_v3 = vmul.f32 %v1337_v59, %v4877_v22  ;;  %6312 = vst [vmem:[#allocation30_spill] sm:$0xff] %v4968_v10 }
  0xe8   : > { %v4976_v25 = vmul.f32 %v1483_v7, %v4877_v22  ;;  %v4998_v48 = vmul.f32 %v1629_v60, %v4877_v22 }
  0xe9   : > { %6310 = vst [vmem:[#allocation28_spill] sm:$0xff] %v4960_v3 }
  0xea   : > { %6314 = vst [vmem:[#allocation32_spill] sm:$0xff] %v4976_v25  ;;  %6318 = vst [vmem:[#allocation36_spill] sm:$0xff] %v4998_v48 }
  0xec   : > { %4143 = vmatmul.mubr.bf16.gmra.mrb[28].mxu0 %v4306_v23  ;;  %v4880_v23 = vmul.f32 %v4854_v6, %v858_v2 }
 0x187   : > { %v4116_v4 = vpop.f32.mrb[0].mxu0 }
 0x188   : > { %v621_v12 = vadd.f32 %v4116_v4, %v4942_v57  ;;  %v612_v14 = vpop.f32.mrb[1].mxu0 }
 0x189   : > { %v613_v34 = vadd.f32 %v4942_v57, %v612_v14  ;;  %v4117_v35 = vpop.f32.mrb[2].mxu0 }
 0x18a   : > { %v4984_v4 = vmax.f32 %v621_v12, 0.0  ;;  %v624_v5 = vadd.f32 %v4117_v35, %v4942_v57  ;;  %v615_v2 = vpop.f32.mrb[3].mxu0 }
 0x18b   : > { %v4993_v14 = vmax.f32 %v613_v34, 0.0  ;;  %v616_v39 = vadd.f32 %v4942_v57, %v615_v2 }
 0x18c   : > { %v5000_v12 = vmax.f32 %v624_v5, 0.0  ;;  %v959_v35 = vmul.f32 %v4877_v22, %v4984_v4  ;;  %v968_v54 = vmul.f32 %v4883_v27, %v4984_v4  ;;  %v5008_v7 = vmul.f32 %v4857_v11, %v4984_v4 }
 0x18d   : > { %v5010_v34 = vmax.f32 %v616_v39, 0.0  ;;  %v911_v2 = vmul.f32 %v4851_v62, %v4993_v14  ;;  %v920_v60 = vmul.f32 %v4868_v18, %v4993_v14  ;;  %v937_v5 = vmul.f32 %v4854_v6, %v4993_v14 }
 0x18e   : > { %v960_v59 = vmul.f32 %v4877_v22, %v5000_v12  ;;  %v969_v50 = vmul.f32 %v4883_v27, %v5000_v12  ;;  %v972_v49 = vrot.slane %v968_v54, 1  ;;  %v986_v39 = vmul.f32 %v4857_v11, %v5000_v12 }
 0x18f   : > { %v4120_v42 = vpop.f32.mrb[4].mxu0  ;;  %v912_v36 = vmul.f32 %v4851_v62, %v5010_v34  ;;  %v914_v31 = vadd.f32 %v911_v2, %v4866_v17  ;;  %v921_v26 = vmul.f32 %v4868_v18, %v5010_v34  ;;  %v924_v58 = vrot.slane %v920_v60, 1 }
 0x190   : > { %v637_v48 = vadd.f32 %v4120_v42, %v4942_v57  ;;  %v628_v10 = vpop.f32.mrb[5].mxu0  ;;  %v938_v24 = vmul.f32 %v4854_v6, %v5010_v34  ;;  %v943_v54 = vrot.slane %v937_v5, 2  ;;  %v973_v63 = vrot.slane %v969_v50, 1 }
 0x191   : > { %v629_v9 = vadd.f32 %v4942_v57, %v628_v10  ;;  %v4121_v61 = vpop.f32.mrb[6].mxu0  ;;  %v915_v25 = vadd.f32 %v912_v36, %v4873_v20  ;;  %v925_v56 = vrot.slane %v921_v26, 1  ;;  %v930_v17 = vadd.f32 %v924_v58, %v4875_v21 }
 0x192   : > { %v5035_v2 = vmax.f32 %v637_v48, 0.0  ;;  %v640_v60 = vadd.f32 %v4121_v61, %v4942_v57  ;;  %v631_v16 = vpop.f32.mrb[7].mxu0  ;;  %v944_v42 = vrot.slane %v938_v24, 2  ;;  %v974_v52 = vsel %vm874_vm0, %v972_v49, %v973_v63 }
 0x193   : > { %v5039_v8 = vmax.f32 %v629_v9, 0.0  ;;  %v632_v50 = vadd.f32 %v4942_v57, %v631_v16  ;;  %v926_v10 = vsel %vm874_vm0, %v924_v58, %v925_v56  ;;  %v932_v5 = vadd.f32 %v925_v56, %v915_v25 }
 0x194   : > { %817 = vst [vmem:[#allocation2 + $0x88] sm:$0xff] %v5035_v2  ;;  %v5044_v20 = vmax.f32 %v640_v60, 0.0  ;;  %v931_v21 = vadd.f32 %v926_v10, %v914_v31  ;;  %v945_v26 = vsel %vm894_vm1, %v943_v54, %v944_v42  ;;  %v6319_v36 = vrot.slane %v4861_v13, 2 }
 0x195   : > { %815 = vst [vmem:[#allocation2 + $0x68] sm:$0xff] %v5039_v8  ;;  %v5051_v9 = vmax.f32 %v632_v50, 0.0  ;;  %v951_v24 = vadd.f32 %v943_v54, %v930_v17  ;;  %v991_v58 = vrot.slane %v5008_v7, 2  ;;  %v992_v25 = vrot.slane %v986_v39, 2 }
 0x196   : > { %v947_v61 = vsel %vm894_vm1, %v944_v42, %v6319_v36  ;;  %818 = vst [vmem:[#allocation2 + $0x90] sm:$0xff] %v5044_v20  ;;  %v952_v56 = vadd.f32 %v945_v26, %v931_v21  ;;  %v1050_v31 = vmul.f32 %v4842_v45, %v4993_v14  ;;  %v1051_v13 = vmul.f32 %v4842_v45, %v5010_v34 }
 0x197   : > { %v953_v16 = vadd.f32 %v947_v61, %v932_v5  ;;  %v4124_v48 = vpop.f32.mrb[8].mxu0  ;;  %v961_v60 = vadd.f32 %v4892_v30, %v951_v24  ;;  %v1052_v54 = vmul.f32 %v4836_v37, %v4993_v14  ;;  %v1053_v7 = vmul.f32 %v4836_v37, %v5010_v34 }
 0x198   : > { %v653_v17 = vadd.f32 %v4124_v48, %v4942_v57  ;;  %v644_v50 = vpop.f32.mrb[9].mxu0  ;;  %v962_v39 = vadd.f32 %v959_v35, %v952_v56  ;;  %v993_v10 = vsel %vm894_vm1, %v991_v58, %v992_v25  ;;  %v6320_v5 = vrot.slane %v4864_v15, 2  ;;  %v5074_v35 = vld [vmem:[%s6261_s4] ss:$0 sm:$0xff] }
 0x199   : > { %v963_v42 = vadd.f32 %v960_v59, %v953_v16  ;;  %v645_v26 = vadd.f32 %v4942_v57, %v644_v50  ;;  %v4125_v30 = vpop.f32.mrb[10].mxu0  ;;  %v978_v59 = vadd.f32 %v972_v49, %v961_v60  ;;  %v1056_v61 = vrot.slane %v1052_v54, 1 }
 0x19a   : > { %v995_v21 = vsel %vm894_vm1, %v992_v25, %v6320_v5  ;;  %v749_v24 = vmax.f32 %v653_v17, 0.0  ;;  %v656_v16 = vadd.f32 %v4125_v30, %v4942_v57  ;;  %v647_v51 = vpop.f32.mrb[11].mxu0  ;;  %v979_v56 = vadd.f32 %v974_v52, %v962_v39 }
 0x19b   : > { %v980_v36 = vadd.f32 %v973_v63, %v963_v42  ;;  %v1057_v48 = vrot.slane %v1053_v7, 1  ;;  %v5076_v15 = vmax.f32 %v645_v26, 0.0  ;;  %v648_v25 = vadd.f32 %v4942_v57, %v647_v51 }
 0x19c   : > { %v999_v50 = vadd.f32 %v991_v58, %v978_v59  ;;  %821 = vst [vmem:[#allocation2 + $0xc8] sm:$0xff] %v749_v24  ;;  %v750_v49 = vmax.f32 %v656_v16, 0.0  ;;  %v1000_v63 = vadd.f32 %v993_v10, %v979_v56  ;;  %v1062_v42 = vadd.f32 %v1056_v61, %v4896_v32 }
 0x19d   : > { %v1001_v5 = vadd.f32 %v995_v21, %v980_v36  ;;  %v1058_v60 = vsel %vm874_vm0, %v1056_v61, %v1057_v48  ;;  %819 = vst [vmem:[#allocation2 + $0xa8] sm:$0xff] %v5076_v15  ;;  %v5082_v54 = vmax.f32 %v648_v25, 0.0  ;;  %v1064_v58 = vadd.f32 %v1057_v48, %v1051_v13 }
 0x19e   : > { %v1008_v52 = vadd.f32 %v5074_v35, %v999_v50  ;;  %v1063_v17 = vadd.f32 %v1058_v60, %v1050_v31  ;;  %822 = vst [vmem:[#allocation2 + $0xd0] sm:$0xff] %v750_v49  ;;  %v1009_v51 = vadd.f32 %v5074_v35, %v1000_v63  ;;  %v1065_v39 = vmul.f32 %v4840_v44, %v4993_v14 }
 0x19f   : > { %6321 = vst [vmem:[#allocation37_spill] sm:$0xff] %v5082_v54  ;;  %v1010_v7 = vadd.f32 %v5074_v35, %v1001_v5  ;;  %v1066_v10 = vmul.f32 %v4840_v44, %v5010_v34  ;;  %820 = vst [vmem:[#allocation2 + $0xb0] sm:$0xff] %v5082_v54  ;;  %v4128_v32 = vpop.f32.mrb[12].mxu0  ;;  %v1083_v30 = vmul.f32 %v4851_v62, %v4984_v4 }
 0x1a0   : > { %v1011_v21 = vmax.f32 %v1008_v52, 0.0  ;;  %v1084_v31 = vmul.f32 %v4851_v62, %v5000_v12  ;;  %v669_v13 = vadd.f32 %v4128_v32, %v4942_v57  ;;  %v660_v59 = vpop.f32.mrb[13].mxu0  ;;  %v1012_v36 = vmax.f32 %v1009_v51, 0.0 }
 0x1a1   : > { %v1013_v26 = vmax.f32 %v1010_v7, 0.0  ;;  %v1071_v14 = vrot.slane %v1065_v39, 2  ;;  %v1072_v61 = vrot.slane %v1066_v10, 2  ;;  %v661_v34 = vadd.f32 %v4942_v57, %v660_v59  ;;  %v4129_v24 = vpop.f32.mrb[14].mxu0 }
 0x1a2   : > { %v1088_v56 = vmul.f32 %v4868_v18, %v4984_v4  ;;  %v1089_v48 = vmul.f32 %v4868_v18, %v5000_v12  ;;  %v753_v25 = vmax.f32 %v669_v13, 0.0  ;;  %v672_v50 = vadd.f32 %v4129_v24, %v4942_v57  ;;  %v663_v5 = vpop.f32.mrb[15].mxu0 }
 0x1a3   : > { %v1015_v16 = vpack.c.bf16 %v1013_v26, %v1013_v26  ;;  %v1014_v49 = vpack.c.bf16 %v1012_v36, %v1011_v21  ;;  %v1073_v63 = vsel %vm894_vm1, %v1071_v14, %v1072_v61  ;;  %v751_v60 = vmax.f32 %v661_v34, 0.0 }
 0x1a4   : > { %v664_v52 = vadd.f32 %v4942_v57, %v663_v5  ;;  %825 = vst [vmem:[#allocation2 + $0x108] sm:$0xff] %v753_v25  ;;  %v754_v39 = vmax.f32 %v672_v50, 0.0  ;;  %v6322_v26 = vrot.slane %v4871_v19, 2  ;;  %v1079_v21 = vadd.f32 %v1071_v14, %v1062_v42 }
 0x1a5   : > { %v1026_v7 = vshrl.u32 %v1015_v16, 16  ;;  %v1029_v51 = vshll.u32 %v1015_v16, 16  ;;  %v1018_v10 = vshrl.u32 %v1014_v49, 16  ;;  %v1021_v32 = vshll.u32 %v1014_v49, 16  ;;  %823 = vst [vmem:[#allocation2 + $0xe8] sm:$0xff] %v751_v60 }
 0x1a6   : > { %v1075_v59 = vsel %vm894_vm1, %v1072_v61, %v6322_v26  ;;  %v752_v13 = vmax.f32 %v664_v52, 0.0  ;;  %826 = vst [vmem:[#allocation2 + $0x110] sm:$0xff] %v754_v39  ;;  %v1080_v47 = vadd.f32 %v1073_v63, %v1063_v17  ;;  %v1085_v50 = vadd.f32 %v4903_v38, %v1079_v21 }
 0x1a7   : > { %v1028_v24 = vrot.slane %v1026_v7, 3  ;;  %v1031_v3 = vrot.slane %v1029_v51, 4  ;;  %v1020_v36 = vrot.slane %v1018_v10, 3  ;;  %v1023_v34 = vrot.slane %v1021_v32, 4  ;;  %v4132_v16 = vpop.f32.mrb[16].mxu0 }
 0x1a8   : > { %v1081_v5 = vadd.f32 %v1075_v59, %v1064_v58  ;;  %824 = vst [vmem:[#allocation2 + $0xf0] sm:$0xff] %v752_v13  ;;  %v1092_v49 = vrot.slane %v1088_v56, 1  ;;  %v1093_v54 = vrot.slane %v1089_v48, 1  ;;  %v685_v19 = vadd.f32 %v4132_v16, %v4942_v57  ;;  %v676_v61 = vpop.f32.mrb[17].mxu0 }
 0x1a9   : > { %v1032_v25 = vor.u32 %v1031_v3, %v1028_v24  ;;  %v1024_v60 = vor.u32 %v1023_v34, %v1020_v36  ;;  %v1086_v52 = vadd.f32 %v1083_v30, %v1080_v47  ;;  %v677_v42 = vadd.f32 %v4942_v57, %v676_v61  ;;  %v4133_v14 = vpop.f32.mrb[18].mxu0 }
 0x1aa   : > { %v1087_v7 = vadd.f32 %v1084_v31, %v1081_v5  ;;  %v1094_v51 = vsel %vm874_vm0, %v1092_v49, %v1093_v54  ;;  %v1098_v17 = vadd.f32 %v1092_v49, %v1085_v50  ;;  %v1101_v58 = vmul.f32 %v4854_v6, %v4984_v4  ;;  %v679_v56 = vpop.f32.mrb[19].mxu0 }
 0x1ab   : > { %v757_v3 = vmax.f32 %v685_v19, 0.0  ;;  %v688_v38 = vadd.f32 %v4133_v14, %v4942_v57  ;;  %v1033_v48 = vsel %vm1016_vm2, %v1024_v60, %v1032_v25  ;;  %v1099_v63 = vadd.f32 %v1094_v51, %v1086_v52 }
 0x1ac   : > { %v755_v39 = vmax.f32 %v677_v42, 0.0  ;;  %v680_v47 = vadd.f32 %v4942_v57, %v679_v56  ;;  %4162 = vmatprep.mubr.bf16.mxu1 %v1033_v48  ;;  %v1100_v30 = vadd.f32 %v1093_v54, %v1087_v7  ;;  %v1102_v31 = vmul.f32 %v4854_v6, %v5000_v12 }
 0x1ad   : > { %829 = vst [vmem:[#allocation2 + $0x148] sm:$0xff] %v757_v3  ;;  %v758_v10 = vmax.f32 %v688_v38, 0.0  ;;  %v1107_v32 = vrot.slane %v1101_v58, 2  ;;  %v1119_v26 = vmul.f32 %v4877_v22, %v5039_v8  ;;  %v1120_v59 = vmul.f32 %v4877_v22, %v5051_v9 }
 0x1ae   : > { %827 = vst [vmem:[#allocation2 + $0x128] sm:$0xff] %v755_v39  ;;  %v756_v13 = vmax.f32 %v680_v47, 0.0  ;;  %v1108_v24 = vrot.slane %v1102_v31, 2  ;;  %v1124_v21 = vmul.f32 %v4883_v27, %v5039_v8  ;;  %v1125_v54 = vmul.f32 %v4883_v27, %v5051_v9 }
 0x1af   : > { %830 = vst [vmem:[#allocation2 + $0x150] sm:$0xff] %v758_v10  ;;  %v1115_v36 = vadd.f32 %v1107_v32, %v1098_v17  ;;  %v1137_v34 = vmul.f32 %v4857_v11, %v5039_v8  ;;  %v1138_v5 = vmul.f32 %v4857_v11, %v5051_v9  ;;  %v5133_v16 = vmul.f32 %v4842_v45, %v4984_v4  ;;  %v4136_v25 = vpop.f32.mrb[20].mxu0 }
 0x1b0   : > { %828 = vst [vmem:[#allocation2 + $0x130] sm:$0xff] %v756_v13  ;;  %v1109_v50 = vsel %vm894_vm1, %v1107_v32, %v1108_v24  ;;  %v6323_v49 = vrot.slane %v4880_v23, 2  ;;  %v1128_v61 = vrot.slane %v1124_v21, 1  ;;  %v1129_v60 = vrot.slane %v1125_v54, 1  ;;  %v692_v7 = vpop.f32.mrb[21].mxu0 }
 0x1b1   : > { %v701_v52 = vadd.f32 %v4136_v25, %v4942_v57  ;;  %v1116_v42 = vadd.f32 %v1109_v50, %v1099_v63  ;;  %v1121_v51 = vadd.f32 %v4913_v43, %v1115_v36  ;;  %v693_v17 = vadd.f32 %v4942_v57, %v692_v7  ;;  %v4137_v58 = vpop.f32.mrb[22].mxu0 }
 0x1b2   : > { %v1111_v19 = vsel %vm894_vm1, %v1108_v24, %v6323_v49  ;;  %v1130_v3 = vsel %vm874_vm0, %v1128_v61, %v1129_v60  ;;  %v1143_v38 = vrot.slane %v1137_v34, 2  ;;  %v1144_v56 = vrot.slane %v1138_v5, 2  ;;  %v695_v39 = vpop.f32.mrb[23].mxu0 }
 0x1b3   : > { %v1117_v14 = vadd.f32 %v1111_v19, %v1100_v30  ;;  %v761_v48 = vmax.f32 %v701_v52, 0.0  ;;  %v704_v23 = vadd.f32 %v4137_v58, %v4942_v57  ;;  %v1122_v47 = vadd.f32 %v1119_v26, %v1116_v42 }
 0x1b4   : > { %v759_v10 = vmax.f32 %v693_v17, 0.0  ;;  %v696_v32 = vadd.f32 %v4942_v57, %v695_v39  ;;  %v1134_v63 = vadd.f32 %v1128_v61, %v1121_v51  ;;  %v1145_v30 = vsel %vm894_vm1, %v1143_v38, %v1144_v56 }
 0x1b5   : > { %v1123_v31 = vadd.f32 %v1120_v59, %v1117_v14  ;;  %833 = vst [vmem:[#allocation2 + $0x188] sm:$0xff] %v761_v48  ;;  %v762_v43 = vmax.f32 %v704_v23, 0.0  ;;  %v1135_v13 = vadd.f32 %v1130_v3, %v1122_v47  ;;  %v6324_v21 = vrot.slane %v4886_v28, 2 }
 0x1b6   : > { %831 = vst [vmem:[#allocation2 + $0x168] sm:$0xff] %v759_v10  ;;  %v760_v36 = vmax.f32 %v696_v32, 0.0  ;;  %v1151_v34 = vadd.f32 %v1143_v38, %v1134_v63  ;;  %v1197_v26 = vmul.f32 %v4842_v45, %v5000_v12  ;;  %v1198_v59 = vmul.f32 %v4836_v37, %v4984_v4 }
 0x1b7   : > { %v1136_v24 = vadd.f32 %v1129_v60, %v1123_v31  ;;  %v1147_v54 = vsel %vm894_vm1, %v1144_v56, %v6324_v21  ;;  %834 = vst [vmem:[#allocation2 + $0x190] sm:$0xff] %v762_v43  ;;  %v1152_v5 = vadd.f32 %v1145_v30, %v1135_v13  ;;  %v1199_v50 = vmul.f32 %v4836_v37, %v5000_v12  ;;  %v4140_v49 = vpop.f32.mrb[24].mxu0 }
 0x1b8   : > { %v1211_v28 = vmul.f32 %v4840_v44, %v4984_v4  ;;  %832 = vst [vmem:[#allocation2 + $0x170] sm:$0xff] %v760_v36  ;;  %v1154_v19 = vadd.f32 %v5074_v35, %v1151_v34  ;;  %v1202_v61 = vrot.slane %v1198_v59, 1  ;;  %v1212_v60 = vmul.f32 %v4840_v44, %v5000_v12  ;;  %v708_v42 = vpop.f32.mrb[25].mxu0 }
 0x1b9   : > { %v1153_v25 = vadd.f32 %v1147_v54, %v1136_v24  ;;  %v1229_v52 = vmul.f32 %v4851_v62, %v5039_v8  ;;  %v717_v7 = vadd.f32 %v4140_v49, %v4942_v57  ;;  %v1155_v14 = vadd.f32 %v5074_v35, %v1152_v5  ;;  %v4141_v58 = vpop.f32.mrb[26].mxu0 }
 0x1ba   : > { %v1203_v17 = vrot.slane %v1199_v50, 1  ;;  %v709_v4 = vadd.f32 %v4942_v57, %v708_v42  ;;  %v1157_v3 = vmax.f32 %v1154_v19, 0.0  ;;  %v1208_v38 = vadd.f32 %v1202_v61, %v4916_v46  ;;  %v711_v47 = vpop.f32.mrb[27].mxu0 }
 0x1bb   : > { %v1156_v51 = vadd.f32 %v5074_v35, %v1153_v25  ;;  %v1217_v56 = vrot.slane %v1211_v28, 2  ;;  %v765_v48 = vmax.f32 %v717_v7, 0.0  ;;  %v720_v12 = vadd.f32 %v4141_v58, %v4942_v57 }
 0x1bc   : > { %v1158_v23 = vmax.f32 %v1155_v14, 0.0  ;;  %v763_v31 = vmax.f32 %v709_v4, 0.0  ;;  %v712_v10 = vadd.f32 %v4942_v57, %v711_v47  ;;  %v1204_v32 = vsel %vm874_vm0, %v1202_v61, %v1203_v17 }
 0x1bd   : > { %v1159_v39 = vmax.f32 %v1156_v51, 0.0  ;;  %v1210_v63 = vadd.f32 %v1203_v17, %v1197_v26  ;;  %837 = vst [vmem:[#allocation2 + $0x1c8] sm:$0xff] %v765_v48  ;;  %v766_v30 = vmax.f32 %v720_v12, 0.0  ;;  %v1209_v24 = vadd.f32 %v1204_v32, %v5133_v16 }
 0x1be   : > { %v1160_v43 = vpack.c.bf16 %v1158_v23, %v1157_v3  ;;  %835 = vst [vmem:[#allocation2 + $0x1a8] sm:$0xff] %v763_v31  ;;  %v764_v46 = vmax.f32 %v712_v10, 0.0  ;;  %v1218_v21 = vrot.slane %v1212_v60, 2  ;;  %v1225_v54 = vadd.f32 %v1217_v56, %v1208_v38 }
 0x1bf   : > { %v1161_v13 = vpack.c.bf16 %v1159_v39, %v1159_v39  ;;  %v1230_v36 = vmul.f32 %v4851_v62, %v5051_v9  ;;  %838 = vst [vmem:[#allocation2 + $0x1d0] sm:$0xff] %v766_v30  ;;  %v6325_v50 = vrot.slane %v4889_v29, 2  ;;  %v1234_v49 = vmul.f32 %v4868_v18, %v5039_v8  ;;  %v4144_v19 = vpop.f32.mrb[28].mxu0 }
 0x1c0   : > { %v1163_v34 = vshrl.u32 %v1160_v43, 16  ;;  %v1166_v59 = vshll.u32 %v1160_v43, 16  ;;  %836 = vst [vmem:[#allocation2 + $0x1b0] sm:$0xff] %v764_v46  ;;  %v1219_v26 = vsel %vm894_vm1, %v1217_v56, %v1218_v21  ;;  %v1231_v16 = vadd.f32 %v4930_v53, %v1225_v54  ;;  %v724_v14 = vpop.f32.mrb[29].mxu0 }
 0x1c1   : > { %v1171_v5 = vshrl.u32 %v1161_v13, 16  ;;  %v1174_v25 = vshll.u32 %v1161_v13, 16  ;;  %v1221_v28 = vsel %vm894_vm1, %v1218_v21, %v6325_v50  ;;  %v1226_v51 = vadd.f32 %v1219_v26, %v1209_v24  ;;  %v4145_v29 = vpop.f32.mrb[30].mxu0 }
 0x1c2   : > { %v1165_v61 = vrot.slane %v1163_v34, 3  ;;  %v1168_v60 = vrot.slane %v1166_v59, 4  ;;  %v1227_v17 = vadd.f32 %v1221_v28, %v1210_v63  ;;  %v1235_v4 = vmul.f32 %v4868_v18, %v5051_v9  ;;  %v5186_v48 = vpop.f32.mrb[31].mxu0 }
 0x1c3   : > { %v1173_v7 = vrot.slane %v1171_v5, 3  ;;  %v1176_v42 = vrot.slane %v1174_v25, 4  ;;  %v1238_v58 = vrot.slane %v1234_v49, 1  ;;  %v1247_v53 = vmul.f32 %v4854_v6, %v5039_v8 }
 0x1c4   : > { %v1169_v3 = vor.u32 %v1168_v60, %v1165_v61  ;;  %v1248_v56 = vmul.f32 %v4854_v6, %v5051_v9  ;;  %v1232_v12 = vadd.f32 %v1229_v52, %v1226_v51  ;;  %v1233_v23 = vadd.f32 %v1230_v36, %v1227_v17  ;;  %v1329_v17 = vld [vmem:[#allocation2 + $0x68] sm:$0xff] }
 0x1c5   : > { %v1177_v38 = vor.u32 %v1176_v42, %v1173_v7  ;;  %v1239_v39 = vrot.slane %v1235_v4, 1  ;;  %v1244_v47 = vadd.f32 %v1238_v58, %v1231_v16  ;;  %v1253_v10 = vrot.slane %v1247_v53, 2 }
 0x1c6   : > { %v1254_v32 = vrot.slane %v1248_v56, 2  ;;  %v1265_v63 = vmul.f32 %v4877_v22, %v5035_v2  ;;  %v1266_v43 = vmul.f32 %v4877_v22, %v5044_v20  ;;  %v1270_v52 = vmul.f32 %v4883_v27, %v5035_v2 }
 0x1c7   : > { %v1178_v31 = vsel %vm1016_vm2, %v1169_v3, %v1177_v38  ;;  %v1240_v30 = vsel %vm874_vm0, %v1238_v58, %v1239_v39  ;;  %v1246_v8 = vadd.f32 %v1239_v39, %v1233_v23  ;;  %v6326_v46 = vrot.slane %v4899_v33, 2 }
 0x1c8   : > { %4163 = vmatmul.mubr.bf16.vlgmr.msra.gmra.mrb[0].mxu1 %v1178_v31  ;;  %v1245_v13 = vadd.f32 %v1240_v30, %v1232_v12  ;;  %v1255_v24 = vsel %vm894_vm1, %v1253_v10, %v1254_v32  ;;  %v1261_v54 = vadd.f32 %v1253_v10, %v1244_v47  ;;  %v1271_v34 = vmul.f32 %v4883_v27, %v5044_v20  ;;  %v5221_v31 = vld [vmem:[#allocation2 + $0x90] sm:$0xff] }
 0x1c9   : > { %v1257_v21 = vsel %vm894_vm1, %v1254_v32, %v6326_v46  ;;  %v1274_v59 = vrot.slane %v1270_v52, 1  ;;  %v1283_v5 = vmul.f32 %v4857_v11, %v5035_v2  ;;  %v1284_v50 = vmul.f32 %v4857_v11, %v5044_v20 }
 0x1ca   : > { %v1263_v36 = vadd.f32 %v1257_v21, %v1246_v8  ;;  %v1262_v25 = vadd.f32 %v1255_v24, %v1245_v13  ;;  %v1267_v26 = vadd.f32 %v4934_v55, %v1261_v54  ;;  %v733_v28 = vadd.f32 %v4144_v19, %v4942_v57 }
 0x1cb   : > { %v1275_v16 = vrot.slane %v1271_v34, 1  ;;  %v1289_v49 = vrot.slane %v1283_v5, 2  ;;  %v725_v61 = vadd.f32 %v4942_v57, %v724_v14  ;;  %v1290_v42 = vrot.slane %v1284_v50, 2  ;;  %v5215_v14 = vld [vmem:[#allocation2 + $0x88] sm:$0xff] }
 0x1cc   : > { %v1269_v33 = vadd.f32 %v1266_v43, %v1263_v36  ;;  %v1268_v60 = vadd.f32 %v1265_v63, %v1262_v25  ;;  %v1280_v7 = vadd.f32 %v1274_v59, %v1267_v26  ;;  %v769_v51 = vmax.f32 %v733_v28, 0.0 }
 0x1cd   : > { %v1276_v2 = vsel %vm874_vm0, %v1274_v59, %v1275_v16  ;;  %v767_v58 = vmax.f32 %v725_v61, 0.0  ;;  %v736_v55 = vadd.f32 %v4145_v29, %v4942_v57  ;;  %v1291_v20 = vsel %vm894_vm1, %v1289_v49, %v1290_v42 }
 0x1ce   : > { %v1282_v4 = vadd.f32 %v1275_v16, %v1269_v33  ;;  %v1281_v3 = vadd.f32 %v1276_v2, %v1268_v60  ;;  %v6327_v19 = vrot.slane %v4906_v40, 2  ;;  %v1297_v53 = vadd.f32 %v1289_v49, %v1280_v7  ;;  %841 = vst [vmem:[#allocation2 + $0x208] sm:$0xff] %v769_v51 }
 0x1cf   : > { %839 = vst [vmem:[#allocation2 + $0x1e8] sm:$0xff] %v767_v58  ;;  %v770_v12 = vmax.f32 %v736_v55, 0.0  ;;  %v1342_v23 = vmul.f32 %v1329_v17, %v4842_v45  ;;  %v1343_v39 = vmul.f32 %v4842_v45, %v5051_v9  ;;  %v1344_v40 = vmul.f32 %v1329_v17, %v4836_v37 }
 0x1d0   : > { %v1293_v38 = vsel %vm894_vm1, %v1290_v42, %v6327_v19  ;;  %v1298_v29 = vadd.f32 %v1291_v20, %v1281_v3  ;;  %v1300_v47 = vadd.f32 %v5074_v35, %v1297_v53  ;;  %v1345_v10 = vmul.f32 %v4836_v37, %v5051_v9 }
 0x1d1   : > { %v1299_v56 = vadd.f32 %v1293_v38, %v1282_v4  ;;  %842 = vst [vmem:[#allocation2 + $0x210] sm:$0xff] %v770_v12  ;;  %v1357_v63 = vmul.f32 %v1329_v17, %v4840_v44  ;;  %v1358_v30 = vmul.f32 %v4840_v44, %v5051_v9  ;;  %v1375_v8 = vmul.f32 %v5215_v14, %v4851_v62 }
 0x1d2   : > { %v1301_v43 = vadd.f32 %v5074_v35, %v1298_v29  ;;  %v1303_v52 = vmax.f32 %v1300_v47, 0.0  ;;  %v1348_v13 = vrot.slane %v1344_v40, 1  ;;  %v1349_v24 = vrot.slane %v1345_v10, 1 }
 0x1d3   : > { %v1302_v32 = vadd.f32 %v5074_v35, %v1299_v56  ;;  %v1363_v21 = vrot.slane %v1357_v63, 2  ;;  %v1364_v54 = vrot.slane %v1358_v30, 2  ;;  %v1376_v36 = vmul.f32 %v5221_v31, %v4851_v62  ;;  %v6329_v30 = vld [vmem:[#allocation37_spill] sm:$0xff] }
 0x1d4   : > { %v1304_v34 = vmax.f32 %v1301_v43, 0.0  ;;  %v1350_v59 = vsel %vm874_vm0, %v1348_v13, %v1349_v24  ;;  %v1354_v5 = vadd.f32 %v1348_v13, %v4953_v0  ;;  %v1356_v9 = vadd.f32 %v1349_v24, %v1343_v39 }
 0x1d5   : > { %v1305_v46 = vmax.f32 %v1302_v32, 0.0  ;;  %v1355_v26 = vadd.f32 %v1350_v59, %v1342_v23  ;;  %v1365_v50 = vsel %vm894_vm1, %v1363_v21, %v1364_v54  ;;  %v6328_v28 = vrot.slane %v4909_v41, 2 }
 0x1d6   : > { %v1306_v16 = vpack.c.bf16 %v1304_v34, %v1303_v52  ;;  %v1371_v49 = vadd.f32 %v1363_v21, %v1354_v5  ;;  %v1380_v60 = vmul.f32 %v5215_v14, %v4868_v18  ;;  %v1381_v0 = vmul.f32 %v5221_v31, %v4868_v18 }
 0x1d7   : > { %v1307_v25 = vpack.c.bf16 %v1305_v46, %v1305_v46  ;;  %v1367_v33 = vsel %vm894_vm1, %v1364_v54, %v6328_v28  ;;  %v1372_v51 = vadd.f32 %v1365_v50, %v1355_v26  ;;  %v1393_v56 = vmul.f32 %v5215_v14, %v4854_v6  ;;  %v6330_v54 = vld [vmem:[#allocation22_spill] sm:$0xff]  ;;  %v6332_v26 = vld [vmem:[#allocation28_spill] sm:$0xff] }
 0x1d8   : > { %v1373_v61 = vadd.f32 %v1367_v33, %v1356_v9  ;;  %v1309_v17 = vshrl.u32 %v1306_v16, 16  ;;  %v1312_v2 = vshll.u32 %v1306_v16, 16  ;;  %v1377_v4 = vadd.f32 %v4956_v1, %v1371_v49 }
 0x1d9   : > { %v1317_v7 = vshrl.u32 %v1307_v25, 16  ;;  %v1320_v42 = vshll.u32 %v1307_v25, 16  ;;  %v1378_v3 = vadd.f32 %v1375_v8, %v1372_v51  ;;  %v1384_v20 = vrot.slane %v1380_v60, 1  ;;  %v5274_v51 = vld [vmem:[#allocation2 + $0xa8] sm:$0xff] }
 0x1da   : > { %v1379_v58 = vadd.f32 %v1376_v36, %v1373_v61  ;;  %v1311_v19 = vrot.slane %v1309_v17, 3  ;;  %v1314_v38 = vrot.slane %v1312_v2, 4  ;;  %v1385_v53 = vrot.slane %v1381_v0, 1  ;;  %v6333_v0 = vld [vmem:[#allocation23_spill] sm:$0xff] }
 0x1db   : > { %v1319_v41 = vrot.slane %v1317_v7, 3  ;;  %v1322_v55 = vrot.slane %v1320_v42, 4  ;;  %v1390_v23 = vadd.f32 %v1384_v20, %v1377_v4  ;;  %v1394_v39 = vmul.f32 %v5221_v31, %v4854_v6 }
 0x1dc   : > { %v1411_v29 = vmul.f32 %v4877_v22, %v5076_v15  ;;  %v1315_v1 = vor.u32 %v1314_v38, %v1311_v19  ;;  %v1386_v47 = vsel %vm874_vm0, %v1384_v20, %v1385_v53  ;;  %v1392_v40 = vadd.f32 %v1385_v53, %v1379_v58 }
 0x1dd   : > { %v1323_v12 = vor.u32 %v1322_v55, %v1319_v41  ;;  %v1399_v10 = vrot.slane %v1393_v56, 2  ;;  %v1391_v32 = vadd.f32 %v1386_v47, %v1378_v3  ;;  %v1400_v63 = vrot.slane %v1394_v39, 2  ;;  %v5282_v55 = vld [vmem:[#allocation2 + $0xb0] sm:$0xff] }
 0x1de   : > { %v1412_v8 = vmul.f32 %v4877_v22, %v6329_v30  ;;  %v1416_v43 = vmul.f32 %v4883_v27, %v5076_v15  ;;  %v1417_v24 = vmul.f32 %v4883_v27, %v6329_v30  ;;  %v1429_v46 = vmul.f32 %v4857_v11, %v5076_v15 }
 0x1df   : > { %v1324_v52 = vsel %vm1016_vm2, %v1315_v1, %v1323_v12  ;;  %v1407_v13 = vadd.f32 %v1399_v10, %v1390_v23  ;;  %v1401_v21 = vsel %vm894_vm1, %v1399_v10, %v1400_v63  ;;  %v6331_v36 = vrot.slane %v6330_v54, 2 }
 0x1e0   : > { %4166 = vmatprep.mubr.bf16.mxu1 %v1324_v52  ;;  %v1420_v59 = vrot.slane %v1416_v43, 1  ;;  %v1430_v5 = vmul.f32 %v4857_v11, %v6329_v30  ;;  %v1408_v9 = vadd.f32 %v1401_v21, %v1391_v32  ;;  %v1421_v28 = vrot.slane %v1417_v24, 1  ;;  %v6336_v52 = vld [vmem:[#allocation24_spill] sm:$0xff] }
 0x1e1   : > { %v1403_v34 = vsel %vm894_vm1, %v1400_v63, %v6331_v36  ;;  %v1413_v50 = vadd.f32 %v6332_v26, %v1407_v13  ;;  %v1435_v33 = vrot.slane %v1429_v46, 2  ;;  %v728_v15 = vadd.f32 %v4942_v57, %v5186_v48 }
 0x1e2   : > { %v1409_v25 = vadd.f32 %v1403_v34, %v1392_v40  ;;  %v1436_v16 = vrot.slane %v1430_v5, 2  ;;  %v1488_v49 = vmul.f32 %v5215_v14, %v4842_v45  ;;  %v1414_v61 = vadd.f32 %v1411_v29, %v1408_v9 }
 0x1e3   : > { %v1422_v7 = vsel %vm874_vm0, %v1420_v59, %v1421_v28  ;;  %v1426_v42 = vadd.f32 %v1420_v59, %v1413_v50  ;;  %v6334_v17 = vrot.slane %v6333_v0, 2  ;;  %v768_v4 = vmax.f32 %v728_v15, 0.0  ;;  %v5314_v0 = vld [vmem:[#allocation2 + $0xc8] sm:$0xff] }
 0x1e4   : > { %v1415_v60 = vadd.f32 %v1412_v8, %v1409_v25  ;;  %v1437_v11 = vsel %vm894_vm1, %v1435_v33, %v1436_v16  ;;  %v1489_v57 = vmul.f32 %v5221_v31, %v4842_v45  ;;  %v1427_v48 = vadd.f32 %v1422_v7, %v1414_v61 }
 0x1e5   : > { %v1439_v2 = vsel %vm894_vm1, %v1436_v16, %v6334_v17  ;;  %v1443_v41 = vadd.f32 %v1435_v33, %v1426_v42  ;;  %v1490_v3 = vmul.f32 %v5215_v14, %v4836_v37  ;;  %840 = vst [vmem:[#allocation2 + $0x1f0] sm:$0xff] %v768_v4  ;;  %v1491_v20 = vmul.f32 %v5221_v31, %v4836_v37  ;;  %v5316_v17 = vld [vmem:[#allocation2 + $0xd0] sm:$0xff] }
 0x1e6   : > { %v1428_v58 = vadd.f32 %v1421_v28, %v1415_v60  ;;  %v1503_v19 = vmul.f32 %v5215_v14, %v4840_v44  ;;  %v1504_v38 = vmul.f32 %v5221_v31, %v4840_v44  ;;  %v1521_v53 = vmul.f32 %v5274_v51, %v4851_v62  ;;  %v6335_v31 = vld [vmem:[#allocation29_spill] sm:$0xff]  ;;  %v6338_v28 = vld [vmem:[#allocation31_spill] sm:$0xff] }
 0x1e7   : > { %v1444_v56 = vadd.f32 %v1437_v11, %v1427_v48  ;;  %v1446_v23 = vadd.f32 %v5074_v35, %v1443_v41  ;;  %v1494_v39 = vrot.slane %v1490_v3, 1  ;;  %v1495_v29 = vrot.slane %v1491_v20, 1 }
 0x1e8   : > { %v1445_v12 = vadd.f32 %v1439_v2, %v1428_v58  ;;  %v1509_v1 = vrot.slane %v1503_v19, 2  ;;  %v1510_v47 = vrot.slane %v1504_v38, 2  ;;  %v1522_v40 = vmul.f32 %v5282_v55, %v4851_v62 }
 0x1e9   : > { %v1447_v10 = vadd.f32 %v5074_v35, %v1444_v56  ;;  %v1449_v32 = vmax.f32 %v1446_v23, 0.0  ;;  %v1500_v63 = vadd.f32 %v1494_v39, %v6335_v31  ;;  %v1496_v30 = vsel %vm874_vm0, %v1494_v39, %v1495_v29 }
 0x1ea   : > { %v1448_v14 = vadd.f32 %v5074_v35, %v1445_v12  ;;  %v1502_v8 = vadd.f32 %v1495_v29, %v1489_v57  ;;  %v1511_v43 = vsel %vm894_vm1, %v1509_v1, %v1510_v47  ;;  %v6337_v13 = vrot.slane %v6336_v52, 2 }
 0x1eb   : > { %v1450_v46 = vmax.f32 %v1447_v10, 0.0  ;;  %v1501_v54 = vadd.f32 %v1496_v30, %v1488_v49  ;;  %v1517_v36 = vadd.f32 %v1509_v1, %v1500_v63  ;;  %v1526_v59 = vmul.f32 %v5274_v51, %v4868_v18 }
 0x1ec   : > { %v1513_v24 = vsel %vm894_vm1, %v1510_v47, %v6337_v13  ;;  %v1451_v21 = vmax.f32 %v1448_v14, 0.0  ;;  %v1527_v5 = vmul.f32 %v5282_v55, %v4868_v18  ;;  %v1539_v9 = vmul.f32 %v5274_v51, %v4854_v6  ;;  %v6339_v47 = vld [vmem:[#allocation25_spill] sm:$0xff] }
 0x1ed   : > { %v1519_v34 = vadd.f32 %v1513_v24, %v1502_v8  ;;  %v1452_v25 = vpack.c.bf16 %v1450_v46, %v1449_v32  ;;  %v1518_v50 = vadd.f32 %v1511_v43, %v1501_v54  ;;  %v1523_v33 = vadd.f32 %v6338_v28, %v1517_v36  ;;  %v6341_v43 = vld [vmem:[#allocation32_spill] sm:$0xff] }
 0x1ee   : > { %v1453_v26 = vpack.c.bf16 %v1451_v21, %v1451_v21  ;;  %v1530_v15 = vrot.slane %v1526_v59, 1  ;;  %v1531_v61 = vrot.slane %v1527_v5, 1  ;;  %v1540_v49 = vmul.f32 %v5282_v55, %v4854_v6  ;;  %v5333_v24 = vld [vmem:[#allocation9 + $0x8] ss:$0 sm:$0xff] }
 0x1ef   : > { %v1525_v16 = vadd.f32 %v1522_v40, %v1519_v34  ;;  %v1455_v60 = vshrl.u32 %v1452_v25, 16  ;;  %v1458_v7 = vshll.u32 %v1452_v25, 16  ;;  %v1524_v2 = vadd.f32 %v1521_v53, %v1518_v50 }
 0x1f0   : > { %v1463_v42 = vshrl.u32 %v1453_v26, 16  ;;  %v1466_v11 = vshll.u32 %v1453_v26, 16  ;;  %v1532_v4 = vsel %vm874_vm0, %v1530_v15, %v1531_v61  ;;  %v1536_v57 = vadd.f32 %v1530_v15, %v1523_v33 }
 0x1f1   : > { %v1538_v48 = vadd.f32 %v1531_v61, %v1525_v16  ;;  %v1457_v58 = vrot.slane %v1455_v60, 3  ;;  %v1460_v41 = vrot.slane %v1458_v7, 4  ;;  %v1537_v19 = vadd.f32 %v1532_v4, %v1524_v2  ;;  %v6342_v61 = vld [vmem:[#allocation26_spill] sm:$0xff] }
 0x1f2   : > { %v1465_v3 = vrot.slane %v1463_v42, 3  ;;  %v1468_v20 = vrot.slane %v1466_v11, 4  ;;  %v1545_v38 = vrot.slane %v1539_v9, 2  ;;  %v1546_v56 = vrot.slane %v1540_v49, 2 }
 0x1f3   : > { %v1557_v12 = vmul.f32 %v5314_v0, %v4877_v22  ;;  %v1461_v23 = vor.u32 %v1460_v41, %v1457_v58  ;;  %v1558_v29 = vmul.f32 %v5316_v17, %v4877_v22  ;;  %v1562_v53 = vmul.f32 %v5314_v0, %v4883_v27 }
 0x1f4   : > { %v1469_v39 = vor.u32 %v1468_v20, %v1465_v3  ;;  %v1547_v1 = vsel %vm894_vm1, %v1545_v38, %v1546_v56  ;;  %v6340_v40 = vrot.slane %v6339_v47, 2  ;;  %v1553_v14 = vadd.f32 %v1545_v38, %v1536_v57 }
 0x1f5   : > { %v1563_v32 = vmul.f32 %v5316_v17, %v4883_v27  ;;  %v1554_v63 = vadd.f32 %v1547_v1, %v1537_v19  ;;  %v1566_v8 = vrot.slane %v1562_v53, 1  ;;  %v1575_v46 = vmul.f32 %v5333_v24, %v5314_v0 }
 0x1f6   : > { %v1549_v10 = vsel %vm894_vm1, %v1546_v56, %v6340_v40  ;;  %v1470_v31 = vsel %vm1016_vm2, %v1461_v23, %v1469_v39  ;;  %v1559_v52 = vadd.f32 %v6341_v43, %v1553_v14  ;;  %v1576_v21 = vmul.f32 %v5333_v24, %v5316_v17 }
 0x1f7   : > { %v1555_v30 = vadd.f32 %v1549_v10, %v1538_v48  ;;  %4167 = vmatmul.mubr.bf16.gmra.mrb[4].mxu1 %v1470_v31  ;;  %v1567_v13 = vrot.slane %v1563_v32, 1  ;;  %v1560_v54 = vadd.f32 %v1557_v12, %v1554_v63  ;;  %v1634_v34 = vmul.f32 %v5274_v51, %v4842_v45  ;;  %v6345_v10 = vld [vmem:[#allocation27_spill] sm:$0xff] }
 0x1f8   : > { %v1635_v59 = vmul.f32 %v5282_v55, %v4842_v45  ;;  %v1572_v9 = vadd.f32 %v1566_v8, %v1559_v52  ;;  %v1581_v25 = vrot.slane %v1575_v46, 2  ;;  %v1582_v26 = vrot.slane %v1576_v21, 2  ;;  %v6347_v52 = vld [vmem:[#allocation34_spill] sm:$0xff] }
 0x1f9   : > { %v1561_v36 = vadd.f32 %v1558_v29, %v1555_v30  ;;  %v1568_v5 = vsel %vm874_vm0, %v1566_v8, %v1567_v13  ;;  %v1636_v33 = vmul.f32 %v5274_v51, %v4836_v37  ;;  %v1637_v16 = vmul.f32 %v5282_v55, %v4836_v37 }
 0x1fa   : > { %v1573_v50 = vadd.f32 %v1568_v5, %v1560_v54  ;;  %v1583_v15 = vsel %vm894_vm1, %v1581_v25, %v1582_v26  ;;  %v6343_v49 = vrot.slane %v6342_v61, 2  ;;  %v1589_v7 = vadd.f32 %v1581_v25, %v1572_v9  ;;  %v5376_v9 = vld [vmem:[#allocation2 + $0xe8] sm:$0xff]  ;;  %v5378_v25 = vld [vmem:[#allocation2 + $0xf0] sm:$0xff] }
 0x1fb   : > { %v1574_v28 = vadd.f32 %v1567_v13, %v1561_v36  ;;  %v1649_v42 = vmul.f32 %v5274_v51, %v4840_v44  ;;  %v1640_v4 = vrot.slane %v1636_v33, 1  ;;  %v1641_v57 = vrot.slane %v1637_v16, 1  ;;  %v6344_v51 = vld [vmem:[#allocation33_spill] sm:$0xff] }
 0x1fc   : > { %v1585_v60 = vsel %vm894_vm1, %v1582_v26, %v6343_v49  ;;  %v1590_v11 = vadd.f32 %v1583_v15, %v1573_v50  ;;  %v1592_v48 = vadd.f32 %v5074_v35, %v1589_v7  ;;  %v1650_v58 = vmul.f32 %v5282_v55, %v4840_v44 }
 0x1fd   : > { %v1591_v2 = vadd.f32 %v1585_v60, %v1574_v28  ;;  %v1655_v41 = vrot.slane %v1649_v42, 2  ;;  %v1667_v3 = vmul.f32 %v5314_v0, %v4851_v62  ;;  %v1642_v38 = vsel %vm874_vm0, %v1640_v4, %v1641_v57  ;;  %v5381_v60 = vld [vmem:[#allocation2 + $0xf8] sm:$0xff] }
 0x1fe   : > { %v1593_v20 = vadd.f32 %v5074_v35, %v1590_v11  ;;  %v1646_v56 = vadd.f32 %v1640_v4, %v6344_v51  ;;  %v1595_v12 = vmax.f32 %v1592_v48, 0.0  ;;  %v1647_v23 = vadd.f32 %v1642_v38, %v1634_v34 }
 0x1ff   : > { %v1594_v19 = vadd.f32 %v5074_v35, %v1591_v2  ;;  %v1648_v39 = vadd.f32 %v1641_v57, %v1635_v59  ;;  %v1656_v29 = vrot.slane %v1650_v58, 2  ;;  %v1668_v55 = vmul.f32 %v5316_v17, %v4851_v62 }
 0x200   : > { %v1596_v53 = vmax.f32 %v1593_v20, 0.0  ;;  %v1663_v47 = vadd.f32 %v1655_v41, %v1646_v56  ;;  %v6346_v14 = vrot.slane %v6345_v10, 2  ;;  %v1672_v32 = vmul.f32 %v5314_v0, %v4868_v18 }
 0x201   : > { %v1597_v1 = vmax.f32 %v1594_v19, 0.0  ;;  %v1657_v40 = vsel %vm894_vm1, %v1655_v41, %v1656_v29  ;;  %v1673_v31 = vmul.f32 %v5316_v17, %v4868_v18  ;;  %v1685_v54 = vmul.f32 %v5314_v0, %v4854_v6 }
 0x202   : > { %v1659_v35 = vsel %vm894_vm1, %v1656_v29, %v6346_v14  ;;  %v1598_v63 = vpack.c.bf16 %v1596_v53, %v1595_v12  ;;  %v1664_v8 = vadd.f32 %v1657_v40, %v1647_v23  ;;  %v1669_v13 = vadd.f32 %v6347_v52, %v1663_v47 }
 0x203   : > { %v1599_v30 = vpack.c.bf16 %v1597_v1, %v1597_v1  ;;  %v1665_v43 = vadd.f32 %v1659_v35, %v1648_v39  ;;  %v1676_v46 = vrot.slane %v1672_v32, 1  ;;  %v1677_v21 = vrot.slane %v1673_v31, 1  ;;  %v6348_v39 = vld [vmem:[#allocation30_spill] sm:$0xff]  ;;  %v6350_v1 = vld [vmem:[#allocation36_spill] sm:$0xff] }
 0x204   : > { %v1601_v36 = vshrl.u32 %v1598_v63, 16  ;;  %v1604_v34 = vshll.u32 %v1598_v63, 16  ;;  %v1670_v26 = vadd.f32 %v1667_v3, %v1664_v8  ;;  %v1686_v11 = vmul.f32 %v5316_v17, %v4854_v6 }
 0x205   : > { %v1609_v59 = vshrl.u32 %v1599_v30, 16  ;;  %v1612_v5 = vshll.u32 %v1599_v30, 16  ;;  %v1671_v50 = vadd.f32 %v1668_v55, %v1665_v43  ;;  %v1678_v28 = vsel %vm874_vm0, %v1676_v46, %v1677_v21 }
 0x206   : > { %v1682_v33 = vadd.f32 %v1676_v46, %v1669_v13  ;;  %v1603_v16 = vrot.slane %v1601_v36, 3  ;;  %v1606_v15 = vrot.slane %v1604_v34, 4  ;;  %v1683_v7 = vadd.f32 %v1678_v28, %v1670_v26 }
 0x207   : > { %v1611_v61 = vrot.slane %v1609_v59, 3  ;;  %v1614_v49 = vrot.slane %v1612_v5, 4  ;;  %v1684_v42 = vadd.f32 %v1677_v21, %v1671_v50  ;;  %v1691_v2 = vrot.slane %v1685_v54, 2  ;;  %v5421_v50 = vld [vmem:[%s6261_s4] ss:$0 sm:$0xff] }
 0x208   : > { %v1607_v4 = vor.u32 %v1606_v15, %v1603_v16  ;;  %v1703_v48 = vmul.f32 %v5376_v9, %v4877_v22  ;;  %v1704_v58 = vmul.f32 %v5378_v25, %v4877_v22  ;;  %v1692_v41 = vrot.slane %v1686_v11, 2  ;;  %v4317_v15 = vld [vmem:[#allocation2 + $0xd8] sm:$0xff] }
 0x209   : > { %v1615_v57 = vor.u32 %v1614_v49, %v1611_v61  ;;  %v1699_v3 = vadd.f32 %v1691_v2, %v1682_v33  ;;  %v1708_v20 = vmul.f32 %v5376_v9, %v4883_v27  ;;  %v1709_v19 = vmul.f32 %v5378_v25, %v4883_v27 }
 0x20a   : > { %v1721_v51 = vmul.f32 %v5333_v24, %v5376_v9  ;;  %v1722_v56 = vmul.f32 %v5333_v24, %v5378_v25  ;;  %v1723_v12 = vmul.f32 %v5333_v24, %v5381_v60  ;;  %v1693_v23 = vsel %vm894_vm1, %v1691_v2, %v1692_v41 }
 0x20b   : > { %v1616_v38 = vsel %vm1016_vm2, %v1607_v4, %v1615_v57  ;;  %v6349_v29 = vrot.slane %v6348_v39, 2  ;;  %v1705_v47 = vadd.f32 %v6350_v1, %v1699_v3  ;;  %v1712_v55 = vrot.slane %v1708_v20, 1  ;;  %v4318_v39 = vld [vmem:[#allocation2 + $0xe0] sm:$0xff] }
 0x20c   : > { %4170 = vmatprep.mubr.bf16.mxu1 %v1616_v38  ;;  %v1700_v40 = vadd.f32 %v1693_v23, %v1683_v7  ;;  %v1713_v14 = vrot.slane %v1709_v19, 1  ;;  %v1727_v35 = vrot.slane %v1721_v51, 2  ;;  %v1728_v31 = vrot.slane %v1722_v56, 2 }
 0x20d   : > { %v1695_v53 = vsel %vm894_vm1, %v1692_v41, %v6349_v29  ;;  %v1718_v32 = vadd.f32 %v1712_v55, %v1705_v47  ;;  %v1730_v63 = vrot.slane %v1723_v12, 2  ;;  %v1780_v30 = vmul.f32 %v5314_v0, %v4842_v45 }
 0x20e   : > { %v1701_v10 = vadd.f32 %v1695_v53, %v1684_v42  ;;  %v1706_v8 = vadd.f32 %v1703_v48, %v1700_v40  ;;  %v1714_v52 = vsel %vm874_vm0, %v1712_v55, %v1713_v14  ;;  %v1781_v13 = vmul.f32 %v5316_v17, %v4842_v45 }
 0x20f   : > { %v1729_v46 = vsel %vm894_vm1, %v1727_v35, %v1728_v31  ;;  %v1731_v21 = vsel %vm894_vm1, %v1728_v31, %v1730_v63  ;;  %v1735_v54 = vadd.f32 %v1727_v35, %v1718_v32  ;;  %v1782_v36 = vmul.f32 %v5314_v0, %v4836_v37 }
 0x210   : > { %v1707_v43 = vadd.f32 %v1704_v58, %v1701_v10  ;;  %v1719_v34 = vadd.f32 %v1714_v52, %v1706_v8  ;;  %v1783_v5 = vmul.f32 %v5316_v17, %v4836_v37  ;;  %v1795_v26 = vmul.f32 %v5314_v0, %v4840_v44  ;;  %v6351_v0 = vld [vmem:[#allocation35_spill] sm:$0xff] }
 0x211   : > { %v1738_v28 = vadd.f32 %v5421_v50, %v1735_v54  ;;  %v1786_v33 = vrot.slane %v1782_v36, 1  ;;  %v1796_v16 = vmul.f32 %v5316_v17, %v4840_v44  ;;  %v1797_v61 = vmul.f32 %v4317_v15, %v4840_v44 }
 0x212   : > { %v1720_v59 = vadd.f32 %v1713_v14, %v1707_v43  ;;  %v1736_v49 = vadd.f32 %v1729_v46, %v1719_v34  ;;  %v1787_v42 = vrot.slane %v1783_v5, 1  ;;  %v1801_v11 = vrot.slane %v1795_v26, 2 }
 0x213   : > { %v1741_v2 = vmax.f32 %v1738_v28, 0.0  ;;  %v1792_v4 = vadd.f32 %v1786_v33, %v6351_v0  ;;  %v1802_v57 = vrot.slane %v1796_v16, 2  ;;  %v1804_v48 = vrot.slane %v1797_v61, 2  ;;  %v5448_v28 = vld [vmem:[#allocation2 + $0x108] sm:$0xff] }
 0x214   : > { %v1737_v7 = vadd.f32 %v1731_v21, %v1720_v59  ;;  %v1739_v58 = vadd.f32 %v5421_v50, %v1736_v49  ;;  %v1788_v3 = vsel %vm874_vm0, %v1786_v33, %v1787_v42  ;;  %v1794_v20 = vadd.f32 %v1787_v42, %v1781_v13  ;;  %v5450_v33 = vld [vmem:[#allocation2 + $0x110] sm:$0xff] }
 0x215   : > { %v1793_v17 = vadd.f32 %v1788_v3, %v1780_v30  ;;  %v1803_v19 = vsel %vm894_vm1, %v1801_v11, %v1802_v57  ;;  %v1805_v38 = vsel %vm894_vm1, %v1802_v57, %v1804_v48  ;;  %v1809_v51 = vadd.f32 %v1801_v11, %v1792_v4  ;;  %v5453_v11 = vld [vmem:[#allocation2 + $0x100] sm:$0xff]  ;;  %v5455_v4 = vld [vmem:[#allocation2 + $0x118] sm:$0xff] }
 0x216   : > { %v1740_v41 = vadd.f32 %v5421_v50, %v1737_v7  ;;  %v1742_v56 = vmax.f32 %v1739_v58, 0.0  ;;  %v1811_v23 = vadd.f32 %v1805_v38, %v1794_v20  ;;  %v1812_v29 = vmul.f32 %v4318_v39, %v4851_v62 }
 0x217   : > { %v1810_v53 = vadd.f32 %v1803_v19, %v1793_v17  ;;  %v1813_v1 = vmul.f32 %v5376_v9, %v4851_v62  ;;  %v1814_v47 = vmul.f32 %v5378_v25, %v4851_v62  ;;  %v1818_v55 = vmul.f32 %v5376_v9, %v4868_v18 }
 0x218   : > { %v1743_v12 = vmax.f32 %v1740_v41, 0.0  ;;  %v1744_v40 = vpack.c.bf16 %v1742_v56, %v1741_v2  ;;  %v1815_v14 = vadd.f32 %v1812_v29, %v1809_v51  ;;  %v1819_v35 = vmul.f32 %v5378_v25, %v4868_v18 }
 0x219   : > { %v1816_v32 = vadd.f32 %v1813_v1, %v1810_v53  ;;  %v1817_v31 = vadd.f32 %v1814_v47, %v1811_v23  ;;  %v1822_v63 = vrot.slane %v1818_v55, 1  ;;  %v1831_v30 = vmul.f32 %v5376_v9, %v4854_v6 }
 0x21a   : > { %v1745_v10 = vpack.c.bf16 %v1743_v12, %v1743_v12  ;;  %v1747_v8 = vshrl.u32 %v1744_v40, 16  ;;  %v1750_v43 = vshll.u32 %v1744_v40, 16  ;;  %v1823_v46 = vrot.slane %v1819_v35, 1 }
 0x21b   : > { %v1828_v21 = vadd.f32 %v1822_v63, %v1815_v14  ;;  %v1832_v54 = vmul.f32 %v5378_v25, %v4854_v6  ;;  %v1833_v36 = vmul.f32 %v5381_v60, %v4854_v6  ;;  %v1837_v61 = vrot.slane %v1831_v30, 2 }
 0x21c   : > { %v1755_v52 = vshrl.u32 %v1745_v10, 16  ;;  %v1758_v13 = vshll.u32 %v1745_v10, 16  ;;  %v1749_v34 = vrot.slane %v1747_v8, 3  ;;  %v1752_v59 = vrot.slane %v1750_v43, 4 }
 0x21d   : > { %v1824_v16 = vsel %vm874_vm0, %v1822_v63, %v1823_v46  ;;  %v1830_v15 = vadd.f32 %v1823_v46, %v1817_v31  ;;  %v1838_v49 = vrot.slane %v1832_v54, 2  ;;  %v1840_v0 = vrot.slane %v1833_v36, 2 }
 0x21e   : > { %v1757_v5 = vrot.slane %v1755_v52, 3  ;;  %v1760_v26 = vrot.slane %v1758_v13, 4  ;;  %v1753_v7 = vor.u32 %v1752_v59, %v1749_v34  ;;  %v1829_v2 = vadd.f32 %v1824_v16, %v1816_v32 }
 0x21f   : > { %v1839_v57 = vsel %vm894_vm1, %v1837_v61, %v1838_v49  ;;  %v1845_v48 = vadd.f32 %v1837_v61, %v1828_v21  ;;  %v1848_v58 = vmul.f32 %v5453_v11, %v4877_v22  ;;  %v1849_v41 = vmul.f32 %v5448_v28, %v4877_v22 }
 0x220   : > { %v1761_v42 = vor.u32 %v1760_v26, %v1757_v5  ;;  %v1841_v20 = vsel %vm894_vm1, %v1838_v49, %v1840_v0  ;;  %v1846_v17 = vadd.f32 %v1839_v57, %v1829_v2  ;;  %v1850_v19 = vmul.f32 %v5450_v33, %v4877_v22 }
 0x221   : > { %v1847_v38 = vadd.f32 %v1841_v20, %v1830_v15  ;;  %v1851_v51 = vadd.f32 %v1848_v58, %v1845_v48  ;;  %v1854_v56 = vmul.f32 %v5448_v28, %v4883_v27  ;;  %v1855_v12 = vmul.f32 %v5450_v33, %v4883_v27 }
 0x222   : > { %v1762_v3 = vsel %vm1016_vm2, %v1753_v7, %v1761_v42  ;;  %v1852_v23 = vadd.f32 %v1849_v41, %v1846_v17  ;;  %v1867_v29 = vmul.f32 %v5333_v24, %v5448_v28  ;;  %v1868_v53 = vmul.f32 %v5333_v24, %v5450_v33 }
 0x223   : > { %4171 = vmatmul.mubr.bf16.gmra.mrb[8].mxu1 %v1762_v3  ;;  %v1869_v1 = vmul.f32 %v5333_v24, %v5455_v4  ;;  %v1853_v47 = vadd.f32 %v1850_v19, %v1847_v38  ;;  %v1858_v55 = vrot.slane %v1854_v56, 1  ;;  %v1859_v40 = vrot.slane %v1855_v12, 1 }
 0x224   : > { %v1925_v10 = vmul.f32 %v4318_v39, %v4842_v45  ;;  %v1873_v14 = vrot.slane %v1867_v29, 2  ;;  %v1874_v35 = vrot.slane %v1868_v53, 2  ;;  %v1926_v31 = vmul.f32 %v5376_v9, %v4842_v45 }
 0x225   : > { %v1876_v32 = vrot.slane %v1869_v1, 2  ;;  %v1860_v63 = vsel %vm874_vm0, %v1858_v55, %v1859_v40  ;;  %v1864_v30 = vadd.f32 %v1858_v55, %v1851_v51  ;;  %v1866_v8 = vadd.f32 %v1859_v40, %v1853_v47 }
 0x226   : > { %v1927_v43 = vmul.f32 %v5378_v25, %v4842_v45  ;;  %v1865_v52 = vadd.f32 %v1860_v63, %v1852_v23  ;;  %v1875_v13 = vsel %vm894_vm1, %v1873_v14, %v1874_v35  ;;  %v1928_v39 = vmul.f32 %v5376_v9, %v4836_v37 }
 0x227   : > { %v1877_v46 = vsel %vm894_vm1, %v1874_v35, %v1876_v32  ;;  %v1881_v21 = vadd.f32 %v1873_v14, %v1864_v30  ;;  %v1929_v36 = vmul.f32 %v5378_v25, %v4836_v37  ;;  %v1941_v34 = vmul.f32 %v5376_v9, %v4840_v44 }
 0x228   : > { %v1883_v54 = vadd.f32 %v1877_v46, %v1866_v8  ;;  %v1882_v59 = vadd.f32 %v1875_v13, %v1865_v52  ;;  %v1932_v5 = vrot.slane %v1928_v39, 1  ;;  %v1942_v26 = vmul.f32 %v5378_v25, %v4840_v44  ;;  %v5510_v52 = vld [vmem:[#allocation2 + $0x128] sm:$0xff] }
 0x229   : > { %v1943_v16 = vmul.f32 %v5381_v60, %v4840_v44  ;;  %v1884_v15 = vadd.f32 %v5421_v50, %v1881_v21  ;;  %v1933_v49 = vrot.slane %v1929_v36, 1  ;;  %v1947_v7 = vrot.slane %v1941_v34, 2  ;;  %v5516_v21 = vld [vmem:[#allocation2 + $0x120] sm:$0xff] }
 0x22a   : > { %v1886_v61 = vadd.f32 %v5421_v50, %v1883_v54  ;;  %v1885_v42 = vadd.f32 %v5421_v50, %v1882_v59  ;;  %v1938_v2 = vadd.f32 %v1932_v5, %v1925_v10  ;;  %v1948_v0 = vrot.slane %v1942_v26, 2 }
 0x22b   : > { %v1950_v57 = vrot.slane %v1943_v16, 2  ;;  %v1887_v9 = vmax.f32 %v1884_v15, 0.0  ;;  %v1934_v58 = vsel %vm874_vm0, %v1932_v5, %v1933_v49  ;;  %v1940_v41 = vadd.f32 %v1933_v49, %v1927_v43  ;;  %v5520_v5 = vld [vmem:[#allocation2 + $0x130] sm:$0xff] }
 0x22c   : > { %v1889_v48 = vmax.f32 %v1886_v61, 0.0  ;;  %v1888_v25 = vmax.f32 %v1885_v42, 0.0  ;;  %v1939_v3 = vadd.f32 %v1934_v58, %v1926_v31  ;;  %v1949_v60 = vsel %vm894_vm1, %v1947_v7, %v1948_v0 }
 0x22d   : > { %v1951_v20 = vsel %vm894_vm1, %v1948_v0, %v1950_v57  ;;  %v1955_v19 = vadd.f32 %v1947_v7, %v1938_v2  ;;  %v1958_v51 = vmul.f32 %v5453_v11, %v4851_v62  ;;  %v1959_v23 = vmul.f32 %v5448_v28, %v4851_v62  ;;  %v5528_v0 = vld [vmem:[#allocation2 + $0x138] sm:$0xff] }
 0x22e   : > { %v1891_v17 = vpack.c.bf16 %v1889_v48, %v1889_v48  ;;  %v1957_v38 = vadd.f32 %v1951_v20, %v1940_v41  ;;  %v1890_v56 = vpack.c.bf16 %v1888_v25, %v1887_v9  ;;  %v1956_v12 = vadd.f32 %v1949_v60, %v1939_v3 }
 0x22f   : > { %v1960_v29 = vmul.f32 %v5450_v33, %v4851_v62  ;;  %v1961_v47 = vadd.f32 %v1958_v51, %v1955_v19  ;;  %v1964_v55 = vmul.f32 %v5448_v28, %v4868_v18  ;;  %v1965_v63 = vmul.f32 %v5450_v33, %v4868_v18 }
 0x230   : > { %v1901_v53 = vshrl.u32 %v1891_v17, 16  ;;  %v1904_v1 = vshll.u32 %v1891_v17, 16  ;;  %v1893_v40 = vshrl.u32 %v1890_v56, 16  ;;  %v1896_v10 = vshll.u32 %v1890_v56, 16 }
 0x231   : > { %v1962_v14 = vadd.f32 %v1959_v23, %v1956_v12  ;;  %v1963_v35 = vadd.f32 %v1960_v29, %v1957_v38  ;;  %v1968_v30 = vrot.slane %v1964_v55, 1  ;;  %v1977_v13 = vmul.f32 %v5448_v28, %v4854_v6 }
 0x232   : > { %v1903_v32 = vrot.slane %v1901_v53, 3  ;;  %v1906_v31 = vrot.slane %v1904_v1, 4  ;;  %v1895_v8 = vrot.slane %v1893_v40, 3  ;;  %v1898_v43 = vrot.slane %v1896_v10, 4 }
 0x233   : > { %v1978_v46 = vmul.f32 %v5450_v33, %v4854_v6  ;;  %v1969_v54 = vrot.slane %v1965_v63, 1  ;;  %v1974_v36 = vadd.f32 %v1968_v30, %v1961_v47  ;;  %v1979_v34 = vmul.f32 %v5455_v4, %v4854_v6 }
 0x234   : > { %v1907_v39 = vor.u32 %v1906_v31, %v1903_v32  ;;  %v1899_v59 = vor.u32 %v1898_v43, %v1895_v8  ;;  %v1983_v26 = vrot.slane %v1977_v13, 2  ;;  %v1994_v15 = vmul.f32 %v5516_v21, %v4877_v22 }
 0x235   : > { %v1984_v16 = vrot.slane %v1978_v46, 2  ;;  %v1970_v61 = vsel %vm874_vm0, %v1968_v30, %v1969_v54  ;;  %v1976_v49 = vadd.f32 %v1969_v54, %v1963_v35  ;;  %v1986_v7 = vrot.slane %v1979_v34, 2 }
 0x236   : > { %v1995_v42 = vmul.f32 %v5510_v52, %v4877_v22  ;;  %v1908_v2 = vsel %vm1016_vm2, %v1899_v59, %v1907_v39  ;;  %v1975_v57 = vadd.f32 %v1970_v61, %v1962_v14  ;;  %v1991_v48 = vadd.f32 %v1983_v26, %v1974_v36 }
 0x237   : > { %v1985_v9 = vsel %vm894_vm1, %v1983_v26, %v1984_v16  ;;  %4174 = vmatprep.mubr.bf16.mxu1 %v1908_v2  ;;  %v1987_v58 = vsel %vm894_vm1, %v1984_v16, %v1986_v7  ;;  %v1996_v41 = vmul.f32 %v5520_v5, %v4877_v22  ;;  %v2000_v25 = vmul.f32 %v5510_v52, %v4883_v27 }
 0x238   : > { %v2001_v3 = vmul.f32 %v5520_v5, %v4883_v27  ;;  %v1992_v60 = vadd.f32 %v1985_v9, %v1975_v57  ;;  %v1993_v20 = vadd.f32 %v1987_v58, %v1976_v49  ;;  %v1997_v17 = vadd.f32 %v1994_v15, %v1991_v48 }
 0x239   : > { %v2013_v19 = vmul.f32 %v5333_v24, %v5510_v52  ;;  %v2004_v38 = vrot.slane %v2000_v25, 1  ;;  %v2014_v56 = vmul.f32 %v5333_v24, %v5520_v5  ;;  %v2015_v12 = vmul.f32 %v5333_v24, %v5528_v0 }
 0x23a   : > { %v2005_v51 = vrot.slane %v2001_v3, 1  ;;  %v1998_v23 = vadd.f32 %v1995_v42, %v1992_v60  ;;  %v1999_v29 = vadd.f32 %v1996_v41, %v1993_v20  ;;  %v2071_v1 = vmul.f32 %v5453_v11, %v4842_v45 }
 0x23b   : > { %v2019_v53 = vrot.slane %v2013_v19, 2  ;;  %v2010_v55 = vadd.f32 %v2004_v38, %v1997_v17  ;;  %v2020_v40 = vrot.slane %v2014_v56, 2  ;;  %v2022_v10 = vrot.slane %v2015_v12, 2 }
 0x23c   : > { %v2006_v47 = vsel %vm874_vm0, %v2004_v38, %v2005_v51  ;;  %v2012_v35 = vadd.f32 %v2005_v51, %v1999_v29  ;;  %v2072_v32 = vmul.f32 %v5448_v28, %v4842_v45  ;;  %v2073_v31 = vmul.f32 %v5450_v33, %v4842_v45 }
 0x23d   : > { %v2011_v14 = vadd.f32 %v2006_v47, %v1998_v23  ;;  %v2021_v63 = vsel %vm894_vm1, %v2019_v53, %v2020_v40  ;;  %v2023_v30 = vsel %vm894_vm1, %v2020_v40, %v2022_v10  ;;  %v2027_v8 = vadd.f32 %v2019_v53, %v2010_v55 }
 0x23e   : > { %v2074_v11 = vmul.f32 %v5448_v28, %v4836_v37  ;;  %v2029_v13 = vadd.f32 %v2023_v30, %v2012_v35  ;;  %v2075_v46 = vmul.f32 %v5450_v33, %v4836_v37  ;;  %v2087_v39 = vmul.f32 %v5448_v28, %v4840_v44 }
 0x23f   : > { %v2028_v43 = vadd.f32 %v2021_v63, %v2011_v14  ;;  %v2030_v54 = vadd.f32 %v5421_v50, %v2027_v8  ;;  %v2088_v34 = vmul.f32 %v5450_v33, %v4840_v44  ;;  %v2089_v59 = vmul.f32 %v5455_v4, %v4840_v44 }
 0x240   : > { %v2078_v36 = vrot.slane %v2074_v11, 1  ;;  %v2032_v16 = vadd.f32 %v5421_v50, %v2029_v13  ;;  %v2079_v15 = vrot.slane %v2075_v46, 1  ;;  %v2093_v61 = vrot.slane %v2087_v39, 2  ;;  %v5585_v13 = vld [vmem:[#allocation2 + $0x148] sm:$0xff]  ;;  %v5587_v46 = vld [vmem:[#allocation2 + $0x150] sm:$0xff] }
 0x241   : > { %v2031_v26 = vadd.f32 %v5421_v50, %v2028_v43  ;;  %v2033_v49 = vmax.f32 %v2030_v54, 0.0  ;;  %v2094_v42 = vrot.slane %v2088_v34, 2  ;;  %v2096_v2 = vrot.slane %v2089_v59, 2 }
 0x242   : > { %v2084_v7 = vadd.f32 %v2078_v36, %v2071_v1  ;;  %v2035_v57 = vmax.f32 %v2032_v16, 0.0  ;;  %v2080_v9 = vsel %vm874_vm0, %v2078_v36, %v2079_v15  ;;  %v2086_v48 = vadd.f32 %v2079_v15, %v2073_v31 }
 0x243   : > { %v2034_v28 = vmax.f32 %v2031_v26, 0.0  ;;  %v2085_v58 = vadd.f32 %v2080_v9, %v2072_v32  ;;  %v2095_v33 = vsel %vm894_vm1, %v2093_v61, %v2094_v42  ;;  %v2097_v4 = vsel %vm894_vm1, %v2094_v42, %v2096_v2  ;;  %v5579_v32 = vld [vmem:[#allocation2 + $0x140] sm:$0xff] }
 0x244   : > { %v2101_v41 = vadd.f32 %v2093_v61, %v2084_v7  ;;  %v2037_v3 = vpack.c.bf16 %v2035_v57, %v2035_v57  ;;  %v2103_v60 = vadd.f32 %v2097_v4, %v2086_v48  ;;  %v2104_v20 = vmul.f32 %v5516_v21, %v4851_v62  ;;  %v5595_v7 = vld [vmem:[#allocation2 + $0x158] sm:$0xff] }
 0x245   : > { %v2036_v25 = vpack.c.bf16 %v2034_v28, %v2033_v49  ;;  %v2102_v17 = vadd.f32 %v2095_v33, %v2085_v58  ;;  %v2105_v19 = vmul.f32 %v5510_v52, %v4851_v62  ;;  %v2106_v38 = vmul.f32 %v5520_v5, %v4851_v62 }
 0x246   : > { %v2110_v51 = vmul.f32 %v5510_v52, %v4868_v18  ;;  %v2047_v23 = vshrl.u32 %v2037_v3, 16  ;;  %v2050_v29 = vshll.u32 %v2037_v3, 16  ;;  %v2107_v53 = vadd.f32 %v2104_v20, %v2101_v41 }
 0x247   : > { %v2039_v56 = vshrl.u32 %v2036_v25, 16  ;;  %v2042_v12 = vshll.u32 %v2036_v25, 16  ;;  %v2108_v1 = vadd.f32 %v2105_v19, %v2102_v17  ;;  %v2109_v47 = vadd.f32 %v2106_v38, %v2103_v60 }
 0x248   : > { %v2111_v55 = vmul.f32 %v5520_v5, %v4868_v18  ;;  %v2049_v14 = vrot.slane %v2047_v23, 3  ;;  %v2052_v35 = vrot.slane %v2050_v29, 4  ;;  %v2114_v31 = vrot.slane %v2110_v51, 1 }
 0x249   : > { %v2041_v40 = vrot.slane %v2039_v56, 3  ;;  %v2044_v10 = vrot.slane %v2042_v12, 4  ;;  %v2123_v30 = vmul.f32 %v5510_v52, %v4854_v6  ;;  %v2124_v8 = vmul.f32 %v5520_v5, %v4854_v6 }
 0x24a   : > { %v2115_v63 = vrot.slane %v2111_v55, 1  ;;  %v2053_v43 = vor.u32 %v2052_v35, %v2049_v14  ;;  %v2125_v39 = vmul.f32 %v5528_v0, %v4854_v6  ;;  %v2140_v54 = vmul.f32 %v5579_v32, %v4877_v22 }
 0x24b   : > { %v2045_v11 = vor.u32 %v2044_v10, %v2041_v40  ;;  %v2120_v34 = vadd.f32 %v2114_v31, %v2107_v53  ;;  %v2129_v26 = vrot.slane %v2123_v30, 2  ;;  %v2130_v61 = vrot.slane %v2124_v8, 2 }
 0x24c   : > { %v2116_v36 = vsel %vm874_vm0, %v2114_v31, %v2115_v63  ;;  %v2122_v59 = vadd.f32 %v2115_v63, %v2109_v47  ;;  %v2132_v49 = vrot.slane %v2125_v39, 2  ;;  %v2141_v2 = vmul.f32 %v5585_v13, %v4877_v22 }
 0x24d   : > { %v2054_v16 = vsel %vm1016_vm2, %v2045_v11, %v2053_v43  ;;  %v2121_v15 = vadd.f32 %v2116_v36, %v2108_v1  ;;  %v2137_v42 = vadd.f32 %v2129_v26, %v2120_v34  ;;  %v2142_v28 = vmul.f32 %v5587_v46, %v4877_v22 }
 0x24e   : > { %4175 = vmatmul.mubr.bf16.gmra.mrb[12].mxu1 %v2054_v16  ;;  %v2146_v57 = vmul.f32 %v5585_v13, %v4883_v27  ;;  %v2131_v9 = vsel %vm894_vm1, %v2129_v26, %v2130_v61  ;;  %v2133_v48 = vsel %vm894_vm1, %v2130_v61, %v2132_v49  ;;  %v2147_v58 = vmul.f32 %v5587_v46, %v4883_v27 }
 0x24f   : > { %v2159_v33 = vmul.f32 %v5333_v24, %v5585_v13  ;;  %v2138_v4 = vadd.f32 %v2131_v9, %v2121_v15  ;;  %v2139_v41 = vadd.f32 %v2133_v48, %v2122_v59  ;;  %v2143_v25 = vadd.f32 %v2140_v54, %v2137_v42 }
 0x250   : > { %v2150_v3 = vrot.slane %v2146_v57, 1  ;;  %v2151_v60 = vrot.slane %v2147_v58, 1  ;;  %v2160_v20 = vmul.f32 %v5333_v24, %v5587_v46  ;;  %v2161_v17 = vmul.f32 %v5333_v24, %v5595_v7 }
 0x251   : > { %v2165_v19 = vrot.slane %v2159_v33, 2  ;;  %v2144_v38 = vadd.f32 %v2141_v2, %v2138_v4  ;;  %v2145_v51 = vadd.f32 %v2142_v28, %v2139_v41  ;;  %v2217_v12 = vmul.f32 %v5516_v21, %v4842_v45 }
 0x252   : > { %v2156_v56 = vadd.f32 %v2150_v3, %v2143_v25  ;;  %v2152_v23 = vsel %vm874_vm0, %v2150_v3, %v2151_v60  ;;  %v2166_v29 = vrot.slane %v2160_v20, 2  ;;  %v2168_v53 = vrot.slane %v2161_v17, 2 }
 0x253   : > { %v2218_v1 = vmul.f32 %v5510_v52, %v4842_v45  ;;  %v2157_v47 = vadd.f32 %v2152_v23, %v2144_v38  ;;  %v2158_v55 = vadd.f32 %v2151_v60, %v2145_v51  ;;  %v2219_v10 = vmul.f32 %v5520_v5, %v4842_v45 }
 0x254   : > { %v2173_v40 = vadd.f32 %v2165_v19, %v2156_v56  ;;  %v2167_v14 = vsel %vm894_vm1, %v2165_v19, %v2166_v29  ;;  %v2169_v35 = vsel %vm894_vm1, %v2166_v29, %v2168_v53  ;;  %v2220_v21 = vmul.f32 %v5510_v52, %v4836_v37 }
 0x255   : > { %v2221_v31 = vmul.f32 %v5520_v5, %v4836_v37  ;;  %v2174_v63 = vadd.f32 %v2167_v14, %v2157_v47  ;;  %v2175_v30 = vadd.f32 %v2169_v35, %v2158_v55  ;;  %v2233_v11 = vmul.f32 %v5510_v52, %v4840_v44 }
 0x256   : > { %v2176_v8 = vadd.f32 %v5421_v50, %v2173_v40  ;;  %v2224_v43 = vrot.slane %v2220_v21, 1  ;;  %v2234_v54 = vmul.f32 %v5520_v5, %v4840_v44  ;;  %v2235_v36 = vmul.f32 %v5528_v0, %v4840_v44  ;;  %v5648_v40 = vld [vmem:[#allocation2 + $0x160] sm:$0xff] }
 0x257   : > { %v2225_v39 = vrot.slane %v2221_v31, 1  ;;  %v2177_v34 = vadd.f32 %v5421_v50, %v2174_v63  ;;  %v2178_v59 = vadd.f32 %v5421_v50, %v2175_v30  ;;  %v2239_v16 = vrot.slane %v2233_v11, 2 }
 0x258   : > { %v2179_v26 = vmax.f32 %v2176_v8, 0.0  ;;  %v2230_v61 = vadd.f32 %v2224_v43, %v2217_v12  ;;  %v2240_v42 = vrot.slane %v2234_v54, 2  ;;  %v2242_v57 = vrot.slane %v2235_v36, 2  ;;  %v5656_v8 = vld [vmem:[#allocation2 + $0x170] sm:$0xff] }
 0x259   : > { %v2226_v15 = vsel %vm874_vm0, %v2224_v43, %v2225_v39  ;;  %v2232_v49 = vadd.f32 %v2225_v39, %v2219_v10  ;;  %v2180_v52 = vmax.f32 %v2177_v34, 0.0  ;;  %v2181_v2 = vmax.f32 %v2178_v59, 0.0  ;;  %v5650_v10 = vld [vmem:[#allocation2 + $0x168] sm:$0xff] }
 0x25a   : > { %v2231_v28 = vadd.f32 %v2226_v15, %v2218_v1  ;;  %v2241_v5 = vsel %vm894_vm1, %v2239_v16, %v2240_v42  ;;  %v2247_v9 = vadd.f32 %v2239_v16, %v2230_v61  ;;  %v2250_v0 = vmul.f32 %v5579_v32, %v4851_v62  ;;  %v5666_v61 = vld [vmem:[#allocation2 + $0x178] sm:$0xff] }
 0x25b   : > { %v2251_v48 = vmul.f32 %v5585_v13, %v4851_v62  ;;  %v2182_v58 = vpack.c.bf16 %v2180_v52, %v2179_v26  ;;  %v2183_v33 = vpack.c.bf16 %v2181_v2, %v2181_v2  ;;  %v2243_v4 = vsel %vm894_vm1, %v2240_v42, %v2242_v57 }
 0x25c   : > { %v2248_v41 = vadd.f32 %v2241_v5, %v2231_v28  ;;  %v2249_v25 = vadd.f32 %v2243_v4, %v2232_v49  ;;  %v2252_v3 = vmul.f32 %v5587_v46, %v4851_v62  ;;  %v2253_v60 = vadd.f32 %v2250_v0, %v2247_v9 }
 0x25d   : > { %v2256_v20 = vmul.f32 %v5585_v13, %v4868_v18  ;;  %v2185_v17 = vshrl.u32 %v2182_v58, 16  ;;  %v2188_v19 = vshll.u32 %v2182_v58, 16  ;;  %v2193_v38 = vshrl.u32 %v2183_v33, 16 }
 0x25e   : > { %v2196_v51 = vshll.u32 %v2183_v33, 16  ;;  %v2254_v56 = vadd.f32 %v2251_v48, %v2248_v41  ;;  %v2255_v12 = vadd.f32 %v2252_v3, %v2249_v25  ;;  %v2257_v23 = vmul.f32 %v5587_v46, %v4868_v18 }
 0x25f   : > { %v2260_v29 = vrot.slane %v2256_v20, 1  ;;  %v2187_v53 = vrot.slane %v2185_v17, 3  ;;  %v2190_v1 = vrot.slane %v2188_v19, 4  ;;  %v2195_v47 = vrot.slane %v2193_v38, 3 }
 0x260   : > { %v2198_v55 = vrot.slane %v2196_v51, 4  ;;  %v2261_v14 = vrot.slane %v2257_v23, 1  ;;  %v2269_v21 = vmul.f32 %v5585_v13, %v4854_v6  ;;  %v2270_v31 = vmul.f32 %v5587_v46, %v4854_v6 }
 0x261   : > { %v2266_v35 = vadd.f32 %v2260_v29, %v2253_v60  ;;  %v2191_v63 = vor.u32 %v2190_v1, %v2187_v53  ;;  %v2271_v11 = vmul.f32 %v5595_v7, %v4854_v6  ;;  %v2286_v43 = vmul.f32 %v5648_v40, %v4877_v22 }
 0x262   : > { %v2199_v30 = vor.u32 %v2198_v55, %v2195_v47  ;;  %v2262_v39 = vsel %vm874_vm0, %v2260_v29, %v2261_v14  ;;  %v2268_v54 = vadd.f32 %v2261_v14, %v2255_v12  ;;  %v2275_v36 = vrot.slane %v2269_v21, 2 }
 0x263   : > { %v2276_v34 = vrot.slane %v2270_v31, 2  ;;  %v2267_v26 = vadd.f32 %v2262_v39, %v2254_v56  ;;  %v2278_v16 = vrot.slane %v2271_v11, 2  ;;  %v2287_v15 = vmul.f32 %v5650_v10, %v4877_v22 }
 0x264   : > { %v2200_v59 = vsel %vm1016_vm2, %v2191_v63, %v2199_v30  ;;  %v2283_v42 = vadd.f32 %v2275_v36, %v2266_v35  ;;  %v2288_v52 = vmul.f32 %v5656_v8, %v4877_v22  ;;  %v2292_v2 = vmul.f32 %v5650_v10, %v4883_v27 }
 0x265   : > { %4178 = vmatprep.mubr.bf16.mxu1 %v2200_v59  ;;  %v2277_v49 = vsel %vm894_vm1, %v2275_v36, %v2276_v34  ;;  %v2279_v28 = vsel %vm894_vm1, %v2276_v34, %v2278_v16  ;;  %v2293_v5 = vmul.f32 %v5656_v8, %v4883_v27  ;;  %v2305_v9 = vmul.f32 %v5333_v24, %v5650_v10 }
 0x266   : > { %v2284_v57 = vadd.f32 %v2277_v49, %v2267_v26  ;;  %v2285_v0 = vadd.f32 %v2279_v28, %v2268_v54  ;;  %v2289_v48 = vadd.f32 %v2286_v43, %v2283_v42  ;;  %v2296_v58 = vrot.slane %v2292_v2, 1 }
 0x267   : > { %v2306_v33 = vmul.f32 %v5333_v24, %v5656_v8  ;;  %v2297_v41 = vrot.slane %v2293_v5, 1  ;;  %v2307_v25 = vmul.f32 %v5333_v24, %v5666_v61  ;;  %v2311_v3 = vrot.slane %v2305_v9, 2 }
 0x268   : > { %v2290_v4 = vadd.f32 %v2287_v15, %v2284_v57  ;;  %v2291_v60 = vadd.f32 %v2288_v52, %v2285_v0  ;;  %v2302_v20 = vadd.f32 %v2296_v58, %v2289_v48  ;;  %v2363_v19 = vmul.f32 %v5579_v32, %v4842_v45 }
 0x269   : > { %v2312_v17 = vrot.slane %v2306_v33, 2  ;;  %v2298_v38 = vsel %vm874_vm0, %v2296_v58, %v2297_v41  ;;  %v2314_v51 = vrot.slane %v2307_v25, 2  ;;  %v2364_v56 = vmul.f32 %v5585_v13, %v4842_v45 }
 0x26a   : > { %v2365_v12 = vmul.f32 %v5587_v46, %v4842_v45  ;;  %v2303_v23 = vadd.f32 %v2298_v38, %v2290_v4  ;;  %v2304_v29 = vadd.f32 %v2297_v41, %v2291_v60  ;;  %v2319_v53 = vadd.f32 %v2311_v3, %v2302_v20 }
 0x26b   : > { %v2313_v24 = vsel %vm894_vm1, %v2311_v3, %v2312_v17  ;;  %v2315_v1 = vsel %vm894_vm1, %v2312_v17, %v2314_v51  ;;  %v2366_v47 = vmul.f32 %v5585_v13, %v4836_v37  ;;  %v2367_v32 = vmul.f32 %v5587_v46, %v4836_v37 }
 0x26c   : > { %v2379_v55 = vmul.f32 %v5585_v13, %v4840_v44  ;;  %v2320_v14 = vadd.f32 %v2313_v24, %v2303_v23  ;;  %v2321_v35 = vadd.f32 %v2315_v1, %v2304_v29  ;;  %v2322_v21 = vadd.f32 %v5421_v50, %v2319_v53  ;;  %v5717_v29 = vld [vmem:[#allocation2 + $0x188] sm:$0xff]  ;;  %v5719_v24 = vld [vmem:[#allocation2 + $0x190] sm:$0xff] }
 0x26d   : > { %v2380_v31 = vmul.f32 %v5587_v46, %v4840_v44  ;;  %v2370_v63 = vrot.slane %v2366_v47, 1  ;;  %v2371_v30 = vrot.slane %v2367_v32, 1  ;;  %v2381_v11 = vmul.f32 %v5595_v7, %v4840_v44 }
 0x26e   : > { %v2385_v43 = vrot.slane %v2379_v55, 2  ;;  %v2323_v39 = vadd.f32 %v5421_v50, %v2320_v14  ;;  %v2324_v54 = vadd.f32 %v5421_v50, %v2321_v35  ;;  %v2325_v36 = vmax.f32 %v2322_v21, 0.0  ;;  %v5724_v35 = vld [vmem:[#allocation2 + $0x180] sm:$0xff] }
 0x26f   : > { %v2386_v34 = vrot.slane %v2380_v31, 2  ;;  %v2372_v13 = vsel %vm874_vm0, %v2370_v63, %v2371_v30  ;;  %v2376_v59 = vadd.f32 %v2370_v63, %v2363_v19  ;;  %v2378_v26 = vadd.f32 %v2371_v30, %v2365_v12  ;;  %v5728_v63 = vld [vmem:[#allocation2 + $0x198] sm:$0xff] }
 0x270   : > { %v2388_v16 = vrot.slane %v2381_v11, 2  ;;  %v2326_v15 = vmax.f32 %v2323_v39, 0.0  ;;  %v2327_v49 = vmax.f32 %v2324_v54, 0.0  ;;  %v2377_v46 = vadd.f32 %v2372_v13, %v2364_v56 }
 0x271   : > { %v2387_v42 = vsel %vm894_vm1, %v2385_v43, %v2386_v34  ;;  %v2393_v7 = vadd.f32 %v2385_v43, %v2376_v59  ;;  %v2396_v2 = vmul.f32 %v5648_v40, %v4851_v62  ;;  %v2397_v28 = vmul.f32 %v5650_v10, %v4851_v62 }
 0x272   : > { %v2389_v52 = vsel %vm894_vm1, %v2386_v34, %v2388_v16  ;;  %v2328_v57 = vpack.c.bf16 %v2326_v15, %v2325_v36  ;;  %v2329_v5 = vpack.c.bf16 %v2327_v49, %v2327_v49  ;;  %v2394_v9 = vadd.f32 %v2387_v42, %v2377_v46  ;;  %v5743_v15 = vld [vmem:[#allocation9 + $0x8] ss:$0 sm:$0xff] }
 0x273   : > { %v2395_v0 = vadd.f32 %v2389_v52, %v2378_v26  ;;  %v2398_v48 = vmul.f32 %v5656_v8, %v4851_v62  ;;  %v2399_v58 = vadd.f32 %v2396_v2, %v2393_v7  ;;  %v2402_v33 = vmul.f32 %v5650_v10, %v4868_v18 }
 0x274   : > { %v2403_v4 = vmul.f32 %v5656_v8, %v4868_v18  ;;  %v2331_v41 = vshrl.u32 %v2328_v57, 16  ;;  %v2334_v25 = vshll.u32 %v2328_v57, 16  ;;  %v2339_v3 = vshrl.u32 %v2329_v5, 16 }
 0x275   : > { %v2342_v60 = vshll.u32 %v2329_v5, 16  ;;  %v2400_v20 = vadd.f32 %v2397_v28, %v2394_v9  ;;  %v2401_v17 = vadd.f32 %v2398_v48, %v2395_v0  ;;  %v2406_v19 = vrot.slane %v2402_v33, 1 }
 0x276   : > { %v2407_v38 = vrot.slane %v2403_v4, 1  ;;  %v2333_v51 = vrot.slane %v2331_v41, 3  ;;  %v2336_v56 = vrot.slane %v2334_v25, 4  ;;  %v2341_v12 = vrot.slane %v2339_v3, 3 }
 0x277   : > { %v2344_v23 = vrot.slane %v2342_v60, 4  ;;  %v2412_v1 = vadd.f32 %v2406_v19, %v2399_v58  ;;  %v2415_v32 = vmul.f32 %v5650_v10, %v4854_v6  ;;  %v2416_v31 = vmul.f32 %v5656_v8, %v4854_v6 }
 0x278   : > { %v2408_v53 = vsel %vm874_vm0, %v2406_v19, %v2407_v38  ;;  %v2414_v47 = vadd.f32 %v2407_v38, %v2401_v17  ;;  %v2337_v55 = vor.u32 %v2336_v56, %v2333_v51  ;;  %v2417_v30 = vmul.f32 %v5666_v61, %v4854_v6 }
 0x279   : > { %v2345_v14 = vor.u32 %v2344_v23, %v2341_v12  ;;  %v2413_v21 = vadd.f32 %v2408_v53, %v2400_v20  ;;  %v2421_v11 = vrot.slane %v2415_v32, 2  ;;  %v2432_v43 = vmul.f32 %v5724_v35, %v4877_v22 }
 0x27a   : > { %v2433_v39 = vmul.f32 %v5717_v29, %v4877_v22  ;;  %v2422_v36 = vrot.slane %v2416_v31, 2  ;;  %v2434_v34 = vmul.f32 %v5719_v24, %v4877_v22  ;;  %v2438_v13 = vmul.f32 %v5717_v29, %v4883_v27 }
 0x27b   : > { %v2346_v54 = vsel %vm1016_vm2, %v2337_v55, %v2345_v14  ;;  %v2424_v59 = vrot.slane %v2417_v30, 2  ;;  %v2429_v26 = vadd.f32 %v2421_v11, %v2412_v1  ;;  %v2439_v16 = vmul.f32 %v5719_v24, %v4883_v27 }
 0x27c   : > { %4179 = vmatmul.mubr.bf16.gmra.mrb[16].mxu1 %v2346_v54  ;;  %v2451_v49 = vmul.f32 %v5743_v15, %v5717_v29  ;;  %v2423_v46 = vsel %vm894_vm1, %v2421_v11, %v2422_v36  ;;  %v2442_v42 = vrot.slane %v2438_v13, 1  ;;  %v2452_v52 = vmul.f32 %v5743_v15, %v5719_v24 }
 0x27d   : > { %v2453_v7 = vmul.f32 %v5743_v15, %v5728_v63  ;;  %v2425_v2 = vsel %vm894_vm1, %v2422_v36, %v2424_v59  ;;  %v2430_v28 = vadd.f32 %v2423_v46, %v2413_v21  ;;  %v2435_v57 = vadd.f32 %v2432_v43, %v2429_v26 }
 0x27e   : > { %v2443_v5 = vrot.slane %v2439_v16, 1  ;;  %v2431_v9 = vadd.f32 %v2425_v2, %v2414_v47  ;;  %v2457_v0 = vrot.slane %v2451_v49, 2  ;;  %v2458_v48 = vrot.slane %v2452_v52, 2 }
 0x27f   : > { %v2460_v58 = vrot.slane %v2453_v7, 2  ;;  %v2436_v33 = vadd.f32 %v2433_v39, %v2430_v28  ;;  %v2448_v41 = vadd.f32 %v2442_v42, %v2435_v57  ;;  %v2509_v25 = vmul.f32 %v5648_v40, %v4842_v45 }
 0x280   : > { %v2444_v4 = vsel %vm874_vm0, %v2442_v42, %v2443_v5  ;;  %v2437_v3 = vadd.f32 %v2434_v34, %v2431_v9  ;;  %v2459_v60 = vsel %vm894_vm1, %v2457_v0, %v2458_v48  ;;  %v2510_v17 = vmul.f32 %v5650_v10, %v4842_v45 }
 0x281   : > { %v2461_v20 = vsel %vm894_vm1, %v2458_v48, %v2460_v58  ;;  %v2449_v19 = vadd.f32 %v2444_v4, %v2436_v33  ;;  %v2465_v38 = vadd.f32 %v2457_v0, %v2448_v41  ;;  %v2511_v51 = vmul.f32 %v5656_v8, %v4842_v45 }
 0x282   : > { %v2512_v56 = vmul.f32 %v5650_v10, %v4836_v37  ;;  %v2450_v12 = vadd.f32 %v2443_v5, %v2437_v3  ;;  %v2513_v40 = vmul.f32 %v5656_v8, %v4836_v37  ;;  %v2525_v23 = vmul.f32 %v5650_v10, %v4840_v44 }
 0x283   : > { %v2526_v53 = vmul.f32 %v5656_v8, %v4840_v44  ;;  %v2466_v1 = vadd.f32 %v2459_v60, %v2449_v19  ;;  %v2468_v47 = vadd.f32 %v5421_v50, %v2465_v38  ;;  %v2527_v55 = vmul.f32 %v5666_v61, %v4840_v44 }
 0x284   : > { %v2516_v32 = vrot.slane %v2512_v56, 1  ;;  %v2467_v14 = vadd.f32 %v2461_v20, %v2450_v12  ;;  %v2517_v21 = vrot.slane %v2513_v40, 1  ;;  %v2531_v31 = vrot.slane %v2525_v23, 2  ;;  %v5794_v56 = vld [vmem:[#allocation2 + $0x1a8] sm:$0xff]  ;;  %v5796_v12 = vld [vmem:[#allocation2 + $0x1b0] sm:$0xff] }
 0x285   : > { %v2532_v30 = vrot.slane %v2526_v53, 2  ;;  %v2469_v11 = vadd.f32 %v5421_v50, %v2466_v1  ;;  %v2471_v43 = vmax.f32 %v2468_v47, 0.0  ;;  %v2534_v54 = vrot.slane %v2527_v55, 2  ;;  %v5799_v1 = vld [vmem:[#allocation2 + $0x1a0] sm:$0xff] }
 0x286   : > { %v2522_v39 = vadd.f32 %v2516_v32, %v2509_v25  ;;  %v2470_v10 = vadd.f32 %v5421_v50, %v2467_v14  ;;  %v2518_v8 = vsel %vm874_vm0, %v2516_v32, %v2517_v21  ;;  %v2524_v36 = vadd.f32 %v2517_v21, %v2511_v51 }
 0x287   : > { %v2533_v34 = vsel %vm894_vm1, %v2531_v31, %v2532_v30  ;;  %v2472_v13 = vmax.f32 %v2469_v11, 0.0  ;;  %v2523_v59 = vadd.f32 %v2518_v8, %v2510_v17  ;;  %v2535_v61 = vsel %vm894_vm1, %v2532_v30, %v2534_v54  ;;  %v5803_v11 = vld [vmem:[#allocation2 + $0x1b8] sm:$0xff] }
 0x288   : > { %v2539_v26 = vadd.f32 %v2531_v31, %v2522_v39  ;;  %v2473_v16 = vmax.f32 %v2470_v10, 0.0  ;;  %v2541_v49 = vadd.f32 %v2535_v61, %v2524_v36  ;;  %v2542_v46 = vmul.f32 %v5724_v35, %v4851_v62 }
 0x289   : > { %v2543_v42 = vmul.f32 %v5717_v29, %v4851_v62  ;;  %v2474_v52 = vpack.c.bf16 %v2472_v13, %v2471_v43  ;;  %v2540_v50 = vadd.f32 %v2533_v34, %v2523_v59  ;;  %v2544_v7 = vmul.f32 %v5719_v24, %v4851_v62 }
 0x28a   : > { %v2548_v2 = vmul.f32 %v5717_v29, %v4868_v18  ;;  %v2475_v28 = vpack.c.bf16 %v2473_v16, %v2473_v16  ;;  %v2545_v57 = vadd.f32 %v2542_v46, %v2539_v26  ;;  %v2549_v5 = vmul.f32 %v5719_v24, %v4868_v18 }
 0x28b   : > { %v2561_v9 = vmul.f32 %v5717_v29, %v4854_v6  ;;  %v2477_v0 = vshrl.u32 %v2474_v52, 16  ;;  %v2480_v48 = vshll.u32 %v2474_v52, 16  ;;  %v2546_v58 = vadd.f32 %v2543_v42, %v2540_v50 }
 0x28c   : > { %v2547_v33 = vadd.f32 %v2544_v7, %v2541_v49  ;;  %v2485_v4 = vshrl.u32 %v2475_v28, 16  ;;  %v2488_v41 = vshll.u32 %v2475_v28, 16  ;;  %v2552_v25 = vrot.slane %v2548_v2, 1 }
 0x28d   : > { %v2553_v3 = vrot.slane %v2549_v5, 1  ;;  %v2479_v60 = vrot.slane %v2477_v0, 3  ;;  %v2482_v20 = vrot.slane %v2480_v48, 4  ;;  %v2562_v17 = vmul.f32 %v5719_v24, %v4854_v6 }
 0x28e   : > { %v2563_v19 = vmul.f32 %v5728_v63, %v4854_v6  ;;  %v2487_v38 = vrot.slane %v2485_v4, 3  ;;  %v2490_v51 = vrot.slane %v2488_v41, 4  ;;  %v2558_v23 = vadd.f32 %v2552_v25, %v2545_v57 }
 0x28f   : > { %v2554_v40 = vsel %vm874_vm0, %v2552_v25, %v2553_v3  ;;  %v2483_v53 = vor.u32 %v2482_v20, %v2479_v60  ;;  %v2560_v32 = vadd.f32 %v2553_v3, %v2547_v33  ;;  %v2567_v55 = vrot.slane %v2561_v9, 2 }
 0x290   : > { %v2559_v47 = vadd.f32 %v2554_v40, %v2546_v58  ;;  %v2491_v14 = vor.u32 %v2490_v51, %v2487_v38  ;;  %v2568_v21 = vrot.slane %v2562_v17, 2  ;;  %v2570_v31 = vrot.slane %v2563_v19, 2  ;;  %v5840_v38 = vld [vmem:[%s6261_s4] ss:$0 sm:$0xff] }
 0x291   : > { %v2578_v30 = vmul.f32 %v5799_v1, %v4877_v22  ;;  %v2575_v43 = vadd.f32 %v2567_v55, %v2558_v23  ;;  %v2579_v39 = vmul.f32 %v5794_v56, %v4877_v22  ;;  %v2580_v54 = vmul.f32 %v5796_v12, %v4877_v22 }
 0x292   : > { %v2584_v10 = vmul.f32 %v5794_v56, %v4883_v27  ;;  %v2492_v8 = vsel %vm1016_vm2, %v2483_v53, %v2491_v14  ;;  %v2569_v36 = vsel %vm894_vm1, %v2567_v55, %v2568_v21  ;;  %v2571_v34 = vsel %vm894_vm1, %v2568_v21, %v2570_v31 }
 0x293   : > { %v2585_v13 = vmul.f32 %v5796_v12, %v4883_v27  ;;  %4182 = vmatprep.mubr.bf16.mxu1 %v2492_v8  ;;  %v2576_v59 = vadd.f32 %v2569_v36, %v2559_v47  ;;  %v2577_v61 = vadd.f32 %v2571_v34, %v2560_v32  ;;  %v2581_v26 = vadd.f32 %v2578_v30, %v2575_v43 }
 0x294   : > { %v2588_v16 = vrot.slane %v2584_v10, 1  ;;  %v2597_v46 = vmul.f32 %v5743_v15, %v5794_v56  ;;  %v2598_v42 = vmul.f32 %v5743_v15, %v5796_v12  ;;  %v2599_v52 = vmul.f32 %v5743_v15, %v5803_v11 }
 0x295   : > { %v2589_v49 = vrot.slane %v2585_v13, 1  ;;  %v2582_v50 = vadd.f32 %v2579_v39, %v2576_v59  ;;  %v2583_v7 = vadd.f32 %v2580_v54, %v2577_v61  ;;  %v2655_v28 = vmul.f32 %v5724_v35, %v4842_v45 }
 0x296   : > { %v2594_v2 = vadd.f32 %v2588_v16, %v2581_v26  ;;  %v2603_v5 = vrot.slane %v2597_v46, 2  ;;  %v2604_v9 = vrot.slane %v2598_v42, 2  ;;  %v2606_v0 = vrot.slane %v2599_v52, 2 }
 0x297   : > { %v2590_v57 = vsel %vm874_vm0, %v2588_v16, %v2589_v49  ;;  %v2596_v58 = vadd.f32 %v2589_v49, %v2583_v7  ;;  %v2656_v33 = vmul.f32 %v5717_v29, %v4842_v45  ;;  %v2657_v4 = vmul.f32 %v5719_v24, %v4842_v45 }
 0x298   : > { %v2595_v48 = vadd.f32 %v2590_v57, %v2582_v50  ;;  %v2605_v41 = vsel %vm894_vm1, %v2603_v5, %v2604_v9  ;;  %v2607_v25 = vsel %vm894_vm1, %v2604_v9, %v2606_v0  ;;  %v2611_v3 = vadd.f32 %v2603_v5, %v2594_v2 }
 0x299   : > { %v2658_v35 = vmul.f32 %v5717_v29, %v4836_v37  ;;  %v2613_v20 = vadd.f32 %v2607_v25, %v2596_v58  ;;  %v2659_v17 = vmul.f32 %v5719_v24, %v4836_v37  ;;  %v2671_v19 = vmul.f32 %v5717_v29, %v4840_v44 }
 0x29a   : > { %v2612_v60 = vadd.f32 %v2605_v41, %v2595_v48  ;;  %v2614_v51 = vadd.f32 %v5840_v38, %v2611_v3  ;;  %v2672_v23 = vmul.f32 %v5719_v24, %v4840_v44  ;;  %v2673_v53 = vmul.f32 %v5728_v63, %v4840_v44  ;;  %v5870_v3 = vld [vmem:[#allocation2 + $0x1c0] sm:$0xff] }
 0x29b   : > { %v2662_v40 = vrot.slane %v2658_v35, 1  ;;  %v2616_v32 = vadd.f32 %v5840_v38, %v2613_v20  ;;  %v2663_v55 = vrot.slane %v2659_v17, 1  ;;  %v2677_v29 = vrot.slane %v2671_v19, 2  ;;  %v5849_v43 = vpop.f32.mrb[0].mxu1 }
 0x29c   : > { %v2615_v47 = vadd.f32 %v5840_v38, %v2612_v60  ;;  %v2617_v14 = vmax.f32 %v2614_v51, 0.0  ;;  %v2678_v31 = vrot.slane %v2672_v23, 2  ;;  %v2680_v30 = vrot.slane %v2673_v53, 2  ;;  %v5852_v8 = vpop.f32.mrb[1].mxu1  ;;  %v5878_v23 = vld [vmem:[#allocation2 + $0x1d0] sm:$0xff] }
 0x29d   : > { %v2668_v21 = vadd.f32 %v2662_v40, %v2655_v28  ;;  %v2619_v54 = vmax.f32 %v2616_v32, 0.0  ;;  %v2664_v10 = vsel %vm874_vm0, %v2662_v40, %v2663_v55  ;;  %v2670_v24 = vadd.f32 %v2663_v55, %v2657_v4  ;;  %v5856_v59 = vpop.f32.mrb[2].mxu1  ;;  %v5876_v40 = vld [vmem:[#allocation2 + $0x1c8] sm:$0xff] }
 0x29e   : > { %v2618_v39 = vmax.f32 %v2615_v47, 0.0  ;;  %v2669_v63 = vadd.f32 %v2664_v10, %v2656_v33  ;;  %v2679_v36 = vsel %vm894_vm1, %v2677_v29, %v2678_v31  ;;  %v2681_v34 = vsel %vm894_vm1, %v2678_v31, %v2680_v30  ;;  %v5860_v46 = vpop.f32.mrb[3].mxu1 }
 0x29f   : > { %v2685_v13 = vadd.f32 %v2677_v29, %v2668_v21  ;;  %v2621_v26 = vpack.c.bf16 %v2619_v54, %v2619_v54  ;;  %v2687_v16 = vadd.f32 %v2681_v34, %v2670_v24  ;;  %v2688_v49 = vmul.f32 %v5799_v1, %v4851_v62  ;;  %v5886_v54 = vld [vmem:[#allocation2 + $0x1d8] sm:$0xff] }
 0x2a0   : > { %v2620_v61 = vpack.c.bf16 %v2618_v39, %v2617_v14  ;;  %v2686_v42 = vadd.f32 %v2679_v36, %v2669_v63  ;;  %v2689_v52 = vmul.f32 %v5794_v56, %v4851_v62  ;;  %v2690_v50 = vmul.f32 %v5796_v12, %v4851_v62 }
 0x2a1   : > { %v2694_v7 = vmul.f32 %v5794_v56, %v4868_v18  ;;  %v2631_v57 = vshrl.u32 %v2621_v26, 16  ;;  %v2634_v5 = vshll.u32 %v2621_v26, 16  ;;  %v2691_v9 = vadd.f32 %v2688_v49, %v2685_v13 }
 0x2a2   : > { %v2623_v2 = vshrl.u32 %v2620_v61, 16  ;;  %v2626_v28 = vshll.u32 %v2620_v61, 16  ;;  %v2692_v0 = vadd.f32 %v2689_v52, %v2686_v42  ;;  %v2693_v48 = vadd.f32 %v2690_v50, %v2687_v16 }
 0x2a3   : > { %v2695_v58 = vmul.f32 %v5796_v12, %v4868_v18  ;;  %v2633_v41 = vrot.slane %v2631_v57, 3  ;;  %v2636_v25 = vrot.slane %v2634_v5, 4  ;;  %v2698_v35 = vrot.slane %v2694_v7, 1 }
 0x2a4   : > { %v2625_v33 = vrot.slane %v2623_v2, 3  ;;  %v2628_v4 = vrot.slane %v2626_v28, 4  ;;  %v2707_v20 = vmul.f32 %v5794_v56, %v4854_v6  ;;  %v2708_v17 = vmul.f32 %v5796_v12, %v4854_v6 }
 0x2a5   : > { %v2699_v60 = vrot.slane %v2695_v58, 1  ;;  %v2637_v51 = vor.u32 %v2636_v25, %v2633_v41  ;;  %v2709_v53 = vmul.f32 %v5803_v11, %v4854_v6  ;;  %v2724_v47 = vmul.f32 %v5870_v3, %v4877_v22 }
 0x2a6   : > { %v2629_v19 = vor.u32 %v2628_v4, %v2625_v33  ;;  %v2704_v55 = vadd.f32 %v2698_v35, %v2691_v9  ;;  %v2713_v14 = vrot.slane %v2707_v20, 2  ;;  %v2714_v30 = vrot.slane %v2708_v17, 2 }
 0x2a7   : > { %v2700_v32 = vsel %vm874_vm0, %v2698_v35, %v2699_v60  ;;  %v2706_v29 = vadd.f32 %v2699_v60, %v2693_v48  ;;  %v2716_v39 = vrot.slane %v2709_v53, 2  ;;  %v2725_v24 = vmul.f32 %v5876_v40, %v4877_v22 }
 0x2a8   : > { %v2638_v21 = vsel %vm1016_vm2, %v2629_v19, %v2637_v51  ;;  %v2705_v31 = vadd.f32 %v2700_v32, %v2692_v0  ;;  %v2721_v10 = vadd.f32 %v2713_v14, %v2704_v55  ;;  %v2726_v63 = vmul.f32 %v5878_v23, %v4877_v22 }
 0x2a9   : > { %4183 = vmatmul.mubr.bf16.gmra.mrb[20].mxu1 %v2638_v21  ;;  %v2730_v36 = vmul.f32 %v5876_v40, %v4883_v27  ;;  %v2715_v34 = vsel %vm894_vm1, %v2713_v14, %v2714_v30  ;;  %v2717_v13 = vsel %vm894_vm1, %v2714_v30, %v2716_v39  ;;  %v2731_v61 = vmul.f32 %v5878_v23, %v4883_v27 }
 0x2aa   : > { %v2743_v26 = vmul.f32 %v5743_v15, %v5876_v40  ;;  %v2722_v16 = vadd.f32 %v2715_v34, %v2705_v31  ;;  %v2723_v49 = vadd.f32 %v2717_v13, %v2706_v29  ;;  %v2727_v42 = vadd.f32 %v2724_v47, %v2721_v10 }
 0x2ab   : > { %v2734_v52 = vrot.slane %v2730_v36, 1  ;;  %v2735_v50 = vrot.slane %v2731_v61, 1  ;;  %v2744_v7 = vmul.f32 %v5743_v15, %v5878_v23  ;;  %v2745_v2 = vmul.f32 %v5743_v15, %v5886_v54 }
 0x2ac   : > { %v2749_v28 = vrot.slane %v2743_v26, 2  ;;  %v2728_v57 = vadd.f32 %v2725_v24, %v2722_v16  ;;  %v2729_v5 = vadd.f32 %v2726_v63, %v2723_v49  ;;  %v2801_v0 = vmul.f32 %v5799_v1, %v4842_v45 }
 0x2ad   : > { %v2740_v9 = vadd.f32 %v2734_v52, %v2727_v42  ;;  %v2736_v48 = vsel %vm874_vm0, %v2734_v52, %v2735_v50  ;;  %v2750_v58 = vrot.slane %v2744_v7, 2  ;;  %v2752_v33 = vrot.slane %v2745_v2, 2 }
 0x2ae   : > { %v2802_v4 = vmul.f32 %v5794_v56, %v4842_v45  ;;  %v2741_v41 = vadd.f32 %v2736_v48, %v2728_v57  ;;  %v2742_v25 = vadd.f32 %v2735_v50, %v2729_v5  ;;  %v2803_v60 = vmul.f32 %v5796_v12, %v4842_v45 }
 0x2af   : > { %v2757_v35 = vadd.f32 %v2749_v28, %v2740_v9  ;;  %v2751_v20 = vsel %vm894_vm1, %v2749_v28, %v2750_v58  ;;  %v2753_v17 = vsel %vm894_vm1, %v2750_v58, %v2752_v33  ;;  %v2804_v1 = vmul.f32 %v5794_v56, %v4836_v37 }
 0x2b0   : > { %v2805_v19 = vmul.f32 %v5796_v12, %v4836_v37  ;;  %v2758_v51 = vadd.f32 %v2751_v20, %v2741_v41  ;;  %v2759_v53 = vadd.f32 %v2753_v17, %v2742_v25  ;;  %v2817_v32 = vmul.f32 %v5794_v56, %v4840_v44 }
 0x2b1   : > { %v2760_v47 = vadd.f32 %v5840_v38, %v2757_v35  ;;  %v2808_v55 = vrot.slane %v2804_v1, 1  ;;  %v2818_v14 = vmul.f32 %v5796_v12, %v4840_v44  ;;  %v2819_v21 = vmul.f32 %v5803_v11, %v4840_v44  ;;  %v5939_v1 = vld [vmem:[#allocation2 + $0x1e0] sm:$0xff] }
 0x2b2   : > { %v2809_v29 = vrot.slane %v2805_v19, 1  ;;  %v2761_v31 = vadd.f32 %v5840_v38, %v2758_v51  ;;  %v2762_v30 = vadd.f32 %v5840_v38, %v2759_v53  ;;  %v2823_v10 = vrot.slane %v2817_v32, 2  ;;  %v5941_v19 = vld [vmem:[#allocation2 + $0x1e8] sm:$0xff] }
 0x2b3   : > { %v2763_v39 = vmax.f32 %v2760_v47, 0.0  ;;  %v2814_v63 = vadd.f32 %v2808_v55, %v2801_v0  ;;  %v2824_v34 = vrot.slane %v2818_v14, 2  ;;  %v2826_v26 = vrot.slane %v2819_v21, 2  ;;  %v5947_v14 = vld [vmem:[#allocation2 + $0x1f0] sm:$0xff] }
 0x2b4   : > { %v2810_v24 = vsel %vm874_vm0, %v2808_v55, %v2809_v29  ;;  %v2816_v36 = vadd.f32 %v2809_v29, %v2803_v60  ;;  %v2764_v56 = vmax.f32 %v2761_v31, 0.0  ;;  %v2765_v13 = vmax.f32 %v2762_v30, 0.0 }
 0x2b5   : > { %v2815_v61 = vadd.f32 %v2810_v24, %v2802_v4  ;;  %v2825_v12 = vsel %vm894_vm1, %v2823_v10, %v2824_v34  ;;  %v2831_v16 = vadd.f32 %v2823_v10, %v2814_v63  ;;  %v2834_v11 = vmul.f32 %v5870_v3, %v4851_v62 }
 0x2b6   : > { %v2835_v49 = vmul.f32 %v5876_v40, %v4851_v62  ;;  %v2766_v42 = vpack.c.bf16 %v2764_v56, %v2763_v39  ;;  %v2767_v52 = vpack.c.bf16 %v2765_v13, %v2765_v13  ;;  %v2827_v50 = vsel %vm894_vm1, %v2824_v34, %v2826_v26  ;;  %v5957_v13 = vld [vmem:[#allocation2 + $0x1f8] sm:$0xff] }
 0x2b7   : > { %v2832_v7 = vadd.f32 %v2825_v12, %v2815_v61  ;;  %v2833_v2 = vadd.f32 %v2827_v50, %v2816_v36  ;;  %v2836_v28 = vmul.f32 %v5878_v23, %v4851_v62  ;;  %v2837_v57 = vadd.f32 %v2834_v11, %v2831_v16 }
 0x2b8   : > { %v2840_v5 = vmul.f32 %v5876_v40, %v4868_v18  ;;  %v2769_v9 = vshrl.u32 %v2766_v42, 16  ;;  %v2772_v0 = vshll.u32 %v2766_v42, 16  ;;  %v2777_v48 = vshrl.u32 %v2767_v52, 16 }
 0x2b9   : > { %v2780_v58 = vshll.u32 %v2767_v52, 16  ;;  %v2838_v33 = vadd.f32 %v2835_v49, %v2832_v7  ;;  %v2839_v4 = vadd.f32 %v2836_v28, %v2833_v2  ;;  %v2841_v41 = vmul.f32 %v5878_v23, %v4868_v18 }
 0x2ba   : > { %v2844_v25 = vrot.slane %v2840_v5, 1  ;;  %v2771_v35 = vrot.slane %v2769_v9, 3  ;;  %v2774_v60 = vrot.slane %v2772_v0, 4  ;;  %v2779_v20 = vrot.slane %v2777_v48, 3 }
 0x2bb   : > { %v2782_v17 = vrot.slane %v2780_v58, 4  ;;  %v2845_v51 = vrot.slane %v2841_v41, 1  ;;  %v2853_v47 = vmul.f32 %v5876_v40, %v4854_v6  ;;  %v2854_v32 = vmul.f32 %v5878_v23, %v4854_v6 }
 0x2bc   : > { %v2850_v53 = vadd.f32 %v2844_v25, %v2837_v57  ;;  %v2775_v55 = vor.u32 %v2774_v60, %v2771_v35  ;;  %v2855_v21 = vmul.f32 %v5886_v54, %v4854_v6  ;;  %v2870_v31 = vmul.f32 %v5939_v1, %v4877_v22 }
 0x2bd   : > { %v2783_v29 = vor.u32 %v2782_v17, %v2779_v20  ;;  %v2846_v30 = vsel %vm874_vm0, %v2844_v25, %v2845_v51  ;;  %v2852_v39 = vadd.f32 %v2845_v51, %v2839_v4  ;;  %v2859_v10 = vrot.slane %v2853_v47, 2 }
 0x2be   : > { %v2860_v24 = vrot.slane %v2854_v32, 2  ;;  %v2851_v36 = vadd.f32 %v2846_v30, %v2838_v33  ;;  %v2862_v34 = vrot.slane %v2855_v21, 2  ;;  %v2871_v56 = vmul.f32 %v5941_v19, %v4877_v22 }
 0x2bf   : > { %v2784_v63 = vsel %vm1016_vm2, %v2775_v55, %v2783_v29  ;;  %v2867_v26 = vadd.f32 %v2859_v10, %v2850_v53  ;;  %v2872_v12 = vmul.f32 %v5947_v14, %v4877_v22  ;;  %v2876_v16 = vmul.f32 %v5941_v19, %v4883_v27 }
 0x2c0   : > { %4186 = vmatprep.mubr.bf16.mxu1 %v2784_v63  ;;  %v2861_v61 = vsel %vm894_vm1, %v2859_v10, %v2860_v24  ;;  %v2863_v11 = vsel %vm894_vm1, %v2860_v24, %v2862_v34  ;;  %v2877_v42 = vmul.f32 %v5947_v14, %v4883_v27  ;;  %v2889_v52 = vmul.f32 %v5743_v15, %v5941_v19 }
 0x2c1   : > { %v2868_v49 = vadd.f32 %v2861_v61, %v2851_v36  ;;  %v2869_v50 = vadd.f32 %v2863_v11, %v2852_v39  ;;  %v2873_v7 = vadd.f32 %v2870_v31, %v2867_v26  ;;  %v2880_v2 = vrot.slane %v2876_v16, 1 }
 0x2c2   : > { %v2890_v28 = vmul.f32 %v5743_v15, %v5947_v14  ;;  %v2881_v5 = vrot.slane %v2877_v42, 1  ;;  %v2891_v9 = vmul.f32 %v5743_v15, %v5957_v13  ;;  %v2895_v0 = vrot.slane %v2889_v52, 2 }
 0x2c3   : > { %v2874_v57 = vadd.f32 %v2871_v56, %v2868_v49  ;;  %v2875_v48 = vadd.f32 %v2872_v12, %v2869_v50  ;;  %v2886_v58 = vadd.f32 %v2880_v2, %v2873_v7  ;;  %v2947_v4 = vmul.f32 %v5870_v3, %v4842_v45 }
 0x2c4   : > { %v2896_v33 = vrot.slane %v2890_v28, 2  ;;  %v2882_v41 = vsel %vm874_vm0, %v2880_v2, %v2881_v5  ;;  %v2898_v25 = vrot.slane %v2891_v9, 2  ;;  %v2948_v35 = vmul.f32 %v5876_v40, %v4842_v45 }
 0x2c5   : > { %v2949_v60 = vmul.f32 %v5878_v23, %v4842_v45  ;;  %v2887_v20 = vadd.f32 %v2882_v41, %v2874_v57  ;;  %v2888_v17 = vadd.f32 %v2881_v5, %v2875_v48  ;;  %v2903_v53 = vadd.f32 %v2895_v0, %v2886_v58 }
 0x2c6   : > { %v2897_v51 = vsel %vm894_vm1, %v2895_v0, %v2896_v33  ;;  %v2899_v47 = vsel %vm894_vm1, %v2896_v33, %v2898_v25  ;;  %v2950_v32 = vmul.f32 %v5876_v40, %v4836_v37  ;;  %v2951_v3 = vmul.f32 %v5878_v23, %v4836_v37 }
 0x2c7   : > { %v2963_v55 = vmul.f32 %v5876_v40, %v4840_v44  ;;  %v2904_v29 = vadd.f32 %v2897_v51, %v2887_v20  ;;  %v2905_v21 = vadd.f32 %v2899_v47, %v2888_v17  ;;  %v2906_v31 = vadd.f32 %v5840_v38, %v2903_v53 }
 0x2c8   : > { %v2964_v30 = vmul.f32 %v5878_v23, %v4840_v44  ;;  %v2954_v39 = vrot.slane %v2950_v32, 1  ;;  %v2955_v10 = vrot.slane %v2951_v3, 1  ;;  %v2965_v24 = vmul.f32 %v5886_v54, %v4840_v44 }
 0x2c9   : > { %v2969_v63 = vrot.slane %v2963_v55, 2  ;;  %v2907_v36 = vadd.f32 %v5840_v38, %v2904_v29  ;;  %v2908_v34 = vadd.f32 %v5840_v38, %v2905_v21  ;;  %v2909_v56 = vmax.f32 %v2906_v31, 0.0  ;;  %v6016_v31 = vld [vmem:[#allocation2 + $0x200] sm:$0xff] }
 0x2ca   : > { %v2970_v61 = vrot.slane %v2964_v30, 2  ;;  %v2956_v40 = vsel %vm874_vm0, %v2954_v39, %v2955_v10  ;;  %v2960_v26 = vadd.f32 %v2954_v39, %v2947_v4  ;;  %v2962_v12 = vadd.f32 %v2955_v10, %v2949_v60  ;;  %v5996_v11 = vpop.f32.mrb[4].mxu1  ;;  %v6018_v30 = vld [vmem:[#allocation2 + $0x208] sm:$0xff]  ;;  %v6020_v39 = vld [vmem:[#allocation2 + $0x210] sm:$0xff] }
 0x2cb   : > { %v2972_v16 = vrot.slane %v2965_v24, 2  ;;  %v2910_v23 = vmax.f32 %v2907_v36, 0.0  ;;  %v2911_v49 = vmax.f32 %v2908_v34, 0.0  ;;  %v2961_v42 = vadd.f32 %v2956_v40, %v2948_v35  ;;  %v5999_v54 = vpop.f32.mrb[5].mxu1 }
 0x2cc   : > { %v2971_v52 = vsel %vm894_vm1, %v2969_v63, %v2970_v61  ;;  %v2977_v7 = vadd.f32 %v2969_v63, %v2960_v26  ;;  %v2980_v2 = vmul.f32 %v5939_v1, %v4851_v62  ;;  %v2981_v28 = vmul.f32 %v5941_v19, %v4851_v62  ;;  %v6006_v57 = vpop.f32.mrb[6].mxu1  ;;  %v6027_v26 = vld [vmem:[#allocation2 + $0x218] sm:$0xff] }
 0x2cd   : > { %v2973_v50 = vsel %vm894_vm1, %v2970_v61, %v2972_v16  ;;  %v2912_v5 = vpack.c.bf16 %v2910_v23, %v2909_v56  ;;  %v2913_v9 = vpack.c.bf16 %v2911_v49, %v2911_v49  ;;  %v2978_v0 = vadd.f32 %v2971_v52, %v2961_v42  ;;  %v6008_v58 = vpop.f32.mrb[7].mxu1 }
 0x2ce   : > { %v2979_v48 = vadd.f32 %v2973_v50, %v2962_v12  ;;  %v2982_v33 = vmul.f32 %v5947_v14, %v4851_v62  ;;  %v2983_v4 = vadd.f32 %v2980_v2, %v2977_v7  ;;  %v2986_v41 = vmul.f32 %v5941_v19, %v4868_v18 }
 0x2cf   : > { %v2987_v25 = vmul.f32 %v5947_v14, %v4868_v18  ;;  %v2915_v35 = vshrl.u32 %v2912_v5, 16  ;;  %v2918_v60 = vshll.u32 %v2912_v5, 16  ;;  %v2923_v20 = vshrl.u32 %v2913_v9, 16 }
 0x2d0   : > { %v2926_v17 = vshll.u32 %v2913_v9, 16  ;;  %v2984_v51 = vadd.f32 %v2981_v28, %v2978_v0  ;;  %v2985_v53 = vadd.f32 %v2982_v33, %v2979_v48  ;;  %v2990_v47 = vrot.slane %v2986_v41, 1 }
 0x2d1   : > { %v2991_v32 = vrot.slane %v2987_v25, 1  ;;  %v2917_v3 = vrot.slane %v2915_v35, 3  ;;  %v2920_v55 = vrot.slane %v2918_v60, 4  ;;  %v2925_v29 = vrot.slane %v2923_v20, 3 }
 0x2d2   : > { %v2928_v21 = vrot.slane %v2926_v17, 4  ;;  %v2996_v24 = vadd.f32 %v2990_v47, %v2983_v4  ;;  %v2999_v36 = vmul.f32 %v5941_v19, %v4854_v6  ;;  %v3000_v40 = vmul.f32 %v5947_v14, %v4854_v6 }
 0x2d3   : > { %v2992_v10 = vsel %vm874_vm0, %v2990_v47, %v2991_v32  ;;  %v2998_v63 = vadd.f32 %v2991_v32, %v2985_v53  ;;  %v2921_v34 = vor.u32 %v2920_v55, %v2917_v3  ;;  %v3001_v12 = vmul.f32 %v5957_v13, %v4854_v6 }
 0x2d4   : > { %v2929_v56 = vor.u32 %v2928_v21, %v2925_v29  ;;  %v2997_v61 = vadd.f32 %v2992_v10, %v2984_v51  ;;  %v3005_v16 = vrot.slane %v2999_v36, 2  ;;  %v3016_v23 = vmul.f32 %v6016_v31, %v4877_v22 }
 0x2d5   : > { %v3017_v49 = vmul.f32 %v6018_v30, %v4877_v22  ;;  %v3006_v52 = vrot.slane %v3000_v40, 2  ;;  %v3018_v50 = vmul.f32 %v6020_v39, %v4877_v22  ;;  %v3022_v7 = vmul.f32 %v6018_v30, %v4883_v27 }
 0x2d6   : > { %v2930_v42 = vsel %vm1016_vm2, %v2921_v34, %v2929_v56  ;;  %v3008_v2 = vrot.slane %v3001_v12, 2  ;;  %v3013_v28 = vadd.f32 %v3005_v16, %v2996_v24  ;;  %v3023_v5 = vmul.f32 %v6020_v39, %v4883_v27 }
 0x2d7   : > { %4187 = vmatmul.mubr.bf16.gmra.mrb[24].mxu1 %v2930_v42  ;;  %v3035_v9 = vmul.f32 %v5743_v15, %v6018_v30  ;;  %v3007_v0 = vsel %vm894_vm1, %v3005_v16, %v3006_v52  ;;  %v3026_v48 = vrot.slane %v3022_v7, 1  ;;  %v3036_v33 = vmul.f32 %v5743_v15, %v6020_v39 }
 0x2d8   : > { %v3037_v4 = vmul.f32 %v5743_v15, %v6027_v26  ;;  %v3009_v41 = vsel %vm894_vm1, %v3006_v52, %v3008_v2  ;;  %v3014_v25 = vadd.f32 %v3007_v0, %v2997_v61  ;;  %v3019_v35 = vadd.f32 %v3016_v23, %v3013_v28 }
 0x2d9   : > { %v3027_v60 = vrot.slane %v3023_v5, 1  ;;  %v3015_v20 = vadd.f32 %v3009_v41, %v2998_v63  ;;  %v3041_v17 = vrot.slane %v3035_v9, 2  ;;  %v3042_v51 = vrot.slane %v3036_v33, 2 }
 0x2da   : > { %v3044_v53 = vrot.slane %v3037_v4, 2  ;;  %v3020_v47 = vadd.f32 %v3017_v49, %v3014_v25  ;;  %v3032_v3 = vadd.f32 %v3026_v48, %v3019_v35  ;;  %v3092_v55 = vmul.f32 %v5939_v1, %v4842_v45 }
 0x2db   : > { %v3028_v32 = vsel %vm874_vm0, %v3026_v48, %v3027_v60  ;;  %v3021_v29 = vadd.f32 %v3018_v50, %v3015_v20  ;;  %v3043_v21 = vsel %vm894_vm1, %v3041_v17, %v3042_v51  ;;  %v3093_v24 = vmul.f32 %v5941_v19, %v4842_v45 }
 0x2dc   : > { %v3045_v10 = vsel %vm894_vm1, %v3042_v51, %v3044_v53  ;;  %v3033_v36 = vadd.f32 %v3028_v32, %v3020_v47  ;;  %v3049_v63 = vadd.f32 %v3041_v17, %v3032_v3  ;;  %v3094_v34 = vmul.f32 %v5947_v14, %v4842_v45 }
 0x2dd   : > { %v3095_v56 = vmul.f32 %v5941_v19, %v4836_v37  ;;  %v3034_v61 = vadd.f32 %v3027_v60, %v3021_v29  ;;  %v3096_v1 = vmul.f32 %v5947_v14, %v4836_v37  ;;  %v3108_v40 = vmul.f32 %v5941_v19, %v4840_v44 }
 0x2de   : > { %v3109_v12 = vmul.f32 %v5947_v14, %v4840_v44  ;;  %v3050_v16 = vadd.f32 %v3043_v21, %v3033_v36  ;;  %v3052_v23 = vadd.f32 %v5840_v38, %v3049_v63  ;;  %v3110_v45 = vmul.f32 %v5957_v13, %v4840_v44 }
 0x2df   : > { %v3099_v49 = vrot.slane %v3095_v56, 1  ;;  %v3051_v42 = vadd.f32 %v3045_v10, %v3034_v61  ;;  %v3100_v52 = vrot.slane %v3096_v1, 1  ;;  %v3114_v50 = vrot.slane %v3108_v40, 2  ;;  %v3088_v56 = vld [vmem:[#allocation2 + $0x220] sm:$0xff] }
 0x2e0   : > { %v3115_v7 = vrot.slane %v3109_v12, 2  ;;  %v3053_v2 = vadd.f32 %v5840_v38, %v3050_v16  ;;  %v3055_v37 = vmax.f32 %v3052_v23, 0.0  ;;  %v3117_v5 = vrot.slane %v3110_v45, 2  ;;  %v3090_v12 = vld [vmem:[#allocation2 + $0x230] sm:$0xff] }
 0x2e1   : > { %v3105_v28 = vadd.f32 %v3099_v49, %v3092_v55  ;;  %v3054_v19 = vadd.f32 %v5840_v38, %v3051_v42  ;;  %v3101_v14 = vsel %vm874_vm0, %v3099_v49, %v3100_v52  ;;  %v3107_v9 = vadd.f32 %v3100_v52, %v3094_v34 }
 0x2e2   : > { %v3116_v0 = vsel %vm894_vm1, %v3114_v50, %v3115_v7  ;;  %v3056_v48 = vmax.f32 %v3053_v2, 0.0  ;;  %v3106_v33 = vadd.f32 %v3101_v14, %v3093_v24  ;;  %v3118_v44 = vsel %vm894_vm1, %v3115_v7, %v3117_v5 }
 0x2e3   : > { %v3122_v13 = vadd.f32 %v3114_v50, %v3105_v28  ;;  %v3057_v4 = vmax.f32 %v3054_v19, 0.0  ;;  %v3124_v41 = vadd.f32 %v3118_v44, %v3107_v9  ;;  %v3125_v25 = vmul.f32 %v6016_v31, %v4851_v62 }
 0x2e4   : > { %v3126_v35 = vmul.f32 %v6018_v30, %v4851_v62  ;;  %v3058_v60 = vpack.c.bf16 %v3056_v48, %v3055_v37  ;;  %v3123_v20 = vadd.f32 %v3116_v0, %v3106_v33  ;;  %v3127_v17 = vmul.f32 %v6020_v39, %v4851_v62  ;;  %v6103_v48 = vld [vmem:[%s6263_s6] ss:$0 sm:$0xff] }
 0x2e5   : > { %v3131_v51 = vmul.f32 %v6018_v30, %v4868_v18  ;;  %v3059_v53 = vpack.c.bf16 %v3057_v4, %v3057_v4  ;;  %v3128_v47 = vadd.f32 %v3125_v25, %v3122_v13  ;;  %v3132_v32 = vmul.f32 %v6020_v39, %v4868_v18 }
 0x2e6   : > { %v3144_v3 = vmul.f32 %v6018_v30, %v4854_v6  ;;  %v3061_v31 = vshrl.u32 %v3058_v60, 16  ;;  %v3064_v55 = vshll.u32 %v3058_v60, 16  ;;  %v3129_v29 = vadd.f32 %v3126_v35, %v3123_v20  ;;  %v3089_v30 = vld [vmem:[#allocation2 + $0x228] sm:$0xff] }
 0x2e7   : > { %v3130_v21 = vadd.f32 %v3127_v17, %v3124_v41  ;;  %v3069_v10 = vshrl.u32 %v3059_v53, 16  ;;  %v3072_v24 = vshll.u32 %v3059_v53, 16  ;;  %v3135_v36 = vrot.slane %v3131_v51, 1 }
 0x2e8   : > { %v3136_v63 = vrot.slane %v3132_v32, 1  ;;  %v3063_v62 = vrot.slane %v3061_v31, 3  ;;  %v3066_v34 = vrot.slane %v3064_v55, 4  ;;  %v3145_v61 = vmul.f32 %v6020_v39, %v4854_v6  ;;  %v3091_v39 = vld [vmem:[#allocation2 + $0x238] sm:$0xff] }
 0x2e9   : > { %v3146_v18 = vmul.f32 %v6027_v26, %v4854_v6  ;;  %v3071_v1 = vrot.slane %v3069_v10, 3  ;;  %v3074_v40 = vrot.slane %v3072_v24, 4  ;;  %v3141_v23 = vadd.f32 %v3135_v36, %v3128_v47 }
 0x2ea   : > { %v3137_v16 = vsel %vm874_vm0, %v3135_v36, %v3136_v63  ;;  %v3067_v49 = vor.u32 %v3066_v34, %v3063_v62  ;;  %v3143_v42 = vadd.f32 %v3136_v63, %v3130_v21  ;;  %v3150_v52 = vrot.slane %v3144_v3, 2 }
 0x2eb   : > { %v3142_v45 = vadd.f32 %v3137_v16, %v3129_v29  ;;  %v3075_v50 = vor.u32 %v3074_v40, %v3071_v1  ;;  %v3151_v7 = vrot.slane %v3145_v61, 2  ;;  %v3153_v2 = vrot.slane %v3146_v18, 2 }
 0x2ec   : > { %v3161_v37 = vmul.f32 %v3088_v56, %v4877_v22  ;;  %v3158_v28 = vadd.f32 %v3150_v52, %v3141_v23  ;;  %v3162_v6 = vmul.f32 %v3089_v30, %v4877_v22  ;;  %v3163_v26 = vmul.f32 %v3090_v12, %v4877_v22 }
 0x2ed   : > { %v3167_v5 = vmul.f32 %v3089_v30, %v4883_v27  ;;  %v3076_v19 = vsel %vm1016_vm2, %v3067_v49, %v3075_v50  ;;  %v3152_v14 = vsel %vm894_vm1, %v3150_v52, %v3151_v7  ;;  %v3154_v9 = vsel %vm894_vm1, %v3151_v7, %v3153_v2 }
 0x2ee   : > { %v3168_v0 = vmul.f32 %v3090_v12, %v4883_v27  ;;  %4190 = vmatprep.mubr.bf16.mxu1 %v3076_v19  ;;  %v3159_v33 = vadd.f32 %v3152_v14, %v3142_v45  ;;  %v3160_v44 = vadd.f32 %v3154_v9, %v3143_v42  ;;  %v3164_v13 = vadd.f32 %v3161_v37, %v3158_v28 }
 0x2ef   : > { %v3171_v22 = vrot.slane %v3167_v5, 1  ;;  %v3180_v41 = vmul.f32 %v5743_v15, %v3089_v30  ;;  %v3181_v25 = vmul.f32 %v5743_v15, %v3090_v12  ;;  %v3182_v35 = vmul.f32 %v5743_v15, %v3091_v39 }
 0x2f0   : > { %v3172_v4 = vrot.slane %v3168_v0, 1  ;;  %v3165_v60 = vadd.f32 %v3162_v6, %v3159_v33  ;;  %v3166_v20 = vadd.f32 %v3163_v26, %v3160_v44  ;;  %v3355_v17 = vadd.f32 %v5849_v43, %v6103_v48 }
 0x2f1   : > { %v3177_v27 = vadd.f32 %v3171_v22, %v3164_v13  ;;  %v3186_v53 = vrot.slane %v3180_v41, 2  ;;  %v3187_v47 = vrot.slane %v3181_v25, 2  ;;  %v3189_v32 = vrot.slane %v3182_v35, 2 }
 0x2f2   : > { %v3173_v51 = vsel %vm874_vm0, %v3171_v22, %v3172_v4  ;;  %v3179_v31 = vadd.f32 %v3172_v4, %v3166_v20  ;;  %v3347_v55 = vadd.f32 %v6103_v48, %v5852_v8  ;;  %v3358_v29 = vadd.f32 %v5856_v59, %v6103_v48 }
 0x2f3   : > { %v3178_v3 = vadd.f32 %v3173_v51, %v3165_v60  ;;  %v3188_v15 = vsel %vm894_vm1, %v3186_v53, %v3187_v47  ;;  %v3190_v21 = vsel %vm894_vm1, %v3187_v47, %v3189_v32  ;;  %v3194_v10 = vadd.f32 %v3186_v53, %v3177_v27 }
 0x2f4   : > { %v3350_v43 = vadd.f32 %v6103_v48, %v5860_v46  ;;  %v3196_v36 = vadd.f32 %v3190_v21, %v3179_v31  ;;  %v3963_v63 = vpack.c.bf16 %v3358_v29, %v3355_v17  ;;  %v3371_v62 = vadd.f32 %v5996_v11, %v6103_v48 }
 0x2f5   : > { %v3195_v24 = vadd.f32 %v3188_v15, %v3178_v3  ;;  %v3197_v8 = vadd.f32 %v5840_v38, %v3194_v10  ;;  %v3363_v61 = vadd.f32 %v6103_v48, %v5999_v54  ;;  %v3374_v46 = vadd.f32 %v6006_v57, %v6103_v48 }
 0x2f6   : > { %v4172_v34 = vpop.f32.mrb[8].mxu1  ;;  %v3958_v56 = vpack.c.bf16 %v3350_v43, %v3347_v55  ;;  %v3633_v59 = vadd.f32 %v3350_v43, %v3347_v55  ;;  %v3199_v40 = vadd.f32 %v5840_v38, %v3196_v36  ;;  %4035 = vst [vmem:[%s6128_s16 + $0x8] sm:$0xff] %v3963_v63   ;;  %v3366_v11 = vadd.f32 %v6103_v48, %v6008_v58 }
 0x2f7   : > { %v3378_v18 = vpop.f32.mrb[9].mxu1  ;;  %v3198_v1 = vadd.f32 %v5840_v38, %v3195_v24  ;;  %v3200_v54 = vmax.f32 %v3197_v8, 0.0  ;;  %v3387_v38 = vadd.f32 %v4172_v34, %v6103_v48  ;;  %v3973_v45 = vpack.c.bf16 %v3374_v46, %v3371_v62 }
 0x2f8   : > { %v4173_v30 = vpop.f32.mrb[10].mxu1  ;;  %3959 = vst [vmem:[%s6128_s16] sm:$0xff] %v3958_v56   ;;  %v3634_v12 = vadd.f32 %v3633_v59, %v3355_v17  ;;  %v3202_v49 = vmax.f32 %v3199_v40, 0.0  ;;  %v3968_v42 = vpack.c.bf16 %v3366_v11, %v3363_v61  ;;  %v3379_v57 = vadd.f32 %v6103_v48, %v3378_v18 }
 0x2f9   : > { %v3381_v16 = vpop.f32.mrb[11].mxu1  ;;  %v3201_v23 = vmax.f32 %v3198_v1, 0.0  ;;  %v3390_v58 = vadd.f32 %v4173_v30, %v6103_v48  ;;  %4037 = vst [vmem:[%s6128_s16 + $0x18] sm:$0xff] %v3973_v45  }
 0x2fa   : > { %v3635_v52 = vadd.f32 %v3634_v12, %v3358_v29  ;;  %v3382_v50 = vadd.f32 %v6103_v48, %v3381_v16  ;;  %v3204_v2 = vpack.c.bf16 %v3202_v49, %v3202_v49  ;;  %4036 = vst [vmem:[%s6128_s16 + $0x10] sm:$0xff] %v3968_v42  }
 0x2fb   : > { %v3203_v7 = vpack.c.bf16 %v3201_v23, %v3200_v54  ;;  %v3983_v39 = vpack.c.bf16 %v3390_v58, %v3387_v38 }
 0x2fc   : > { %v3636_v37 = vadd.f32 %v3635_v52, %v3363_v61  ;;  %v3978_v28 = vpack.c.bf16 %v3382_v50, %v3379_v57  ;;  %v3214_v5 = vshrl.u32 %v3204_v2, 16  ;;  %v3217_v19 = vshll.u32 %v3204_v2, 16 }
 0x2fd   : > { %v3206_v6 = vshrl.u32 %v3203_v7, 16  ;;  %v3209_v26 = vshll.u32 %v3203_v7, 16  ;;  %4039 = vst [vmem:[%s6128_s16 + $0x28] sm:$0xff] %v3983_v39  }
 0x2fe   : > { %v3637_v14 = vadd.f32 %v3636_v37, %v3366_v11  ;;  %4038 = vst [vmem:[%s6128_s16 + $0x20] sm:$0xff] %v3978_v28   ;;  %v3216_v33 = vrot.slane %v3214_v5, 3  ;;  %v3219_v44 = vrot.slane %v3217_v19, 4 }
 0x2ff   : > { %v3208_v9 = vrot.slane %v3206_v6, 3  ;;  %v3211_v0 = vrot.slane %v3209_v26, 4 }
 0x300   : > { %v3638_v13 = vadd.f32 %v3637_v14, %v3371_v62  ;;  %v3220_v4 = vor.u32 %v3219_v44, %v3216_v33 }
 0x301   : > { %v3212_v22 = vor.u32 %v3211_v0, %v3208_v9 }
 0x302   : > { %v3639_v41 = vadd.f32 %v3638_v13, %v3374_v46 }
 0x303   : > { %v3221_v25 = vsel %vm1016_vm2, %v3212_v22, %v3220_v4 }
 0x304   : > { %4191 = vmatmul.mubr.bf16.gmra.mrb[28].mxu1 %v3221_v25  ;;  %v3640_v35 = vadd.f32 %v3639_v41, %v3379_v57 }
 0x306   : > { %v3641_v60 = vadd.f32 %v3640_v35, %v3382_v50 }
 0x308   : > { %v3642_v20 = vadd.f32 %v3641_v60, %v3387_v38 }
 0x30a   : > { %v3643_v27 = vadd.f32 %v3642_v20, %v3390_v58 }
 0x321   : > { %v4176_v17 = vpop.f32.mrb[12].mxu1 }
 0x322   : > { %v3394_v51 = vpop.f32.mrb[13].mxu1  ;;  %v3403_v32 = vadd.f32 %v4176_v17, %v6103_v48 }
 0x323   : > { %v3395_v53 = vadd.f32 %v6103_v48, %v3394_v51  ;;  %v4177_v47 = vpop.f32.mrb[14].mxu1 }
 0x324   : > { %v3406_v3 = vadd.f32 %v4177_v47, %v6103_v48  ;;  %v3397_v31 = vpop.f32.mrb[15].mxu1 }
 0x325   : > { %v3644_v55 = vadd.f32 %v3643_v27, %v3395_v53  ;;  %v3398_v29 = vadd.f32 %v6103_v48, %v3397_v31 }
 0x326   : > { %v3993_v15 = vpack.c.bf16 %v3406_v3, %v3403_v32 }
 0x327   : > { %v3988_v21 = vpack.c.bf16 %v3398_v29, %v3395_v53  ;;  %v3645_v10 = vadd.f32 %v3644_v55, %v3398_v29 }
 0x328   : > { %4041 = vst [vmem:[%s6128_s16 + $0x38] sm:$0xff] %v3993_v15  }
 0x329   : > { %4040 = vst [vmem:[%s6128_s16 + $0x30] sm:$0xff] %v3988_v21   ;;  %v3646_v43 = vadd.f32 %v3645_v10, %v3403_v32 }
 0x32b   : > { %v3647_v24 = vadd.f32 %v3646_v43, %v3406_v3 }
 0x34f   : > { %v4180_v36 = vpop.f32.mrb[16].mxu1 }
 0x350   : > { %v3410_v63 = vpop.f32.mrb[17].mxu1  ;;  %v3419_v8 = vadd.f32 %v4180_v36, %v6103_v48 }
 0x351   : > { %v3411_v62 = vadd.f32 %v6103_v48, %v3410_v63  ;;  %v4181_v34 = vpop.f32.mrb[18].mxu1 }
 0x352   : > { %v3422_v56 = vadd.f32 %v4181_v34, %v6103_v48  ;;  %v3413_v59 = vpop.f32.mrb[19].mxu1 }
 0x353   : > { %v3648_v61 = vadd.f32 %v3647_v24, %v3411_v62  ;;  %v3414_v18 = vadd.f32 %v6103_v48, %v3413_v59 }
 0x354   : > { %v4003_v1 = vpack.c.bf16 %v3422_v56, %v3419_v8 }
 0x355   : > { %v3998_v40 = vpack.c.bf16 %v3414_v18, %v3411_v62  ;;  %v3649_v46 = vadd.f32 %v3648_v61, %v3414_v18 }
 0x356   : > { %4043 = vst [vmem:[%s6128_s16 + $0x48] sm:$0xff] %v4003_v1  }
 0x357   : > { %4042 = vst [vmem:[%s6128_s16 + $0x40] sm:$0xff] %v3998_v40   ;;  %v3650_v11 = vadd.f32 %v3649_v46, %v3419_v8 }
 0x359   : > { %v3651_v30 = vadd.f32 %v3650_v11, %v3422_v56 }
 0x37c   : > { %v4184_v54 = vpop.f32.mrb[20].mxu1 }
 0x37d   : > { %v3426_v12 = vpop.f32.mrb[21].mxu1  ;;  %v3435_v23 = vadd.f32 %v4184_v54, %v6103_v48 }
 0x37e   : > { %v3427_v38 = vadd.f32 %v6103_v48, %v3426_v12  ;;  %v4185_v16 = vpop.f32.mrb[22].mxu1 }
 0x37f   : > { %v3438_v49 = vadd.f32 %v4185_v16, %v6103_v48  ;;  %v3429_v45 = vpop.f32.mrb[23].mxu1 }
 0x380   : > { %v3652_v42 = vadd.f32 %v3651_v30, %v3427_v38  ;;  %v3430_v52 = vadd.f32 %v6103_v48, %v3429_v45 }
 0x381   : > { %v4013_v57 = vpack.c.bf16 %v3438_v49, %v3435_v23 }
 0x382   : > { %v4008_v58 = vpack.c.bf16 %v3430_v52, %v3427_v38  ;;  %v3653_v50 = vadd.f32 %v3652_v42, %v3430_v52 }
 0x383   : > { %4045 = vst [vmem:[%s6128_s16 + $0x58] sm:$0xff] %v4013_v57  }
 0x384   : > { %4044 = vst [vmem:[%s6128_s16 + $0x50] sm:$0xff] %v4008_v58   ;;  %v3654_v7 = vadd.f32 %v3653_v50, %v3435_v23 }
 0x386   : > { %v3655_v2 = vadd.f32 %v3654_v7, %v3438_v49 }
 0x3aa   : > { %v4188_v37 = vpop.f32.mrb[24].mxu1 }
 0x3ab   : > { %v3442_v39 = vpop.f32.mrb[25].mxu1  ;;  %v3451_v26 = vadd.f32 %v4188_v37, %v6103_v48 }
 0x3ac   : > { %v3443_v28 = vadd.f32 %v6103_v48, %v3442_v39  ;;  %v4189_v6 = vpop.f32.mrb[26].mxu1 }
 0x3ad   : > { %v3454_v5 = vadd.f32 %v4189_v6, %v6103_v48  ;;  %v3445_v19 = vpop.f32.mrb[27].mxu1 }
 0x3ae   : > { %v3656_v14 = vadd.f32 %v3655_v2, %v3443_v28  ;;  %v3446_v9 = vadd.f32 %v6103_v48, %v3445_v19 }
 0x3af   : > { %v4023_v0 = vpack.c.bf16 %v3454_v5, %v3451_v26 }
 0x3b0   : > { %v4018_v33 = vpack.c.bf16 %v3446_v9, %v3443_v28  ;;  %v3657_v44 = vadd.f32 %v3656_v14, %v3446_v9 }
 0x3b1   : > { %4047 = vst [vmem:[%s6128_s16 + $0x68] sm:$0xff] %v4023_v0  }
 0x3b2   : > { %4046 = vst [vmem:[%s6128_s16 + $0x60] sm:$0xff] %v4018_v33   ;;  %v3658_v13 = vadd.f32 %v3657_v44, %v3451_v26 }
 0x3b4   : > { %v3659_v22 = vadd.f32 %v3658_v13, %v3454_v5 }
 0x3d7   : > { %v4192_v4 = vpop.f32.mrb[28].mxu1 }
 0x3d8   : > { %v3458_v41 = vpop.f32.mrb[29].mxu1  ;;  %v3467_v60 = vadd.f32 %v4192_v4, %v6103_v48 }
 0x3d9   : > { %v3459_v25 = vadd.f32 %v6103_v48, %v3458_v41  ;;  %v4193_v35 = vpop.f32.mrb[30].mxu1 }
 0x3da   : > { %v3470_v20 = vadd.f32 %v4193_v35, %v6103_v48  ;;  %v3461_v27 = vpop.f32.mrb[31].mxu1 }
 0x3db   : > { %v3660_v17 = vadd.f32 %v3659_v22, %v3459_v25  ;;  %v3462_v51 = vadd.f32 %v6103_v48, %v3461_v27 }
 0x3dc   : > { %v4033_v53 = vpack.c.bf16 %v3470_v20, %v3467_v60 }
 0x3dd   : > { %v4028_v47 = vpack.c.bf16 %v3462_v51, %v3459_v25  ;;  %v3661_v32 = vadd.f32 %v3660_v17, %v3462_v51 }
 0x3de   : > { %4049 = vst [vmem:[%s6128_s16 + $0x78] sm:$0xff] %v4033_v53  }
 0x3df   : > { %4048 = vst [vmem:[%s6128_s16 + $0x70] sm:$0xff] %v4028_v47   ;;  %v3662_v3 = vadd.f32 %v3661_v32, %v3467_v60 }
 0x3e0   : > { %4448 = shalt.err (!%p4445_p4)
}
 0x3e1   : > { %s4449_s27 = scalar_lea.hbm %s6178_s11, 2048  ;;  %s4453_s15 = scalar_lea.hbm %s6264_s7, 4096 }
 0x3e2   : > { %p4450_p9 = scmp.ne.s32.totalorder %s6178_s11, %s4449_s27  ;;  %p4454_p8 = scmp.lt.u32.totalorder %s6178_s11, %s6264_s7 }
 0x3e3   : > { %p4455_p13 = scmp.lt.u32.totalorder %s4453_s15, %s4449_s27  ;;  %p4457_p10 = scmp.lt.u32.totalorder %s4449_s27, %s6178_s11 }
 0x3e4   : > { %p4451_p0 = pnand %p4450_p9, %p4749_p5 }
 0x3e5   : > { %p4456_p6 = por %p4455_p13, %p4454_p8 }
 0x3e6   : > { %p4452_p11 = pneg %p4451_p0 }
 0x3e7   : > { %p4458_p3 = por %p4457_p10, %p4456_p6 }
 0x3e9   : > { %p4459_p7 = pnand %p4458_p3, %p4452_p11 }
 0x3eb   : > { %4462 = shalt.err (!%p4459_p7)
}
 0x3ec   : > { %s4553_s26 = smov 64   ;;  %s4554_s1 = smov 4   ;;  %v3663_v48 = vadd.f32 %v3662_v3, %v3470_v20 }
 0x3ed   : > { %4208 = dma.vmem_to_hbm [thread:$0]  (%p4749_p5), %s6180_s22, 2048, %s6178_s11, %s3672_s13, %s4553_s26, %s4553_s26, %s4554_s1  }
 0x3ee   : > { %v3664_v31 = vrot.slane %v3663_v48, 4  ;;  %s3918_s14 = sshll.u32 %s4622_s9, 4  ;;  %s377_s17 = scalar_lea.vmem [#allocation13], %s4800_s24 }
 0x3ef   : > { %s3705_s23 = sshll.u32 %s377_s17, 4  ;;  %s6213_s10 = scalar_lea.hbm %s6265_s8, %s3918_s14  ;;  %s6215_s23 = int_to_ptr.vmem [resolvable:$true] %s3705_s23 }
 0x3f0   : > { %v3665_v55 = vadd.f32 %v3664_v31, %v3663_v48  ;;  %s3677_s22 = scalar_lea.sflag [#allocation14], %s4800_s24  ;;  %s4463_s11 = scalar_lea.vmem %s6215_s23, 16 }
 0x3f1   : > { %p4464_p12 = scmp.ne.s32.totalorder %s6215_s23, %s4463_s11  ;;  %s4555_s9 = smov [#allocation13]  }
 0x3f2   : > { %v3666_v29 = vrot.slane %v3665_v55, 2  ;;  %s4467_s13 = sshll.u32 %s4555_s9, 4  ;;  %s4468_s13 = int_to_ptr.vmem [resolvable:$false] %s4467_s13 }
 0x3f3   : > { %p4465_p1 = pnand %p4464_p12, %p4749_p5  ;;  %s4469_s20 = scalar_lea.vmem %s4468_s13, 32 }
 0x3f4   : > { %v3667_v15 = vadd.f32 %v3666_v29, %v3665_v55  ;;  %p4470_p4 = scmp.lt.s32.totalorder %s6215_s23, %s4468_s13  ;;  %p4471_p9 = scmp.lt.s32.totalorder %s4469_s20, %s4463_s11 }
 0x3f5   : > { %p4466_p2 = pneg %p4465_p1 }
 0x3f6   : > { %v3668_v21 = vrot.slane %v3667_v15, 1  ;;  %p4472_p0 = por %p4471_p9, %p4470_p4 }
 0x3f8   : > { %v3669_v10 = vadd.f32 %v3668_v21, %v3667_v15  ;;  %p4473_p11 = pnand %p4472_p0, %p4466_p2 }
 0x3fa   : > { %3670 = vst [vmem:[%s377_s17] sm:$0x1] %v3669_v10 }
 0x3fb   : > { %4476 = shalt.err (!%p4473_p11)
}
 0x3fc   : > { %s4477_s24 = scalar_lea.hbm %s6213_s10, 16  ;;  %s4481_s21 = scalar_lea.hbm %s6265_s8, 32 }
 0x3fd   : > { %p4478_p8 = scmp.ne.s32.totalorder %s6213_s10, %s4477_s24  ;;  %p4482_p10 = scmp.lt.u32.totalorder %s6213_s10, %s6265_s8 }
 0x3fe   : > { %p4483_p3 = scmp.lt.u32.totalorder %s4481_s21, %s4477_s24  ;;  %p4485_p12 = scmp.lt.u32.totalorder %s4477_s24, %s6213_s10 }
 0x3ff   : > { %p4479_p13 = pnand %p4478_p8, %p4749_p5 }
 0x400   : > { %p4484_p7 = por %p4483_p3, %p4482_p10 }
 0x401   : > { %p4480_p6 = pneg %p4479_p13 }
 0x402   : > { %p4486_p1 = por %p4485_p12, %p4484_p7 }
 0x404   : > { %p4487_p2 = pnand %p4486_p1, %p4480_p6 }
 0x406   : > { %4490 = shalt.err (!%p4487_p2)
}
 0x407   : > { %4209 = dma.vmem_to_hbm [thread:$0]  (%p4749_p5), %s6215_s23, 16, %s6213_s10, %s3677_s22  }
 0x408 PF: > { %s6352_s14 = sld [smem:[#allocation20_spill]]  ;;  %s6353_s17 = sld [smem:[#allocation21_spill]] }
 0x409   : > { %p6355_p9 = scmp.ge.s32.totalorder %s4541_s30, 2 }
 0x40e   : > { %s3717_s18 = sand.u32 1, %s6352_s14   ;;  %p6354_p4 = scmp.ne.s32.totalorder %s6353_s17, 0 }
 0x40f   : > { %s3718_s27 = scalar_lea.sflag [#allocation6], %s3717_s18 }
 0x410   : > { %p4227_p0 = pnand %p6355_p9, %p6354_p4 }
 0x412   : > { %4520 = dma.done.wait (!%p4227_p0), %s3718_s27, 2048  }
 0x413   : > { %4522 = vsyncadd (!%p4227_p0), %s3718_s27, 4294965248  ;;  %s3727_s11 = scalar_lea.sflag [#allocation14], %s3717_s18 }
 0x414   : > { %4524 = dma.done.wait (!%p4227_p0), %s3727_s11, 16  }
 0x415   : > { %4526 = vsyncadd (!%p4227_p0), %s3727_s11, 4294967280  ;;  %p27_p5 = scmp.ge.s32.totalorder %s4714_s25, 4   ;;  %s6356_s27 = smov %s4533_s28 }
 0x416   : > { %s6357_s28 = smov %s4537_s29  ;;  %s6358_s29 = smov %s4745_s19 }
 0x417   : > { %s6359_s30 = smov %s4714_s25  ;;  %29 = sbr.rel (!%p27_p5) target bundleno = 11 (0xb), region = 154 }
 0x41e   :  { %3731 = vsyncpa [#allocation5], 1 }
 0x41f   :  { %3733 = vsyncpa [#allocation5 + $0x1], 1 }
 0x420   :  { %3734 = vsyncpa [#allocation8], 1 }
 0x421   :  { %3735 = vsyncpa [#allocation11], 1 }
 0x422   :  { %3736 = vsyncpa [#allocation6], 1 }
 0x423   :  { %3738 = vsyncpa [#allocation6 + $0x1], 1 }
 0x424   :  { %3739 = vsyncpa [#allocation14], 1 }
 0x425   :  { %3741 = vsyncpa [#allocation14 + $0x1], 1 }

</bundles_post_ra>
